<compile_context>
chip_gen: v5e
topology: v5e:2x2
jax: 0.10.0
libtpu: 0.0.40
codegen_flags: <defaults>
</compile_context>

<pallas_src>
import functools

import jax
import jax.numpy as jnp
from jax.experimental import pallas as pl
from jax.experimental.pallas import tpu as pltpu


def _round_up(x, m):
    return ((x + m - 1) // m) * m


def _vmem_capacity_bytes():
    try:
        cap = getattr(pltpu.get_tpu_info(), "vmem_capacity_bytes", None)
        if cap:
            return int(cap)
    except Exception:
        pass
    return 64 * 2 ** 20          # conservative (v7x-sized) fallback


# ----------------------------- Pallas kernel --------------------------------
def _conv_elu_kernel(x_ref, w_ref, b_ref, o_ref, slab_ref, *,
                     K, S, D, TH, W_out, C, KKC):
    # x_ref:    (R, Wp, C)   bf16  pre-overlapped, zero-padded NHWC input tile
    # w_ref:    (KKCp, OC)   bf16  weights, rows ordered (kh, kw, c)
    # b_ref:    (1, OC)      f32   bias
    # o_ref:    (TM, OC)     bf16  output tile (TM = TH * W_out, unpadded OC)
    # slab_ref: (TM, KKCp)   bf16  im2col slab (VMEM scratch)
    TM = TH * W_out
    KKCp = slab_ref.shape[1]
    row_span = (TH - 1) * S + 1
    col_span = (W_out - 1) * S + 1

    if KKCp > KKC:
        # Zero the contraction padding lanes (weight pad rows are also zero).
        slab_ref[:, KKC:KKCp] = jnp.zeros((TM, KKCp - KKC), slab_ref.dtype)

    # Fold (kh, kw) onto the contraction axis: K*K shifted bf16 copies into
    # the slab, then a single big-K MXU matmul with f32 accumulation (no
    # per-(kh,kw) partials, no f32 accumulator read-modify-write sweeps).
    for kh in range(K):
        for kw in range(K):
            xs = x_ref[kh * D: kh * D + row_span, kw * D: kw * D + col_span, :]
            if S > 1:                     # untested S>1 path (module default S=1)
                xs = xs[::S, ::S, :]
            j = kh * K + kw
            slab_ref[:, j * C:(j + 1) * C] = xs.reshape(TM, C)

    acc = jnp.dot(slab_ref[...], w_ref[...], preferred_element_type=jnp.float32)
    acc = acc + b_ref[...]
    # ELU (alpha = 1): x if x > 0 else exp(x) - 1 (clamped so the untaken
    # branch never produces inf on the EUP).
    o_ref[...] = jnp.where(
        acc > 0, acc, jnp.exp(jnp.minimum(acc, 0.0)) - 1.0).astype(o_ref.dtype)


# ------------------------------ Conv module ---------------------------------
def init_conv_params(key, in_ch, out_ch, K=3):
    """Kaiming normal (a=0, fan_in=in_ch*K*K), bias=0 — matches weights_init('kaiming')."""
    fan_in = in_ch * K * K
    std = (2.0 / fan_in) ** 0.5
    w = jax.random.normal(key, (out_ch, in_ch, K, K), dtype=jnp.float32) * std
    b = jnp.zeros((out_ch,), dtype=jnp.float32)
    return w, b


def conv_forward_nhwc(x_nhwc, weight, bias, *, K=3, S=1, P=1, D=1,
                      out_dtype=jnp.bfloat16, target_rows=None):
    """Fused Conv2d(K,S,P,D) + ELU on NHWC input; returns (N, H_out, W_out, OC)."""
    N, H, W, C = x_nhwc.shape
    OC = weight.shape[0]
    H_out = (H + 2 * P - D * (K - 1) - 1) // S + 1
    W_out = (W + 2 * P - D * (K - 1) - 1) // S + 1

    KKC = K * K * C
    # Pad the folded contraction: full 128 lanes for tiny-C first layers,
    # otherwise just sublane granularity (avoid wasted MXU columns).
    KKCp = _round_up(KKC, 128) if KKC < 128 else _round_up(KKC, 8)

    vmem_cap = _vmem_capacity_bytes()
    vmem_budget = max(vmem_cap // 2, 24 * 2 ** 20)
    if target_rows is None:
        # Bigger tiles on 128-MiB-VMEM parts (v5e/v6e); smaller on v7x so both
        # TensorCores get work and the 64 MiB VMEM budget is respected.
        target_rows = 1024 if vmem_cap > 64 * 2 ** 20 else 512

    Wp = W + 2 * P

    def _plan(rows):
        TH = max(1, min(H_out, rows // max(1, W_out)))
        # output block sublane dim must be a multiple of 8 unless full-extent
        while TH < H_out and (TH * W_out) % 8 != 0:
            TH += 1
        if (TH * W_out) % 8 != 0:
            TH = H_out
        TM = TH * W_out
        R = (TH - 1) * S + D * (K - 1) + 1       # input rows per overlapped tile
        est = (2 * R * Wp * C * 2                # double-buffered input tile (bf16)
               + 2 * KKCp * OC * 2               # resident weights
               + 2 * OC * 4                      # bias
               + 2 * TM * OC * 2                 # double-buffered output tile (bf16)
               + TM * KKCp * 2                   # im2col slab scratch
               + 3 * TM * OC * 4                 # f32 matmul result / ELU temps
               + 4 * TM * C * 2)                 # slab-build slice temporaries
        return TH, TM, R, est

    TH, TM, R, est = _plan(target_rows)
    while 2 * est > vmem_budget and target_rows > max(8, W_out):
        target_rows //= 2
        TH, TM, R, est = _plan(target_rows)

    n_tiles = -(-H_out // TH)                    # cdiv
    vmem_limit = int(min(vmem_budget, max(2 * est, 16 * 2 ** 20)))

    # --- padded bf16 NHWC input, pre-overlapped row tiles (no halo stream) ----
    Hp = max(H + 2 * P, (n_tiles - 1) * TH * S + R)
    x_pad = jnp.pad(x_nhwc, ((0, 0), (P, Hp - H - P), (P, P), (0, 0)))
    x_pad = x_pad.astype(jnp.bfloat16)
    x_tiles = jnp.stack(
        [x_pad[:, i * TH * S: i * TH * S + R] for i in range(n_tiles)],
        axis=1)                                  # (N, n_tiles, R, Wp, C)

    # --- weights: rows ordered (kh, kw, c), zero-padded to KKCp; f32 bias -----
    w_mat = jnp.transpose(weight, (2, 3, 1, 0)).reshape(KKC, OC)
    w_mat = jnp.pad(w_mat, ((0, KKCp - KKC), (0, 0))).astype(jnp.bfloat16)
    b_row = bias.reshape(1, OC).astype(jnp.float32)

    kernel = functools.partial(_conv_elu_kernel, K=K, S=S, D=D, TH=TH,
                               W_out=W_out, C=C, KKC=KKC)

    out = pl.pallas_call(
        kernel,
        out_shape=jax.ShapeDtypeStruct((N, n_tiles * TM, OC), out_dtype),
        grid=(N, n_tiles),
        in_specs=[
            pl.BlockSpec((None, None, R, Wp, C), lambda n, i: (n, i, 0, 0, 0)),
            pl.BlockSpec((KKCp, OC), lambda n, i: (0, 0)),   # resident weights
            pl.BlockSpec((1, OC), lambda n, i: (0, 0)),      # resident bias
        ],
        out_specs=pl.BlockSpec((None, TM, OC), lambda n, i: (n, i, 0)),
        scratch_shapes=[pltpu.VMEM((TM, KKCp), jnp.bfloat16)],
        compiler_params=pltpu.CompilerParams(
            dimension_semantics=("parallel", "parallel"),
            vmem_limit_bytes=vmem_limit,
        ),
    )(x_tiles, w_mat, b_row)

    # strip row padding (when H_out % TH != 0); output stays unpadded in OC
    return out.reshape(N, n_tiles * TH, W_out, OC)[:, :H_out]


def conv_forward(x, weight, bias, *, K=3, S=1, P=1, D=1,
                 out_dtype=jnp.bfloat16, target_rows=None):
    """PyTorch-interface wrapper: x (N, C, H, W) -> (N, OC, H_out, W_out).

    For a chain of DeepFill convs, call conv_forward_nhwc directly with bf16
    NHWC activations to avoid per-layer transpose/cast HBM traffic.
    """
    x_nhwc = jnp.transpose(x, (0, 2, 3, 1))
    out = conv_forward_nhwc(x_nhwc, weight, bias, K=K, S=S, P=P, D=D,
                            out_dtype=out_dtype, target_rows=target_rows)
    return jnp.transpose(out, (0, 3, 1, 2))


# --------------------------------- main --------------------------------------
if __name__ == "__main__":
    key = jax.random.PRNGKey(0)
    k_x, k_w = jax.random.split(key)

    N, C, H, W = 2, 4, 16, 16
    OC, K, S, P, D = 8, 3, 1, 1, 1

    x = jax.random.normal(k_x, (N, C, H, W), dtype=jnp.float32)
    weight, bias = init_conv_params(k_w, C, OC, K)

    fwd = jax.jit(functools.partial(conv_forward, K=K, S=S, P=P, D=D))
    y = fwd(x, weight, bias)
    jax.block_until_ready(y)

    # Reference: f32 lax conv on bf16-rounded operands (kernel matmul is
    # bf16 x bf16 with f32 accumulation), bias + ELU; kernel output is bf16.
    x_bf = x.astype(jnp.bfloat16).astype(jnp.float32)
    w_bf = weight.astype(jnp.bfloat16).astype(jnp.float32)
    y_ref = jax.lax.conv_general_dilated(
        x_bf, w_bf, window_strides=(S, S), padding=[(P, P), (P, P)],
        rhs_dilation=(D, D), dimension_numbers=("NCHW", "OIHW", "NCHW"),
    ) + bias.reshape(1, OC, 1, 1)
    y_ref = jnp.where(y_ref > 0, y_ref, jnp.exp(y_ref) - 1.0)

    assert y.shape == (N, OC, H, W), y.shape
    y_f32 = y.astype(jnp.float32)
    err = float(jnp.max(jnp.abs(y_f32 - y_ref)))
    assert jnp.allclose(y_f32, y_ref, atol=3e-2, rtol=3e-2), err

    print("KERNEL_OK")
</pallas_src>

<mosaic_0001>
module attributes {stable_mosaic.version = 11 : i64} {
  func.func @_conv_elu_kernel(%arg0: i32, %arg1: i32, %arg2: memref<1x1x18x18x4xbf16, #tpu.memory_space<vmem>>, %arg3: memref<128x8xbf16, #tpu.memory_space<vmem>>, %arg4: memref<1x8xf32, #tpu.memory_space<vmem>>, %arg5: memref<1x256x8xbf16, #tpu.memory_space<vmem>>, %arg6: memref<256x128xbf16, #tpu.memory_space<vmem>>) attributes {dimension_semantics = [#tpu.dimension_semantics<parallel>, #tpu.dimension_semantics<parallel>], iteration_bounds = array<i64: 2, 1>, scalar_prefetch = 0 : i64, scratch_operands = 1 : i64, tpu.core_type = #tpu.core_type<tc>, window_params = [{transform_indices = @transform_0, window_bounds = array<i64: 1, 1, 18, 18, 4>}, {pipeline_mode = #tpu.pipeline_mode<synchronous>, transform_indices = @transform_1, window_bounds = array<i64: 128, 8>}, {pipeline_mode = #tpu.pipeline_mode<synchronous>, transform_indices = @transform_2, window_bounds = array<i64: 1, 8>}, {transform_indices = @transform_3, window_bounds = array<i64: 1, 256, 8>}]} {
    %cst = arith.constant 0.000000e+00 : bf16
    %0 = vector.broadcast %cst : bf16 to vector<256x92xbf16>
    %c0 = arith.constant 0 : index
    %c36 = arith.constant 36 : index
    %1 = vector.load %arg6[%c0, %c36] : memref<256x128xbf16, #tpu.memory_space<vmem>>, vector<256x92xbf16>
    tpu.vector_store %arg6[%c0, %c36], %0 {strides = array<i32>} : memref<256x128xbf16, #tpu.memory_space<vmem>>, vector<256x92xbf16>,
    %c0_0 = arith.constant 0 : index
    %c0_1 = arith.constant 0 : index
    %c0_2 = arith.constant 0 : index
    %c0_3 = arith.constant 0 : index
    %c0_4 = arith.constant 0 : index
    %2 = vector.load %arg2[%c0_0, %c0_1, %c0_2, %c0_3, %c0_4] : memref<1x1x18x18x4xbf16, #tpu.memory_space<vmem>>, vector<1x1x16x16x4xbf16>
    %3 = vector.shape_cast %2 : vector<1x1x16x16x4xbf16> to vector<16x16x4xbf16>
    %4 = vector.shape_cast %3 : vector<16x16x4xbf16> to vector<256x4xbf16>
    %c0_5 = arith.constant 0 : index
    %c0_6 = arith.constant 0 : index
    %5 = vector.load %arg6[%c0_5, %c0_6] : memref<256x128xbf16, #tpu.memory_space<vmem>>, vector<256x4xbf16>
    tpu.vector_store %arg6[%c0_5, %c0_6], %4 {strides = array<i32>} : memref<256x128xbf16, #tpu.memory_space<vmem>>, vector<256x4xbf16>,
    %c0_7 = arith.constant 0 : index
    %c0_8 = arith.constant 0 : index
    %c0_9 = arith.constant 0 : index
    %c1 = arith.constant 1 : index
    %c0_10 = arith.constant 0 : index
    %6 = vector.load %arg2[%c0_7, %c0_8, %c0_9, %c1, %c0_10] : memref<1x1x18x18x4xbf16, #tpu.memory_space<vmem>>, vector<1x1x16x16x4xbf16>
    %7 = vector.shape_cast %6 : vector<1x1x16x16x4xbf16> to vector<16x16x4xbf16>
    %8 = vector.shape_cast %7 : vector<16x16x4xbf16> to vector<256x4xbf16>
    %c0_11 = arith.constant 0 : index
    %c4 = arith.constant 4 : index
    %9 = vector.load %arg6[%c0_11, %c4] : memref<256x128xbf16, #tpu.memory_space<vmem>>, vector<256x4xbf16>
    tpu.vector_store %arg6[%c0_11, %c4], %8 {strides = array<i32>} : memref<256x128xbf16, #tpu.memory_space<vmem>>, vector<256x4xbf16>,
    %c0_12 = arith.constant 0 : index
    %c0_13 = arith.constant 0 : index
    %c0_14 = arith.constant 0 : index
    %c2 = arith.constant 2 : index
    %c0_15 = arith.constant 0 : index
    %10 = vector.load %arg2[%c0_12, %c0_13, %c0_14, %c2, %c0_15] : memref<1x1x18x18x4xbf16, #tpu.memory_space<vmem>>, vector<1x1x16x16x4xbf16>
    %11 = vector.shape_cast %10 : vector<1x1x16x16x4xbf16> to vector<16x16x4xbf16>
    %12 = vector.shape_cast %11 : vector<16x16x4xbf16> to vector<256x4xbf16>
    %c0_16 = arith.constant 0 : index
    %c8 = arith.constant 8 : index
    %13 = vector.load %arg6[%c0_16, %c8] : memref<256x128xbf16, #tpu.memory_space<vmem>>, vector<256x4xbf16>
    tpu.vector_store %arg6[%c0_16, %c8], %12 {strides = array<i32>} : memref<256x128xbf16, #tpu.memory_space<vmem>>, vector<256x4xbf16>,
    %c0_17 = arith.constant 0 : index
    %c0_18 = arith.constant 0 : index
    %c1_19 = arith.constant 1 : index
    %c0_20 = arith.constant 0 : index
    %c0_21 = arith.constant 0 : index
    %14 = vector.load %arg2[%c0_17, %c0_18, %c1_19, %c0_20, %c0_21] : memref<1x1x18x18x4xbf16, #tpu.memory_space<vmem>>, vector<1x1x16x16x4xbf16>
    %15 = vector.shape_cast %14 : vector<1x1x16x16x4xbf16> to vector<16x16x4xbf16>
    %16 = vector.shape_cast %15 : vector<16x16x4xbf16> to vector<256x4xbf16>
    %c0_22 = arith.constant 0 : index
    %c12 = arith.constant 12 : index
    %17 = vector.load %arg6[%c0_22, %c12] : memref<256x128xbf16, #tpu.memory_space<vmem>>, vector<256x4xbf16>
    tpu.vector_store %arg6[%c0_22, %c12], %16 {strides = array<i32>} : memref<256x128xbf16, #tpu.memory_space<vmem>>, vector<256x4xbf16>,
    %c0_23 = arith.constant 0 : index
    %c0_24 = arith.constant 0 : index
    %c1_25 = arith.constant 1 : index
    %c1_26 = arith.constant 1 : index
    %c0_27 = arith.constant 0 : index
    %18 = vector.load %arg2[%c0_23, %c0_24, %c1_25, %c1_26, %c0_27] : memref<1x1x18x18x4xbf16, #tpu.memory_space<vmem>>, vector<1x1x16x16x4xbf16>
    %19 = vector.shape_cast %18 : vector<1x1x16x16x4xbf16> to vector<16x16x4xbf16>
    %20 = vector.shape_cast %19 : vector<16x16x4xbf16> to vector<256x4xbf16>
    %c0_28 = arith.constant 0 : index
    %c16 = arith.constant 16 : index
    %21 = vector.load %arg6[%c0_28, %c16] : memref<256x128xbf16, #tpu.memory_space<vmem>>, vector<256x4xbf16>
    tpu.vector_store %arg6[%c0_28, %c16], %20 {strides = array<i32>} : memref<256x128xbf16, #tpu.memory_space<vmem>>, vector<256x4xbf16>,
    %c0_29 = arith.constant 0 : index
    %c0_30 = arith.constant 0 : index
    %c1_31 = arith.constant 1 : index
    %c2_32 = arith.constant 2 : index
    %c0_33 = arith.constant 0 : index
    %22 = vector.load %arg2[%c0_29, %c0_30, %c1_31, %c2_32, %c0_33] : memref<1x1x18x18x4xbf16, #tpu.memory_space<vmem>>, vector<1x1x16x16x4xbf16>
    %23 = vector.shape_cast %22 : vector<1x1x16x16x4xbf16> to vector<16x16x4xbf16>
    %24 = vector.shape_cast %23 : vector<16x16x4xbf16> to vector<256x4xbf16>
    %c0_34 = arith.constant 0 : index
    %c20 = arith.constant 20 : index
    %25 = vector.load %arg6[%c0_34, %c20] : memref<256x128xbf16, #tpu.memory_space<vmem>>, vector<256x4xbf16>
    tpu.vector_store %arg6[%c0_34, %c20], %24 {strides = array<i32>} : memref<256x128xbf16, #tpu.memory_space<vmem>>, vector<256x4xbf16>,
    %c0_35 = arith.constant 0 : index
    %c0_36 = arith.constant 0 : index
    %c2_37 = arith.constant 2 : index
    %c0_38 = arith.constant 0 : index
    %c0_39 = arith.constant 0 : index
    %26 = vector.load %arg2[%c0_35, %c0_36, %c2_37, %c0_38, %c0_39] : memref<1x1x18x18x4xbf16, #tpu.memory_space<vmem>>, vector<1x1x16x16x4xbf16>
    %27 = vector.shape_cast %26 : vector<1x1x16x16x4xbf16> to vector<16x16x4xbf16>
    %28 = vector.shape_cast %27 : vector<16x16x4xbf16> to vector<256x4xbf16>
    %c0_40 = arith.constant 0 : index
    %c24 = arith.constant 24 : index
    %29 = vector.load %arg6[%c0_40, %c24] : memref<256x128xbf16, #tpu.memory_space<vmem>>, vector<256x4xbf16>
    tpu.vector_store %arg6[%c0_40, %c24], %28 {strides = array<i32>} : memref<256x128xbf16, #tpu.memory_space<vmem>>, vector<256x4xbf16>,
    %c0_41 = arith.constant 0 : index
    %c0_42 = arith.constant 0 : index
    %c2_43 = arith.constant 2 : index
    %c1_44 = arith.constant 1 : index
    %c0_45 = arith.constant 0 : index
    %30 = vector.load %arg2[%c0_41, %c0_42, %c2_43, %c1_44, %c0_45] : memref<1x1x18x18x4xbf16, #tpu.memory_space<vmem>>, vector<1x1x16x16x4xbf16>
    %31 = vector.shape_cast %30 : vector<1x1x16x16x4xbf16> to vector<16x16x4xbf16>
    %32 = vector.shape_cast %31 : vector<16x16x4xbf16> to vector<256x4xbf16>
    %c0_46 = arith.constant 0 : index
    %c28 = arith.constant 28 : index
    %33 = vector.load %arg6[%c0_46, %c28] : memref<256x128xbf16, #tpu.memory_space<vmem>>, vector<256x4xbf16>
    tpu.vector_store %arg6[%c0_46, %c28], %32 {strides = array<i32>} : memref<256x128xbf16, #tpu.memory_space<vmem>>, vector<256x4xbf16>,
    %c0_47 = arith.constant 0 : index
    %c0_48 = arith.constant 0 : index
    %c2_49 = arith.constant 2 : index
    %c2_50 = arith.constant 2 : index
    %c0_51 = arith.constant 0 : index
    %34 = vector.load %arg2[%c0_47, %c0_48, %c2_49, %c2_50, %c0_51] : memref<1x1x18x18x4xbf16, #tpu.memory_space<vmem>>, vector<1x1x16x16x4xbf16>
    %35 = vector.shape_cast %34 : vector<1x1x16x16x4xbf16> to vector<16x16x4xbf16>
    %36 = vector.shape_cast %35 : vector<16x16x4xbf16> to vector<256x4xbf16>
    %c0_52 = arith.constant 0 : index
    %c32 = arith.constant 32 : index
    %37 = vector.load %arg6[%c0_52, %c32] : memref<256x128xbf16, #tpu.memory_space<vmem>>, vector<256x4xbf16>
    tpu.vector_store %arg6[%c0_52, %c32], %36 {strides = array<i32>} : memref<256x128xbf16, #tpu.memory_space<vmem>>, vector<256x4xbf16>,
    %c0_53 = arith.constant 0 : index
    %c0_54 = arith.constant 0 : index
    %38 = vector.load %arg6[%c0_53, %c0_54] : memref<256x128xbf16, #tpu.memory_space<vmem>>, vector<256x128xbf16>
    %c0_55 = arith.constant 0 : index
    %c0_56 = arith.constant 0 : index
    %39 = vector.load %arg3[%c0_55, %c0_56] : memref<128x8xbf16, #tpu.memory_space<vmem>>, vector<128x8xbf16>
    %cst_57 = arith.constant dense<0.000000e+00> : vector<256x8xf32>
    %40 = tpu.matmul %38, %39, %cst_57 {dimension_numbers = #tpu.dot_dimension_numbers<[1], [0], [0], [1], [0, 0, 1, 1], [], []>} : vector<256x128xbf16>, vector<128x8xbf16>, vector<256x8xf32> -> vector<256x8xf32>
    %c0_58 = arith.constant 0 : index
    %c0_59 = arith.constant 0 : index
    %41 = vector.load %arg4[%c0_58, %c0_59] : memref<1x8xf32, #tpu.memory_space<vmem>>, vector<1x8xf32>
    %42 = vector.broadcast %41 : vector<1x8xf32> to vector<256x8xf32>
    %43 = arith.addf %40, %42 : vector<256x8xf32>
    %cst_60 = arith.constant 0.000000e+00 : f32
    %44 = vector.broadcast %cst_60 : f32 to vector<256x8xf32>
    %45 = arith.cmpf ogt, %43, %44 : vector<256x8xf32>
    %cst_61 = arith.constant 0.000000e+00 : f32
    %46 = vector.broadcast %cst_61 : f32 to vector<256x8xf32>
    %47 = arith.minimumf %43, %46 : vector<256x8xf32>
    %48 = math.exp %47 : vector<256x8xf32>
    %cst_62 = arith.constant 1.000000e+00 : f32
    %49 = vector.broadcast %cst_62 : f32 to vector<256x8xf32>
    %50 = arith.subf %48, %49 : vector<256x8xf32>
    %51 = arith.select %45, %43, %50 : vector<256x8xi1>, vector<256x8xf32>
    %52 = arith.truncf %51 : vector<256x8xf32> to vector<256x8xbf16>
    %c0_63 = arith.constant 0 : index
    %c0_64 = arith.constant 0 : index
    %c0_65 = arith.constant 0 : index
    %53 = vector.load %arg5[%c0_63, %c0_64, %c0_65] : memref<1x256x8xbf16, #tpu.memory_space<vmem>>, vector<1x256x8xbf16>
    %54 = vector.shape_cast %53 : vector<1x256x8xbf16> to vector<256x8xbf16>
    %55 = vector.shape_cast %52 : vector<256x8xbf16> to vector<1x256x8xbf16>
    tpu.vector_store %arg5[%c0_63, %c0_64, %c0_65], %55 {strides = array<i32>} : memref<1x256x8xbf16, #tpu.memory_space<vmem>>, vector<1x256x8xbf16>,
    return
  }
  func.func @transform_0(%arg0: i32, %arg1: i32) -> (i32, i32, i32, i32, i32) {
    %c0_i32 = arith.constant 0 : i32
    %c0_i32_0 = arith.constant 0 : i32
    %c0_i32_1 = arith.constant 0 : i32
    %c0_i32_2 = arith.constant 0 : i32
    return %arg0, %arg1, %c0_i32, %c0_i32_0, %c0_i32_1 : i32, i32, i32, i32, i32
  }
  func.func @transform_1(%arg0: i32, %arg1: i32) -> (i32, i32) {
    %c0_i32 = arith.constant 0 : i32
    %c0_i32_0 = arith.constant 0 : i32
    %c0_i32_1 = arith.constant 0 : i32
    return %c0_i32, %c0_i32_0 : i32, i32
  }
  func.func @transform_2(%arg0: i32, %arg1: i32) -> (i32, i32) {
    %c0_i32 = arith.constant 0 : i32
    %c0_i32_0 = arith.constant 0 : i32
    %c0_i32_1 = arith.constant 0 : i32
    return %c0_i32, %c0_i32_0 : i32, i32
  }
  func.func @transform_3(%arg0: i32, %arg1: i32) -> (i32, i32, i32) {
    %c0_i32 = arith.constant 0 : i32
    %c0_i32_0 = arith.constant 0 : i32
    return %arg0, %arg1, %c0_i32 : i32, i32, i32
  }
}

</mosaic_0001>

<bundles_post_ra>
// kernel: conv_forward.1
= control target key start
LH: loop header
LB: loop body
LE: loop exit
PB: predicated region body
PF: predicated region fallthrough
CT: control target
= control target key end

     0   :  { %s4670_s12 = smov 0   ;;  %s4672_s13 = smov 0   ;;  %s6290_s0 = inlined_call_operand.vmem [shape: bf16[2,1,18,18,4], index: 0, kind: input, shape index: {}]   ;;  %s6291_s1 = inlined_call_operand.vmem [shape: bf16[128,8], index: 1, kind: input, shape index: {}]   ;;  %s6292_s2 = inlined_call_operand.vmem [shape: f32[1,8], index: 2, kind: input, shape index: {}]   ;;  %s6293_s3 = inlined_call_operand.vmem [shape: bf16[2,256,8], index: 3, kind: output, shape index: {}]  }
   0x1   :  { %s4674_s14 = smov 0  }
   0x2 LB: > { %s25_s15 = sadd.s32 1, %s4635_s13  ;;  %p4031_p0 = scmp.ge.s32.totalorder %s4639_s14, 1  ;;  %s4639_s14 = sphi %s4674_s14, %s13_s14   ;;  %s4635_s13 = sphi %s4672_s13, %s6299_s13   ;;  %s4631_s12 = sphi %s4670_s12, %s6298_s12  }
   0x3   : > { %p27_p1 = scmp.ge.s32.totalorder %s25_s15, 2  ;;  %p157_p2 = scmp.lt.s32.totalorder %s4639_s14, 3 }
   0x5   : > { %s6301_s15 = smov (%p27_p1, %s25_s15), 0  ;;  %p158_p3 = pnand %p4031_p0, %p157_p2 }
   0x6   : > { %p189_p4 = scmp.lt.s32.totalorder (!%p158_p3), %s4631_s12, 1  ;;  %s4641_s20 = smov (!%p158_p3), 4  }
   0x7   : > { %161 = sbr.rel (%p158_p3) target bundleno = 983 (0x3d7), region = 32  ;;  %s4643_s21 = smov (!%p158_p3), 8  }
   0x8   : > { %s4644_s22 = smov (!%p158_p3), 12   ;;  %s4645_s23 = smov (!%p158_p3), 16  }
   0x9   : > { %s4646_s24 = smov (!%p158_p3), 20   ;;  %s4647_s25 = smov (!%p158_p3), 24  }
   0xa   : > { %s4648_s26 = smov (!%p158_p3), 28   ;;  %s4649_s27 = smov (!%p158_p3), 32  }
   0xc   : > { %s6303_s12 = smov (!%p189_p4, %s4631_s12), 1  ;;  %vm355_vm0 = vsmask.f32 3328  ;;  %vm356_vm1 = vsmask.f32 7440  ;;  %vm967_vm3 = vcmask 1042432  }
   0xd   : > { %s4518_s16 = smul.u32 216, %s6303_s12  ;;  %vm4705_vm2 = vmor %vm355_vm0, %vm356_vm1  ;;  %vm968_vm4 = vcmask 1046532   ;;  %vm209_vm5 = vcmask 1043744   ;;  %vm274_vm7 = vcmask 27648   ;;  %vm838_vm8 = vcmask 60448  }
   0xe   : > { %vm4879_vm6 = vmor %vm967_vm3, %vm968_vm4  ;;  %vm1178_vm9 = vcmask 93248   ;;  %vm1372_vm10 = vcmask 126048   ;;  %vm1933_vm11 = vcmask 158848   ;;  %vm2270_vm12 = vcmask 191648  }
   0xf   : > { %s4694_s19 = scalar_lea.vmem %s6290_s0, %s4518_s16  ;;  %vm2464_vm13 = vcmask 224448   ;;  %vm3025_vm14 = vcmask 257248   ;;  %vm3362_vm15 = vcmask 290048  }
  0x10   : > { %v310_v0 = vld [vmem:[%s4694_s19 + $0xc] sm:$0xf]  ;;  %v311_v1 = vld [vmem:[%s4694_s19 + $0x10] sm:$0xf]  ;;  %v307_v2 = vld [vmem:[%s4694_s19] sm:$0xf] }
  0x11   : > { %v383_v3 = vshrl.u32 %v310_v0, 16  ;;  %v386_v4 = vshll.u32 %v310_v0, 16  ;;  %v392_v5 = vshll.u32 %v311_v1, 16  ;;  %v396_v6 = vshrl.u32 %v311_v1, 16  ;;  %v308_v7 = vld [vmem:[%s4694_s19 + $0x4] sm:$0xf] }
  0x12   : > { %v359_v8 = vshrl.u32 %v307_v2, 16  ;;  %v362_v9 = vshll.u32 %v307_v2, 16  ;;  %v368_v10 = vshll.u32 %v308_v7, 16  ;;  %v372_v11 = vshrl.u32 %v308_v7, 16  ;;  %v312_v12 = vld [vmem:[%s4694_s19 + $0x14] sm:$0x1] }
  0x13   : > { %v385_v13 = vrot.slane %v383_v3, 4  ;;  %v388_v14 = vrot.slane %v386_v4, 5  ;;  %v394_v15 = vrot.slane %v392_v5, 5  ;;  %v398_v16 = vrot.slane %v396_v6, 4  ;;  %v309_v17 = vld [vmem:[%s4694_s19 + $0x8] sm:$0x1] }
  0x14   : > { %v361_v18 = vrot.slane %v359_v8, 4  ;;  %v364_v19 = vrot.slane %v362_v9, 5  ;;  %v374_v20 = vrot.slane %v372_v11, 4  ;;  %v317_v21 = vld [vmem:[%s4694_s19 + $0x28] sm:$0xf]  ;;  %v402_v24 = vshll.u32 %v312_v12, 16 }
  0x15   : > { %v389_v22 = vor.u32 %v388_v14, %v385_v13  ;;  %v399_v23 = vor.u32 %v398_v16, %v394_v15  ;;  %v370_v27 = vrot.slane %v368_v10, 5  ;;  %v440_v28 = vshll.u32 %v317_v21, 16  ;;  %v316_v30 = vld [vmem:[%s4694_s19 + $0x24] sm:$0xf]  ;;  %v313_v35 = vld [vmem:[%s4694_s19 + $0x18] sm:$0xf] }
  0x16   : > { %v365_v26 = vor.u32 %v364_v19, %v361_v18  ;;  %v444_v29 = vshrl.u32 %v317_v21, 16  ;;  %v378_v32 = vshll.u32 %v309_v17, 16  ;;  %v404_v38 = vrot.slane %v402_v24, 5  ;;  %v314_v40 = vld [vmem:[%s4694_s19 + $0x1c] sm:$0xf] }
  0x17   : > { %v390_v31 = vrot.slane %v389_v22, 4  ;;  %v375_v34 = vor.u32 %v374_v20, %v370_v27  ;;  %v400_v37 = vrot.slane %v399_v23, 4  ;;  %v431_v39 = vshrl.u32 %v316_v30, 16  ;;  %v318_v42 = vld [vmem:[%s4694_s19 + $0x2c] sm:$0x1] }
  0x18   : > { %v366_v33 = vrot.slane %v365_v26, 4  ;;  %v4718_v43 = vrot.slane %v440_v28, 5  ;;  %v446_v44 = vrot.slane %v444_v29, 4  ;;  %v434_v45 = vshll.u32 %v316_v30, 16  ;;  %v322_v50 = vld [vmem:[%s4694_s19 + $0x3c] sm:$0xf] }
  0x19   : > { %v395_v36 = vsel %vm4705_vm2, %v390_v31, %v394_v15  ;;  %v380_v46 = vrot.slane %v378_v32, 5  ;;  %v433_v47 = vrot.slane %v431_v39, 4  ;;  %v407_v48 = vshrl.u32 %v313_v35, 16  ;;  %v320_v58 = vld [vmem:[%s4694_s19 + $0x34] sm:$0xf] }
  0x1a   : > { %746 = vrot.lane.b32.xlu1 %v395_v36, %s4641_s20  ;;  %v371_v41 = vsel %vm4705_vm2, %v366_v33, %v370_v27  ;;  %v410_v49 = vshll.u32 %v313_v35, 16  ;;  %v376_v51 = vrot.slane %v375_v34, 4  ;;  %v436_v52 = vrot.slane %v434_v45, 5  ;;  %v315_v6 = vld [vmem:[%s4694_s19 + $0x20] sm:$0x1] }
  0x1b   : > { %742 = vrot.lane.b32.xlu0 %v371_v41, %s4641_s20  ;;  %v416_v53 = vshll.u32 %v314_v40, 16  ;;  %v420_v54 = vshrl.u32 %v314_v40, 16  ;;  %v450_v55 = vshll.u32 %v318_v42, 16  ;;  %v409_v56 = vrot.slane %v407_v48, 4  ;;  %v323_v15 = vld [vmem:[%s4694_s19 + $0x40] sm:$0xf] }
  0x1c   : > { %v412_v57 = vrot.slane %v410_v49, 5  ;;  %v447_v59 = vor.u32 %v446_v44, %v4718_v43  ;;  %v479_v61 = vshrl.u32 %v322_v50, 16  ;;  %v482_v62 = vshll.u32 %v322_v50, 16  ;;  %v321_v16 = vld [vmem:[%s4694_s19 + $0x38] sm:$0x1] }
  0x1d   : > { %v422_v60 = vrot.slane %v420_v54, 4  ;;  %v405_v63 = vsel %vm4705_vm2, %v400_v37, %v404_v38  ;;  %v437_v0 = vor.u32 %v436_v52, %v433_v47  ;;  %v418_v2 = vrot.slane %v416_v53, 5  ;;  %v326_v20 = vld [vmem:[%s4694_s19 + $0x4c] sm:$0xf]  ;;  %v319_v21 = vld [vmem:[%s4694_s19 + $0x30] sm:$0xf] }
  0x1e   : > { %v413_v1 = vor.u32 %v412_v57, %v409_v56  ;;  %v381_v3 = vsel %vm4705_vm2, %v376_v51, %v380_v46  ;;  %v464_v4 = vshll.u32 %v320_v58, 16  ;;  %v468_v5 = vshrl.u32 %v320_v58, 16  ;;  %v325_v24 = vld [vmem:[%s4694_s19 + $0x48] sm:$0xf]  ;;  %v331_v47 = vld [vmem:[%s4694_s19 + $0x60] sm:$0xf] }
  0x1f   : > { %v452_v7 = vrot.slane %v450_v55, 5  ;;  %v448_v9 = vrot.slane %v447_v59, 4  ;;  %v481_v10 = vrot.slane %v479_v61, 4  ;;  %v484_v11 = vrot.slane %v482_v62, 5  ;;  %v327_v49 = vld [vmem:[%s4694_s19 + $0x50] sm:$0x1] }
  0x20   : > { %v414_v8 = vrot.slane %v413_v1, 4  ;;  %v423_v12 = vor.u32 %v422_v60, %v418_v2  ;;  %v438_v13 = vrot.slane %v437_v0, 4  ;;  %v426_v17 = vshll.u32 %v315_v6, 16  ;;  %v329_v53 = vld [vmem:[%s4694_s19 + $0x58] sm:$0xf] }
  0x21   : > { %v4736_v18 = vrot.slane %v464_v4, 5  ;;  %v470_v19 = vrot.slane %v468_v5, 4  ;;  %v453_v26 = vsel %vm4705_vm2, %v448_v9, %v452_v7  ;;  %v485_v27 = vor.u32 %v484_v11, %v481_v10  ;;  %v324_v58 = vld [vmem:[%s4694_s19 + $0x44] sm:$0x1]  ;;  %v335_v11 = vld [vmem:[%s4694_s19 + $0x70] sm:$0xf] }
  0x22   : > { %748 = vrot.lane.b32.xlu1 %v405_v63, %s4641_s20  ;;  %v419_v14 = vsel %vm4705_vm2, %v414_v8, %v418_v2  ;;  %v424_v22 = vrot.slane %v423_v12, 4  ;;  %v428_v23 = vrot.slane %v426_v17, 5  ;;  %v488_v28 = vshll.u32 %v323_v15, 16  ;;  %v328_v2 = vld [vmem:[%s4694_s19 + $0x54] sm:$0xf] }
  0x23   : > { %744 = vrot.lane.b32.xlu0 %v381_v3, %s4641_s20  ;;  %750 = vrot.lane.b32.xlu2 %v419_v14, %s4641_s20  ;;  %v474_v29 = vshll.u32 %v321_v16, 16  ;;  %v443_v30 = vsel %vm4705_vm2, %v438_v13, %v4718_v43  ;;  %v512_v31 = vshll.u32 %v326_v20, 16  ;;  %v516_v32 = vshrl.u32 %v326_v20, 16  ;;  %v332_v6 = vld [vmem:[%s4694_s19 + $0x64] sm:$0xf] }
  0x24   : > { %v455_v33 = vshrl.u32 %v319_v21, 16  ;;  %v471_v34 = vor.u32 %v470_v19, %v4736_v18  ;;  %v503_v35 = vshrl.u32 %v325_v24, 16  ;;  %v506_v36 = vshll.u32 %v325_v24, 16  ;;  %v334_v20 = vld [vmem:[%s4694_s19 + $0x6c] sm:$0xf] }
  0x25   : > { %v458_v37 = vshll.u32 %v319_v21, 16  ;;  %v492_v38 = vshrl.u32 %v323_v15, 16  ;;  %v429_v39 = vsel %vm4705_vm2, %v424_v22, %v428_v23  ;;  %v490_v41 = vrot.slane %v488_v28, 5  ;;  %v330_v15 = vld [vmem:[%s4694_s19 + $0x5c] sm:$0x1] }
  0x26   : > { %v457_v40 = vrot.slane %v455_v33, 4  ;;  %v486_v43 = vrot.slane %v485_v27, 4  ;;  %v476_v44 = vrot.slane %v474_v29, 5  ;;  %v4751_v45 = vrot.slane %v512_v31, 5 }
  0x27   : > { %v460_v42 = vrot.slane %v458_v37, 5  ;;  %v518_v46 = vrot.slane %v516_v32, 4  ;;  %v472_v48 = vrot.slane %v471_v34, 4  ;;  %v505_v50 = vrot.slane %v503_v35, 4 }
  0x28   : > { %v508_v51 = vrot.slane %v506_v36, 5  ;;  %v494_v54 = vrot.slane %v492_v38, 4  ;;  %v551_v56 = vshrl.u32 %v331_v47, 16  ;;  %v554_v57 = vshll.u32 %v331_v47, 16  ;;  %v338_v47 = vld [vmem:[%s4694_s19 + $0x7c] sm:$0xf] }
  0x29   : > { %v461_v52 = vor.u32 %v460_v42, %v457_v40  ;;  %v491_v59 = vsel %vm4705_vm2, %v486_v43, %v490_v41  ;;  %v519_v60 = vor.u32 %v518_v46, %v4751_v45  ;;  %v522_v61 = vshll.u32 %v327_v49, 16  ;;  %v340_v42 = vld [vmem:[%s4694_s19 + $0x84] sm:$0xf]  ;;  %v333_v49 = vld [vmem:[%s4694_s19 + $0x68] sm:$0x1] }
  0x2a   : > { %756 = vrot.lane.b32.xlu1 %v453_v26, %s4641_s20  ;;  %v477_v62 = vsel %vm4705_vm2, %v472_v48, %v476_v44  ;;  %v509_v63 = vor.u32 %v508_v51, %v505_v50  ;;  %v536_v0 = vshll.u32 %v329_v53, 16  ;;  %v540_v1 = vshrl.u32 %v329_v53, 16 }
  0x2b   : > { %754 = vrot.lane.b32.xlu0 %v443_v30, %s4641_s20  ;;  %752 = vrot.lane.b32.xlu2 %v429_v39, %s4641_s20  ;;  %v462_v55 = vrot.slane %v461_v52, 4  ;;  %v495_v4 = vor.u32 %v494_v54, %v490_v41  ;;  %v498_v5 = vshll.u32 %v324_v58, 16  ;;  %v553_v7 = vrot.slane %v551_v56, 4  ;;  %v336_v41 = vld [vmem:[%s4694_s19 + $0x74] sm:$0x1] }
  0x2c   : > { %v556_v8 = vrot.slane %v554_v57, 5  ;;  %v520_v9 = vrot.slane %v519_v60, 4  ;;  %v524_v10 = vrot.slane %v522_v61, 5  ;;  %v527_v12 = vshrl.u32 %v328_v2, 16  ;;  %v337_v54 = vld [vmem:[%s4694_s19 + $0x78] sm:$0xf] }
  0x2d   : > { %v467_v3 = vsel %vm4705_vm2, %v462_v55, %v4736_v18  ;;  %v530_v13 = vshll.u32 %v328_v2, 16  ;;  %v510_v14 = vrot.slane %v509_v63, 4  ;;  %v4773_v16 = vrot.slane %v536_v0, 5 }
  0x2e   : > { %v542_v17 = vrot.slane %v540_v1, 4  ;;  %v496_v18 = vrot.slane %v495_v4, 4  ;;  %v500_v19 = vrot.slane %v498_v5, 5  ;;  %v529_v21 = vrot.slane %v527_v12, 4  ;;  %v341_v4 = vld [vmem:[%s4694_s19 + $0x88] sm:$0xf] }
  0x2f   : > { %v532_v22 = vrot.slane %v530_v13, 5  ;;  %v557_v23 = vor.u32 %v556_v8, %v553_v7  ;;  %v560_v24 = vshll.u32 %v332_v6, 16  ;;  %v584_v26 = vshll.u32 %v335_v11, 16 }
  0x30   : > { %v588_v27 = vshrl.u32 %v335_v11, 16  ;;  %v525_v28 = vsel %vm4705_vm2, %v520_v9, %v524_v10  ;;  %v546_v29 = vshll.u32 %v330_v15, 16  ;;  %v515_v30 = vsel %vm4705_vm2, %v510_v14, %v4751_v45  ;;  %v344_v9 = vld [vmem:[%s4694_s19 + $0x94] sm:$0xf]  ;;  %v339_v11 = vld [vmem:[%s4694_s19 + $0x80] sm:$0x1] }
  0x31   : > { %v543_v31 = vor.u32 %v542_v17, %v4773_v16  ;;  %v575_v32 = vshrl.u32 %v334_v20, 16  ;;  %v578_v33 = vshll.u32 %v334_v20, 16  ;;  %v564_v34 = vshrl.u32 %v332_v6, 16  ;;  %v343_v14 = vld [vmem:[%s4694_s19 + $0x90] sm:$0xf] }
  0x32   : > { %762 = vrot.lane.b32.xlu1 %v491_v59, %s4641_s20  ;;  %v501_v35 = vsel %vm4705_vm2, %v496_v18, %v500_v19  ;;  %v533_v36 = vor.u32 %v532_v22, %v529_v21  ;;  %v558_v37 = vrot.slane %v557_v23, 4  ;;  %v562_v38 = vrot.slane %v560_v24, 5 }
  0x33   : > { %760 = vrot.lane.b32.xlu0 %v477_v62, %s4641_s20  ;;  %758 = vrot.lane.b32.xlu2 %v467_v3, %s4641_s20  ;;  %v4785_v39 = vrot.slane %v584_v26, 5  ;;  %v590_v40 = vrot.slane %v588_v27, 4  ;;  %v544_v43 = vrot.slane %v543_v31, 4  ;;  %v548_v44 = vrot.slane %v546_v29, 5 }
  0x34   : > { %v577_v45 = vrot.slane %v575_v32, 4  ;;  %v580_v46 = vrot.slane %v578_v33, 5  ;;  %v534_v48 = vrot.slane %v533_v36, 4  ;;  %v566_v50 = vrot.slane %v564_v34, 4 }
  0x35   : > { %v563_v51 = vsel %vm4705_vm2, %v558_v37, %v562_v38  ;;  %v591_v52 = vor.u32 %v590_v40, %v4785_v39  ;;  %v594_v53 = vshll.u32 %v336_v41, 16  ;;  %v623_v55 = vshrl.u32 %v340_v42, 16  ;;  %v345_v37 = vld [vmem:[%s4694_s19 + $0x98] sm:$0x1]  ;;  %v349_v40 = vld [vmem:[%s4694_s19 + $0xa8] sm:$0xf] }
  0x36   : > { %v626_v56 = vshll.u32 %v340_v42, 16  ;;  %v608_v57 = vshll.u32 %v338_v47, 16  ;;  %v612_v58 = vshrl.u32 %v338_v47, 16  ;;  %v549_v59 = vsel %vm4705_vm2, %v544_v43, %v548_v44  ;;  %v347_v42 = vld [vmem:[%s4694_s19 + $0xa0] sm:$0xf] }
  0x37   : > { %v581_v60 = vor.u32 %v580_v46, %v577_v45  ;;  %v570_v61 = vshll.u32 %v333_v49, 16  ;;  %v539_v62 = vsel %vm4705_vm2, %v534_v48, %v4773_v16  ;;  %v567_v63 = vor.u32 %v566_v50, %v562_v38  ;;  %v342_v43 = vld [vmem:[%s4694_s19 + $0x8c] sm:$0x1]  ;;  %v346_v47 = vld [vmem:[%s4694_s19 + $0x9c] sm:$0xf] }
  0x38   : > { %v599_v0 = vshrl.u32 %v337_v54, 16  ;;  %v602_v1 = vshll.u32 %v337_v54, 16  ;;  %v592_v2 = vrot.slane %v591_v52, 4  ;;  %v596_v3 = vrot.slane %v594_v53, 5 }
  0x39   : > { %v625_v5 = vrot.slane %v623_v55, 4  ;;  %v628_v6 = vrot.slane %v626_v56, 5  ;;  %v4805_v7 = vrot.slane %v608_v57, 5  ;;  %v614_v8 = vrot.slane %v612_v58, 4 }
  0x3a   : > { %768 = vrot.lane.b32.xlu1 %v525_v28, %s4641_s20  ;;  %v582_v10 = vrot.slane %v581_v60, 4  ;;  %v568_v12 = vrot.slane %v567_v63, 4  ;;  %v572_v13 = vrot.slane %v570_v61, 5  ;;  %v601_v15 = vrot.slane %v599_v0, 4 }
  0x3b   : > { %766 = vrot.lane.b32.xlu0 %v515_v30, %s4641_s20  ;;  %764 = vrot.lane.b32.xlu2 %v501_v35, %s4641_s20  ;;  %v604_v16 = vrot.slane %v602_v1, 5  ;;  %v632_v17 = vshll.u32 %v341_v4, 16  ;;  %v656_v18 = vshll.u32 %v344_v9, 16  ;;  %v660_v19 = vshrl.u32 %v344_v9, 16  ;;  %v348_v1 = vld [vmem:[%s4694_s19 + $0xa4] sm:$0x1] }
  0x3c   : > { %v597_v20 = vsel %vm4705_vm2, %v592_v2, %v596_v3  ;;  %v629_v21 = vor.u32 %v628_v6, %v625_v5  ;;  %v615_v22 = vor.u32 %v614_v8, %v4805_v7  ;;  %v618_v23 = vshll.u32 %v339_v11, 16  ;;  %v353_v5 = vld [vmem:[%s4694_s19 + $0xb8] sm:$0xf]  ;;  %v352_v8 = vld [vmem:[%s4694_s19 + $0xb4] sm:$0xf] }
  0x3d   : > { %v587_v24 = vsel %vm4705_vm2, %v582_v10, %v4785_v39  ;;  %v647_v26 = vshrl.u32 %v343_v14, 16  ;;  %v650_v27 = vshll.u32 %v343_v14, 16  ;;  %v636_v28 = vshrl.u32 %v341_v4, 16 }
  0x3e   : > { %v573_v29 = vsel %vm4705_vm2, %v568_v12, %v572_v13  ;;  %v605_v30 = vor.u32 %v604_v16, %v601_v15  ;;  %v4820_v31 = vrot.slane %v656_v18, 5  ;;  %v662_v32 = vrot.slane %v660_v19, 4 }
  0x3f   : > { %v630_v33 = vrot.slane %v629_v21, 4  ;;  %v634_v34 = vrot.slane %v632_v17, 5  ;;  %v616_v35 = vrot.slane %v615_v22, 4  ;;  %v620_v36 = vrot.slane %v618_v23, 5 }
  0x40   : > { %v649_v38 = vrot.slane %v647_v26, 4  ;;  %v652_v39 = vrot.slane %v650_v27, 5  ;;  %v606_v41 = vrot.slane %v605_v30, 4  ;;  %v638_v44 = vrot.slane %v636_v28, 4 }
  0x41   : > { %v663_v45 = vor.u32 %v662_v32, %v4820_v31  ;;  %v666_v46 = vshll.u32 %v345_v37, 16  ;;  %v635_v48 = vsel %vm4705_vm2, %v630_v33, %v634_v34  ;;  %v621_v49 = vsel %vm4705_vm2, %v616_v35, %v620_v36  ;;  %v351_v36 = vld [vmem:[%s4694_s19 + $0xb0] sm:$0x1] }
  0x42   : > { %774 = vrot.lane.b32.xlu1 %v563_v51, %s4641_s20  ;;  %v695_v50 = vshrl.u32 %v349_v40, 16  ;;  %v698_v51 = vshll.u32 %v349_v40, 16  ;;  %v653_v52 = vor.u32 %v652_v39, %v649_v38  ;;  %v680_v53 = vshll.u32 %v347_v42, 16 }
  0x43   : > { %772 = vrot.lane.b32.xlu0 %v549_v59, %s4641_s20  ;;  %770 = vrot.lane.b32.xlu2 %v539_v62, %s4641_s20  ;;  %v684_v54 = vshrl.u32 %v347_v42, 16  ;;  %v642_v55 = vshll.u32 %v342_v43, 16  ;;  %v611_v56 = vsel %vm4705_vm2, %v606_v41, %v4805_v7  ;;  %v639_v57 = vor.u32 %v638_v44, %v634_v34  ;;  %v350_v62 = vld [vmem:[%s4694_s19 + $0xac] sm:$0xf] }
  0x44   : > { %v671_v58 = vshrl.u32 %v346_v47, 16  ;;  %v674_v59 = vshll.u32 %v346_v47, 16  ;;  %v664_v60 = vrot.slane %v663_v45, 4  ;;  %v668_v61 = vrot.slane %v666_v46, 5 }
  0x45   : > { %v697_v63 = vrot.slane %v695_v50, 4  ;;  %v700_v0 = vrot.slane %v698_v51, 5  ;;  %v654_v2 = vrot.slane %v653_v52, 4  ;;  %v682_v3 = vrot.slane %v680_v53, 5  ;;  %v874_v52 = vld [vmem:[%s4694_s19 + $0xc] sm:$0xe] }
  0x46   : > { %v686_v4 = vrot.slane %v684_v54, 4  ;;  %v640_v6 = vrot.slane %v639_v57, 4  ;;  %v644_v7 = vrot.slane %v642_v55, 5  ;;  %v673_v9 = vrot.slane %v671_v58, 4  ;;  %v875_v54 = vld [vmem:[%s4694_s19 + $0x10] sm:$0xf] }
  0x47   : > { %v676_v10 = vrot.slane %v674_v59, 5  ;;  %v669_v11 = vsel %vm4705_vm2, %v664_v60, %v668_v61  ;;  %v704_v12 = vshll.u32 %v350_v62, 16  ;;  %v701_v13 = vor.u32 %v700_v0, %v697_v63  ;;  %v873_v55 = vld [vmem:[%s4694_s19 + $0x8] sm:$0x1]  ;;  %v871_v59 = vld [vmem:[%s4694_s19] sm:$0xe] }
  0x48   : > { %v690_v14 = vshll.u32 %v348_v1, 16  ;;  %v728_v15 = vshll.u32 %v353_v5, 16  ;;  %v732_v16 = vshrl.u32 %v353_v5, 16  ;;  %v659_v17 = vsel %vm4705_vm2, %v654_v2, %v4820_v31  ;;  %v354_v31 = vld [vmem:[%s4694_s19 + $0xbc] sm:$0x1] }
  0x49   : > { %v687_v18 = vor.u32 %v686_v4, %v682_v3  ;;  %v719_v19 = vshrl.u32 %v352_v8, 16  ;;  %v708_v21 = vshrl.u32 %v350_v62, 16  ;;  %v645_v22 = vsel %vm4705_vm2, %v640_v6, %v644_v7  ;;  %v246_v62 = vld [vmem:[%s4694_s19 + $0x18] sm:$0xf]  ;;  %v878_v1 = vld [vmem:[%s4694_s19 + $0x1c] sm:$0xf] }
  0x4a   : > { %780 = vrot.lane.b32.xlu1 %v597_v20, %s4641_s20  ;;  %v722_v20 = vshll.u32 %v352_v8, 16  ;;  %v677_v23 = vor.u32 %v676_v10, %v673_v9  ;;  %v706_v26 = vrot.slane %v704_v12, 5  ;;  %v730_v27 = vrot.slane %v728_v15, 5  ;;  %v879_v7 = vld [vmem:[%s4694_s19 + $0x20] sm:$0x1] }
  0x4b   : > { %778 = vrot.lane.b32.xlu0 %v587_v24, %s4641_s20  ;;  %776 = vrot.lane.b32.xlu2 %v573_v29, %s4641_s20  ;;  %v702_v24 = vrot.slane %v701_v13, 4  ;;  %v734_v28 = vrot.slane %v732_v16, 4  ;;  %v688_v29 = vrot.slane %v687_v18, 4  ;;  %v692_v30 = vrot.slane %v690_v14, 5  ;;  %v877_v8 = vld [vmem:[%s4694_s19 + $0x18] sm:$0xe] }
  0x4c   : > { %v721_v32 = vrot.slane %v719_v19, 4  ;;  %v724_v33 = vrot.slane %v722_v20, 5  ;;  %v678_v34 = vrot.slane %v677_v23, 4  ;;  %v710_v35 = vrot.slane %v708_v21, 4  ;;  %v876_v10 = vld [vmem:[%s4694_s19 + $0x14] sm:$0x1] }
  0x4d   : > { %v707_v37 = vsel %vm4705_vm2, %v702_v24, %v706_v26  ;;  %v735_v38 = vor.u32 %v734_v28, %v730_v27  ;;  %v738_v39 = vshll.u32 %v354_v31, 16  ;;  %v693_v40 = vsel %vm4705_vm2, %v688_v29, %v692_v30  ;;  %v881_v14 = vld [vmem:[%s4694_s19 + $0x28] sm:$0xf]  ;;  %v883_v18 = vld [vmem:[%s4694_s19 + $0x30] sm:$0xe] }
  0x4e   : > { %v725_v41 = vor.u32 %v724_v33, %v721_v32  ;;  %v683_v42 = vsel %vm4705_vm2, %v678_v34, %v682_v3  ;;  %v711_v43 = vor.u32 %v710_v35, %v706_v26  ;;  %v714_v44 = vshll.u32 %v351_v36, 16  ;;  %v884_v20 = vld [vmem:[%s4694_s19 + $0x34] sm:$0xf]  ;;  %v880_v24 = vld [vmem:[%s4694_s19 + $0x24] sm:$0xe] }
  0x4f   : > { %v736_v45 = vrot.slane %v735_v38, 4  ;;  %v740_v46 = vrot.slane %v738_v39, 5  ;;  %v4036_v58 = vrot.slane %v874_v52, 9  ;;  %v979_v60 = vrot.slane %v875_v54, 5  ;;  %v887_v30 = vld [vmem:[%s4694_s19 + $0x40] sm:$0xf] }
  0x50   : > { %v726_v47 = vrot.slane %v725_v41, 4  ;;  %v716_v50 = vrot.slane %v714_v44, 5  ;;  %v975_v61 = vrot.slane %v873_v55, 5  ;;  %v4642_v2 = vmov 0   ;;  %v888_v36 = vld [vmem:[%s4694_s19 + $0x44] sm:$0x1] }
  0x51   : > { %v741_v51 = vsel %vm4705_vm2, %v736_v45, %v740_v46  ;;  %214 = vst.msk [vmem:[#allocation2 + $0x10] sm:$0xf] %vm209_vm5, %v4642_v2  ;;  %v4035_v3 = vrot.slane %v871_v59, 9  ;;  %v980_v4 = vsel %vm4879_vm6, %v4036_v58, %v979_v60  ;;  %v986_v5 = vrot.slane %v878_v1, 5  ;;  %v885_v39 = vld [vmem:[%s4694_s19 + $0x38] sm:$0x1] }
  0x52   : > { %786 = vrot.lane.b32.xlu1 %v635_v48, %s4641_s20  ;;  %v872_v48 = vld [vmem:[%s4694_s19 + $0x4] sm:$0xf]  ;;  %v731_v53 = vsel %vm4705_vm2, %v726_v47, %v730_v27  ;;  %279 = vst.msk [vmem:[#allocation2 + $0x10] sm:$0xf] %vm274_vm7, %v246_v62  ;;  %v989_v12 = vrot.slane %v879_v7, 5  ;;  %v4037_v13 = vrot.slane %v877_v8, 9 }
  0x53   : > { %784 = vrot.lane.b32.xlu0 %v621_v49, %s4641_s20  ;;  %782 = vrot.lane.b32.xlu2 %v611_v56, %s4641_s20  ;;  %v712_v49 = vrot.slane %v711_v43, 4  ;;  %v972_v56 = vrot.slane %v872_v48, 5  ;;  %210 = vst.msk [vmem:[#allocation2] sm:$0xf] %vm209_vm5, %v4642_v2  ;;  %v981_v15 = vrot.slane %v979_v60, 4  ;;  %v982_v16 = vrot.slane %v876_v10, 5 }
  0x54   : > { %211 = vst.msk [vmem:[#allocation2 + $0x4] sm:$0xf] %vm209_vm5, %v4642_v2  ;;  %v987_v19 = vsel %vm4879_vm6, %v4037_v13, %v986_v5  ;;  %v993_v21 = vrot.slane %v881_v14, 5  ;;  %v4039_v26 = vrot.slane %v883_v18, 9  ;;  %v1000_v27 = vrot.slane %v884_v20, 5 }
  0x55   : > { %v717_v57 = vsel %vm4705_vm2, %v712_v49, %v716_v50  ;;  %v974_v0 = vrot.slane %v972_v56, 4  ;;  %212 = vst.msk [vmem:[#allocation2 + $0x8] sm:$0xf] %vm209_vm5, %v4642_v2  ;;  %v973_v9 = vsel %vm4879_vm6, %v4035_v3, %v972_v56  ;;  %v983_v23 = vsel %vm4879_vm6, %v981_v15, %v982_v16  ;;  %v890_v43 = vld [vmem:[%s4694_s19 + $0x4c] sm:$0xf] }
  0x56   : > { %213 = vst.msk [vmem:[#allocation2 + $0xc] sm:$0xf] %vm209_vm5, %v4642_v2  ;;  %v995_v28 = vrot.slane %v993_v21, 4  ;;  %v4038_v31 = vrot.slane %v880_v24, 9  ;;  %v1001_v33 = vsel %vm4879_vm6, %v4039_v26, %v1000_v27  ;;  %v1007_v34 = vrot.slane %v887_v30, 5 }
  0x57   : > { %v976_v6 = vsel %vm4879_vm6, %v974_v0, %v975_v61  ;;  %215 = vst.msk [vmem:[#allocation2 + $0x14] sm:$0xf] %vm209_vm5, %v4642_v2  ;;  %v1010_v41 = vrot.slane %v888_v36, 5  ;;  %v1002_v44 = vrot.slane %v1000_v27, 4  ;;  %v1003_v45 = vrot.slane %v885_v39, 5 }
  0x58   : > { %216 = vst.msk [vmem:[#allocation2 + $0x18] sm:$0xf] %vm209_vm5, %v4642_v2  ;;  %v994_v38 = vsel %vm4879_vm6, %v4038_v31, %v993_v21  ;;  %v892_v48 = vld [vmem:[%s4694_s19 + $0x54] sm:$0xe]  ;;  %v893_v50 = vld [vmem:[%s4694_s19 + $0x58] sm:$0xf] }
  0x59   : > { %217 = vst.msk [vmem:[#allocation2 + $0x1c] sm:$0xf] %vm209_vm5, %v4642_v2  ;;  %v891_v52 = vld [vmem:[%s4694_s19 + $0x50] sm:$0x1]  ;;  %v889_v54 = vld [vmem:[%s4694_s19 + $0x48] sm:$0xe] }
  0x5a   : > { %792 = vrot.lane.b32.xlu1 %v669_v11, %s4641_s20  ;;  %v988_v11 = vrot.slane %v986_v5, 4  ;;  %218 = vst.msk [vmem:[#allocation2 + $0x20] sm:$0xf] %vm209_vm5, %v4642_v2  ;;  %v244_v55 = vld [vmem:[%s4694_s19 + $0xc] sm:$0xf]  ;;  %v4042_v56 = vrot.slane %v892_v48, 9 }
  0x5b   : > { %790 = vrot.lane.b32.xlu0 %v659_v17, %s4641_s20  ;;  %788 = vrot.lane.b32.xlu2 %v645_v22, %s4641_s20  ;;  %219 = vst.msk [vmem:[#allocation2 + $0x24] sm:$0xf] %vm209_vm5, %v4642_v2  ;;  %v882_v22 = vld [vmem:[%s4694_s19 + $0x2c] sm:$0x1]  ;;  %v1017_v60 = vrot.slane %v891_v52, 5  ;;  %v4041_v1 = vrot.slane %v889_v54, 9 }
  0x5c   : > { %v990_v17 = vsel %vm4879_vm6, %v988_v11, %v989_v12  ;;  %220 = vst.msk [vmem:[#allocation2 + $0x28] sm:$0xf] %vm209_vm5, %v4642_v2  ;;  %v996_v29 = vrot.slane %v882_v22, 5  ;;  %v896_v61 = vld [vmem:[%s4694_s19 + $0x64] sm:$0xf] }
  0x5d   : > { %221 = vst.msk [vmem:[#allocation2 + $0x2c] sm:$0xf] %vm209_vm5, %v4642_v2  ;;  %v242_v0 = vld [vmem:[%s4694_s19] sm:$0xf]  ;;  %v247_v5 = vld [vmem:[%s4694_s19 + $0x1c] sm:$0xf] }
  0x5e   : > { %222 = vst.msk [vmem:[#allocation2 + $0x30] sm:$0xf] %vm209_vm5, %v4642_v2  ;;  %v997_v35 = vsel %vm4879_vm6, %v995_v28, %v996_v29  ;;  %v897_v7 = vld [vmem:[%s4694_s19 + $0x68] sm:$0x1]  ;;  %v245_v8 = vld [vmem:[%s4694_s19 + $0x10] sm:$0xf] }
  0x5f   : > { %223 = vst.msk [vmem:[#allocation2 + $0x34] sm:$0xf] %vm209_vm5, %v4642_v2  ;;  %v894_v11 = vld [vmem:[%s4694_s19 + $0x5c] sm:$0x1]  ;;  %v243_v12 = vld [vmem:[%s4694_s19 + $0x4] sm:$0xf] }
  0x60   : > { %224 = vst.msk [vmem:[#allocation2 + $0x38] sm:$0xf] %vm209_vm5, %v4642_v2  ;;  %v1031_v14 = vrot.slane %v897_v7, 5  ;;  %v1024_v21 = vrot.slane %v894_v11, 5  ;;  %v249_v22 = vld [vmem:[%s4694_s19 + $0x28] sm:$0xf] }
  0x61   : > { %225 = vst.msk [vmem:[#allocation2 + $0x3c] sm:$0xf] %vm209_vm5, %v4642_v2  ;;  %v248_v26 = vld [vmem:[%s4694_s19 + $0x24] sm:$0xf]  ;;  %v901_v27 = vld [vmem:[%s4694_s19 + $0x78] sm:$0xe] }
  0x62   : > { %798 = vrot.lane.b32.xlu1 %v707_v37, %s4641_s20  ;;  %226 = vst.msk [vmem:[#allocation2 + $0x40] sm:$0xf] %vm209_vm5, %v4642_v2  ;;  %v886_v37 = vld [vmem:[%s4694_s19 + $0x3c] sm:$0xe]  ;;  %v900_v31 = vld [vmem:[%s4694_s19 + $0x74] sm:$0x1] }
  0x63   : > { %796 = vrot.lane.b32.xlu0 %v693_v40, %s4641_s20  ;;  %794 = vrot.lane.b32.xlu2 %v683_v42, %s4641_s20  ;;  %227 = vst.msk [vmem:[#allocation2 + $0x44] sm:$0xf] %vm209_vm5, %v4642_v2  ;;  %v1009_v40 = vrot.slane %v1007_v34, 4  ;;  %v4040_v42 = vrot.slane %v886_v37, 9  ;;  %v902_v29 = vld [vmem:[%s4694_s19 + $0x7c] sm:$0xf] }
  0x64   : > { %228 = vst.msk [vmem:[#allocation2 + $0x48] sm:$0xf] %vm209_vm5, %v4642_v2  ;;  %v1042_v36 = vrot.slane %v902_v29, 5  ;;  %v1038_v39 = vrot.slane %v900_v31, 5  ;;  %v256_v48 = vld [vmem:[%s4694_s19 + $0x54] sm:$0xf] }
  0x65   : > { %229 = vst.msk [vmem:[#allocation2 + $0x4c] sm:$0xf] %vm209_vm5, %v4642_v2  ;;  %v1011_v47 = vsel %vm4879_vm6, %v1009_v40, %v1010_v41  ;;  %v1008_v49 = vsel %vm4879_vm6, %v4040_v42, %v1007_v34  ;;  %v898_v34 = vld [vmem:[%s4694_s19 + $0x6c] sm:$0xe]  ;;  %v905_v40 = vld [vmem:[%s4694_s19 + $0x88] sm:$0xf] }
  0x66   : > { %230 = vst.msk [vmem:[#allocation2 + $0x50] sm:$0xf] %vm209_vm5, %v4642_v2  ;;  %v252_v42 = vld [vmem:[%s4694_s19 + $0x3c] sm:$0xf]  ;;  %v255_v52 = vld [vmem:[%s4694_s19 + $0x4c] sm:$0xf] }
  0x67   : > { %231 = vst.msk [vmem:[#allocation2 + $0x54] sm:$0xf] %vm209_vm5, %v4642_v2  ;;  %v903_v54 = vld [vmem:[%s4694_s19 + $0x80] sm:$0x1]  ;;  %v264_v31 = vld [vmem:[%s4694_s19 + $0x84] sm:$0xf] }
  0x68   : > { %232 = vst.msk [vmem:[#allocation2 + $0x58] sm:$0xf] %vm209_vm5, %v4642_v2 }
  0x69   : > { %233 = vst.msk [vmem:[#allocation2 + $0x5c] sm:$0xf] %vm209_vm5, %v4642_v2 }
  0x6a   : > { %804 = vrot.lane.b32.xlu1 %v741_v51, %s4641_s20  ;;  %234 = vst.msk [vmem:[#allocation2 + $0x60] sm:$0xf] %vm209_vm5, %v4642_v2  ;;  %v1014_v51 = vrot.slane %v890_v43, 5  ;;  %v4044_v43 = vrot.slane %v898_v34, 9  ;;  %v263_v34 = vld [vmem:[%s4694_s19 + $0x7c] sm:$0xf] }
  0x6b   : > { %802 = vrot.lane.b32.xlu0 %v731_v53, %s4641_s20  ;;  %800 = vrot.lane.b32.xlu2 %v717_v57, %s4641_s20  ;;  %235 = vst.msk [vmem:[#allocation2 + $0x64] sm:$0xf] %vm209_vm5, %v4642_v2  ;;  %v1004_v53 = vsel %vm4879_vm6, %v1002_v44, %v1003_v45  ;;  %v1021_v57 = vrot.slane %v893_v50, 5  ;;  %v251_v44 = vld [vmem:[%s4694_s19 + $0x34] sm:$0xf] }
  0x6c   : > { %236 = vst.msk [vmem:[#allocation2 + $0x68] sm:$0xf] %vm209_vm5, %v4642_v2  ;;  %v1016_v59 = vrot.slane %v1014_v51, 4  ;;  %v1015_v10 = vsel %vm4879_vm6, %v4041_v1, %v1014_v51  ;;  %v906_v50 = vld [vmem:[%s4694_s19 + $0x8c] sm:$0x1]  ;;  %v1045_v1 = vrot.slane %v903_v54, 5 }
  0x6d   : > { %237 = vst.msk [vmem:[#allocation2 + $0x6c] sm:$0xf] %vm209_vm5, %v4642_v2  ;;  %v1023_v20 = vrot.slane %v1021_v57, 4  ;;  %v904_v51 = vld [vmem:[%s4694_s19 + $0x84] sm:$0xe] }
  0x6e   : > { %238 = vst.msk [vmem:[#allocation2 + $0x70] sm:$0xf] %vm209_vm5, %v4642_v2  ;;  %v270_v54 = vld [vmem:[%s4694_s19 + $0xa8] sm:$0xf] }
  0x6f   : > { %239 = vst.msk [vmem:[#allocation2 + $0x74] sm:$0xf] %vm209_vm5, %v4642_v2 }
  0x70   : > { %240 = vst.msk [vmem:[#allocation2 + $0x78] sm:$0xf] %vm209_vm5, %v4642_v2 }
  0x71   : > { %241 = vst.msk [vmem:[#allocation2 + $0x7c] sm:$0xf] %vm209_vm5, %v4642_v2  ;;  %v1018_v2 = vsel %vm4879_vm6, %v1016_v59, %v1017_v60  ;;  %v254_v59 = vld [vmem:[%s4694_s19 + $0x48] sm:$0xf]  ;;  %v908_v60 = vld [vmem:[%s4694_s19 + $0x94] sm:$0xf] }
  0x72   : > { %1086 = vrot.lane.b32.xlu1 %v980_v4, %s4643_s21  ;;  %277 = vst.msk [vmem:[#allocation2 + $0x8] sm:$0xf] %vm274_vm7, %v244_v55  ;;  %v1022_v4 = vsel %vm4879_vm6, %v4042_v56, %v1021_v57  ;;  %v1052_v56 = vrot.slane %v906_v50, 5  ;;  %v4046_v57 = vrot.slane %v904_v51, 9  ;;  %v271_v51 = vld [vmem:[%s4694_s19 + $0xac] sm:$0xf] }
  0x73   : > { %1084 = vrot.lane.b32.xlu0 %v976_v6, %s4643_s21  ;;  %1082 = vrot.lane.b32.xlu2 %v973_v9, %s4643_s21  ;;  %v1028_v6 = vrot.slane %v896_v61, 5  ;;  %275 = vst.msk [vmem:[#allocation2] sm:$0xf] %vm274_vm7, %v242_v0  ;;  %v895_v9 = vld [vmem:[%s4694_s19 + $0x60] sm:$0xe]  ;;  %v1044_v0 = vrot.slane %v1042_v36, 4 }
  0x74   : > { %280 = vst.msk [vmem:[#allocation2 + $0x14] sm:$0xf] %vm274_vm7, %v247_v5  ;;  %v4043_v16 = vrot.slane %v895_v9, 9  ;;  %v257_v9 = vld [vmem:[%s4694_s19 + $0x58] sm:$0xf] }
  0x75   : > { %v1030_v13 = vrot.slane %v1028_v6, 4  ;;  %278 = vst.msk [vmem:[#allocation2 + $0xc] sm:$0xf] %vm274_vm7, %v245_v8  ;;  %v1056_v8 = vrot.slane %v908_v60, 5  ;;  %v1046_v11 = vsel %vm4879_vm6, %v1044_v0, %v1045_v1  ;;  %v273_v0 = vld [vmem:[%s4694_s19 + $0xb8] sm:$0xf] }
  0x76   : > { %276 = vst.msk [vmem:[#allocation2 + $0x4] sm:$0xf] %vm274_vm7, %v243_v12  ;;  %v1029_v28 = vsel %vm4879_vm6, %v4043_v16, %v1028_v6  ;;  %v911_v6 = vld [vmem:[%s4694_s19 + $0xa0] sm:$0xf]  ;;  %v262_v12 = vld [vmem:[%s4694_s19 + $0x78] sm:$0xf] }
  0x77   : > { %v1032_v24 = vsel %vm4879_vm6, %v1030_v13, %v1031_v14  ;;  %282 = vst.msk [vmem:[#allocation2 + $0x1c] sm:$0xf] %vm274_vm7, %v249_v22  ;;  %v907_v13 = vld [vmem:[%s4694_s19 + $0x90] sm:$0xe]  ;;  %v4051_v1 = vld [vmem:[%s4694_s19 + $0xc] sm:$0xf] }
  0x78   : > { %281 = vst.msk [vmem:[#allocation2 + $0x18] sm:$0xf] %vm274_vm7, %v248_v26  ;;  %v4047_v22 = vrot.slane %v907_v13, 9 }
  0x79   : > { %285 = vst.msk [vmem:[#allocation2 + $0x28] sm:$0xf] %vm274_vm7, %v252_v42 }
  0x7a   : > { %1092 = vrot.lane.b32.xlu1 %v990_v17, %s4643_s21  ;;  %v250_v17 = vld [vmem:[%s4694_s19 + $0x30] sm:$0xf]  ;;  %284 = vst.msk [vmem:[#allocation2 + $0x24] sm:$0xf] %vm274_vm7, %v251_v44  ;;  %v268_v44 = vld [vmem:[%s4694_s19 + $0x9c] sm:$0xf] }
  0x7b   : > { %1090 = vrot.lane.b32.xlu0 %v987_v19, %s4643_s21  ;;  %1088 = vrot.lane.b32.xlu2 %v983_v23, %s4643_s21  ;;  %v899_v19 = vld [vmem:[%s4694_s19 + $0x70] sm:$0xf]  ;;  %283 = vst.msk [vmem:[#allocation2 + $0x20] sm:$0xf] %vm274_vm7, %v250_v17  ;;  %v1058_v17 = vrot.slane %v1056_v8, 4 }
  0x7c   : > { %v1035_v30 = vrot.slane %v899_v19, 5  ;;  %289 = vst.msk [vmem:[#allocation2 + $0x38] sm:$0xf] %vm274_vm7, %v256_v48  ;;  %v914_v19 = vld [vmem:[%s4694_s19 + $0xac] sm:$0xf] }
  0x7d   : > { %v751_v32 = vpop.permute.xlu2 %750  ;;  %288 = vst.msk [vmem:[#allocation2 + $0x34] sm:$0xf] %vm274_vm7, %v255_v52  ;;  %v266_v48 = vld [vmem:[%s4694_s19 + $0x90] sm:$0xf]  ;;  %v918_v52 = vld [vmem:[%s4694_s19 + $0xbc] sm:$0x1] }
  0x7e   : > { %843 = vst.msk [vmem:[#allocation2 + $0x10] sm:$0xf] %vm838_vm8, %v751_v32  ;;  %v253_v32 = vld [vmem:[%s4694_s19 + $0x40] sm:$0xf] }
  0x7f   : > { %286 = vst.msk [vmem:[#allocation2 + $0x2c] sm:$0xf] %vm274_vm7, %v253_v32  ;;  %v913_v32 = vld [vmem:[%s4694_s19 + $0xa8] sm:$0xe] }
  0x80   : > { %287 = vst.msk [vmem:[#allocation2 + $0x30] sm:$0xf] %vm274_vm7, %v254_v59 }
  0x81   : > { %290 = vst.msk [vmem:[#allocation2 + $0x3c] sm:$0xf] %vm274_vm7, %v257_v9  ;;  %v4053_v9 = vld [vmem:[%s4694_s19 + $0x18] sm:$0xf] }
  0x82   : > { %1098 = vrot.lane.b32.xlu1 %v1001_v33, %s4643_s21  ;;  %v1025_v33 = vsel %vm4879_vm6, %v1023_v20, %v1024_v21  ;;  %295 = vst.msk [vmem:[#allocation2 + $0x50] sm:$0xf] %vm274_vm7, %v262_v12  ;;  %v261_v21 = vld [vmem:[%s4694_s19 + $0x70] sm:$0xf] }
  0x83   : > { %1096 = vrot.lane.b32.xlu0 %v997_v35, %s4643_s21  ;;  %1094 = vrot.lane.b32.xlu2 %v994_v38, %s4643_s21  ;;  %v4045_v35 = vrot.slane %v901_v27, 9  ;;  %v1037_v38 = vrot.slane %v1035_v30, 4  ;;  %v1070_v27 = vrot.slane %v914_v19, 5  ;;  %294 = vst.msk [vmem:[#allocation2 + $0x4c] sm:$0xf] %vm274_vm7, %v261_v21 }
  0x84   : > { %297 = vst.msk [vmem:[#allocation2 + $0x58] sm:$0xf] %vm274_vm7, %v264_v31  ;;  %v4059_v21 = vld [vmem:[%s4694_s19 + $0x3c] sm:$0xf] }
  0x85   : > { %v753_v46 = vpop.permute.xlu2 %752  ;;  %296 = vst.msk [vmem:[#allocation2 + $0x54] sm:$0xf] %vm274_vm7, %v263_v34  ;;  %v4065_v34 = vld [vmem:[%s4694_s19 + $0x60] sm:$0xf] }
  0x86   : > { %844 = vst.msk [vmem:[#allocation2 + $0x14] sm:$0xf] %vm838_vm8, %v753_v46  ;;  %v1043_v46 = vsel %vm4879_vm6, %v4045_v35, %v1042_v36  ;;  %v912_v35 = vld [vmem:[%s4694_s19 + $0xa4] sm:$0x1]  ;;  %v1072_v36 = vrot.slane %v1070_v27, 4 }
  0x87   : > { %301 = vst.msk [vmem:[#allocation2 + $0x68] sm:$0xf] %vm274_vm7, %v268_v44 }
  0x88   : > { %299 = vst.msk [vmem:[#allocation2 + $0x60] sm:$0xf] %vm274_vm7, %v266_v48 }
  0x89   : > { %304 = vst.msk [vmem:[#allocation2 + $0x74] sm:$0xf] %vm274_vm7, %v271_v51  ;;  %v4075_v51 = vld [vmem:[%s4694_s19 + $0x9c] sm:$0xf] }
  0x8a   : > { %1104 = vrot.lane.b32.xlu1 %v1011_v47, %s4643_s21  ;;  %v1049_v47 = vrot.slane %v905_v40, 5  ;;  %v917_v40 = vld [vmem:[%s4694_s19 + $0xb8] sm:$0xf]  ;;  %303 = vst.msk [vmem:[#allocation2 + $0x70] sm:$0xf] %vm274_vm7, %v270_v54 }
  0x8b   : > { %1102 = vrot.lane.b32.xlu0 %v1008_v49, %s4643_s21  ;;  %1100 = vrot.lane.b32.xlu2 %v1004_v53, %s4643_s21  ;;  %v1039_v49 = vsel %vm4879_vm6, %v1037_v38, %v1038_v39  ;;  %v1036_v53 = vsel %vm4879_vm6, %v4044_v43, %v1035_v30  ;;  %v915_v30 = vld [vmem:[%s4694_s19 + $0xb0] sm:$0x1]  ;;  %v4049_v39 = vrot.slane %v913_v32, 9  ;;  %v1066_v43 = vrot.slane %v912_v35, 5  ;;  %306 = vst.msk [vmem:[#allocation2 + $0x7c] sm:$0xf] %vm274_vm7, %v273_v0 }
  0x8c   : > { %v747_v58 = vpop.permute.xlu1 %746  ;;  %v1051_v55 = vrot.slane %v1049_v47, 4  ;;  %v1050_v7 = vsel %vm4879_vm6, %v4046_v57, %v1049_v47  ;;  %v1077_v50 = vrot.slane %v917_v40, 5  ;;  %v4064_v35 = vld [vmem:[%s4694_s19 + $0x58] sm:$0xf]  ;;  %v4068_v40 = vld [vmem:[%s4694_s19 + $0x70] sm:$0xf] }
  0x8d   : > { %v743_v62 = vpop.permute.xlu0 %742  ;;  %v759_v3 = vpop.permute.xlu2 %758  ;;  %841 = vst.msk [vmem:[#allocation2 + $0x8] sm:$0xf] %vm838_vm8, %v747_v58  ;;  %v4084_v54 = vld [vmem:[%s4694_s19 + $0x10] sm:$0xf] }
  0x8e   : > { %839 = vst.msk [vmem:[#allocation2] sm:$0xf] %vm838_vm8, %v743_v62  ;;  %v259_v62 = vld [vmem:[%s4694_s19 + $0x64] sm:$0xf]  ;;  %v1053_v5 = vsel %vm4879_vm6, %v1051_v55, %v1052_v56  ;;  %v916_v55 = vld [vmem:[%s4694_s19 + $0xb4] sm:$0xe] }
  0x8f   : > { %847 = vst.msk [vmem:[#allocation2 + $0x20] sm:$0xf] %vm838_vm8, %v759_v3  ;;  %v910_v3 = vld [vmem:[%s4694_s19 + $0x9c] sm:$0xe]  ;;  %v1079_v57 = vrot.slane %v1077_v50, 4  ;;  %v4050_v60 = vrot.slane %v916_v55, 9 }
  0x90   : > { %292 = vst.msk [vmem:[#allocation2 + $0x44] sm:$0xf] %vm274_vm7, %v259_v62  ;;  %v4048_v14 = vrot.slane %v910_v3, 9  ;;  %v272_v3 = vld [vmem:[%s4694_s19 + $0xb4] sm:$0xf] }
  0x91   : > { %305 = vst.msk [vmem:[#allocation2 + $0x78] sm:$0xf] %vm274_vm7, %v272_v3  ;;  %v4076_v3 = vld [vmem:[%s4694_s19 + $0xa0] sm:$0xf] }
  0x92   : > { %1110 = vrot.lane.b32.xlu1 %v1022_v4, %s4643_s21 }
  0x93   : > { %1108 = vrot.lane.b32.xlu0 %v1018_v2, %s4643_s21  ;;  %1106 = vrot.lane.b32.xlu2 %v1015_v10, %s4643_s21  ;;  %v258_v2 = vld [vmem:[%s4694_s19 + $0x60] sm:$0xf]  ;;  %v909_v10 = vld [vmem:[%s4694_s19 + $0x98] sm:$0x1] }
  0x94   : > { %v749_v15 = vpop.permute.xlu1 %748  ;;  %291 = vst.msk [vmem:[#allocation2 + $0x40] sm:$0xf] %vm274_vm7, %v258_v2 }
  0x95   : > { %842 = vst.msk [vmem:[#allocation2 + $0xc] sm:$0xf] %vm838_vm8, %v749_v15  ;;  %v745_v18 = vpop.permute.xlu0 %744  ;;  %v765_v23 = vpop.permute.xlu2 %764  ;;  %v1063_v15 = vrot.slane %v911_v6, 5 }
  0x96   : > { %840 = vst.msk [vmem:[#allocation2 + $0x4] sm:$0xf] %vm838_vm8, %v745_v18  ;;  %v1059_v18 = vrot.slane %v909_v10, 5  ;;  %v4052_v10 = vld [vmem:[%s4694_s19 + $0x10] sm:$0xf] }
  0x97   : > { %850 = vst.msk [vmem:[#allocation2 + $0x2c] sm:$0xf] %vm838_vm8, %v765_v23  ;;  %v1064_v26 = vsel %vm4879_vm6, %v4048_v14, %v1063_v15  ;;  %v1065_v42 = vrot.slane %v1063_v15, 4  ;;  %v4057_v14 = vld [vmem:[%s4694_s19 + $0x30] sm:$0xf] }
  0x98   : > { %v1060_v29 = vsel %vm4879_vm6, %v1058_v17, %v1059_v18  ;;  %v4056_v15 = vld [vmem:[%s4694_s19 + $0x28] sm:$0xf] }
  0x9a   : > { %1116 = vrot.lane.b32.xlu1 %v1032_v24, %s4643_s21  ;;  %v260_v24 = vld [vmem:[%s4694_s19 + $0x6c] sm:$0xf] }
  0x9b   : > { %1114 = vrot.lane.b32.xlu0 %v1029_v28, %s4643_s21  ;;  %1112 = vrot.lane.b32.xlu2 %v1025_v33, %s4643_s21  ;;  %v265_v28 = vld [vmem:[%s4694_s19 + $0x88] sm:$0xf]  ;;  %293 = vst.msk [vmem:[#allocation2 + $0x48] sm:$0xf] %vm274_vm7, %v260_v24  ;;  %v1057_v33 = vsel %vm4879_vm6, %v4047_v22, %v1056_v8  ;;  %v4054_v8 = vld [vmem:[%s4694_s19 + $0x1c] sm:$0xf] }
  0x9c   : > { %v757_v37 = vpop.permute.xlu1 %756  ;;  %298 = vst.msk [vmem:[#allocation2 + $0x5c] sm:$0xf] %vm274_vm7, %v265_v28  ;;  %v4058_v22 = vld [vmem:[%s4694_s19 + $0x34] sm:$0xf]  ;;  %v4062_v28 = vld [vmem:[%s4694_s19 + $0x4c] sm:$0xf] }
  0x9d   : > { %846 = vst.msk [vmem:[#allocation2 + $0x1c] sm:$0xf] %vm838_vm8, %v757_v37  ;;  %v755_v41 = vpop.permute.xlu0 %754  ;;  %v771_v45 = vpop.permute.xlu2 %770  ;;  %v1073_v37 = vrot.slane %v915_v30, 5 }
  0x9e   : > { %845 = vst.msk [vmem:[#allocation2 + $0x18] sm:$0xf] %vm838_vm8, %v755_v41 }
  0x9f   : > { %853 = vst.msk [vmem:[#allocation2 + $0x38] sm:$0xf] %vm838_vm8, %v771_v45  ;;  %v1074_v47 = vsel %vm4879_vm6, %v1072_v36, %v1073_v37 }
  0xa2   : > { %1122 = vrot.lane.b32.xlu1 %v1043_v46, %s4643_s21  ;;  %v267_v46 = vld [vmem:[%s4694_s19 + $0x94] sm:$0xf] }
  0xa3   : > { %1120 = vrot.lane.b32.xlu0 %v1039_v49, %s4643_s21  ;;  %1118 = vrot.lane.b32.xlu2 %v1036_v53, %s4643_s21  ;;  %v1071_v49 = vsel %vm4879_vm6, %v4049_v39, %v1070_v27  ;;  %v1067_v53 = vsel %vm4879_vm6, %v1065_v42, %v1066_v43  ;;  %300 = vst.msk [vmem:[#allocation2 + $0x64] sm:$0xf] %vm274_vm7, %v267_v46  ;;  %v4063_v27 = vld [vmem:[%s4694_s19 + $0x54] sm:$0xf]  ;;  %v4069_v39 = vld [vmem:[%s4694_s19 + $0x78] sm:$0xf] }
  0xa4   : > { %v763_v58 = vpop.permute.xlu1 %762  ;;  %v4071_v46 = vld [vmem:[%s4694_s19 + $0x84] sm:$0xf] }
  0xa5   : > { %849 = vst.msk [vmem:[#allocation2 + $0x28] sm:$0xf] %vm838_vm8, %v763_v58  ;;  %v761_v61 = vpop.permute.xlu0 %760  ;;  %v777_v4 = vpop.permute.xlu2 %776  ;;  %v1080_v58 = vrot.slane %v918_v52, 5  ;;  %v4074_v52 = vld [vmem:[%s4694_s19 + $0x94] sm:$0xf] }
  0xa6   : > { %848 = vst.msk [vmem:[#allocation2 + $0x24] sm:$0xf] %vm838_vm8, %v761_v61  ;;  %v269_v61 = vld [vmem:[%s4694_s19 + $0xa0] sm:$0xf] }
  0xa7   : > { %856 = vst.msk [vmem:[#allocation2 + $0x44] sm:$0xf] %vm838_vm8, %v777_v4  ;;  %v1081_v4 = vsel %vm4879_vm6, %v1079_v57, %v1080_v58  ;;  %v4083_v57 = vld [vmem:[%s4694_s19 + $0xc] sm:$0xf] }
  0xa8   : > { %302 = vst.msk [vmem:[#allocation2 + $0x6c] sm:$0xf] %vm274_vm7, %v269_v61  ;;  %v4078_v61 = vld [vmem:[%s4694_s19 + $0xac] sm:$0xf]  ;;  %v1454_v0 = vshrl.u32 %v4083_v57, 16 }
  0xaa   : > { %1128 = vrot.lane.b32.xlu1 %v1053_v5, %s4643_s21  ;;  %v1078_v5 = vsel %vm4879_vm6, %v4050_v60, %v1077_v50  ;;  %v1467_v60 = vshrl.u32 %v4084_v54, 16 }
  0xab   : > { %1126 = vrot.lane.b32.xlu0 %v1050_v7, %s4643_s21  ;;  %1124 = vrot.lane.b32.xlu2 %v1046_v11, %s4643_s21 }
  0xac   : > { %v769_v16 = vpop.permute.xlu1 %768 }
  0xad   : > { %852 = vst.msk [vmem:[#allocation2 + $0x34] sm:$0xf] %vm838_vm8, %v769_v16  ;;  %v767_v20 = vpop.permute.xlu0 %766  ;;  %v783_v23 = vpop.permute.xlu2 %782  ;;  %v4055_v16 = vld [vmem:[%s4694_s19 + $0x24] sm:$0xf] }
  0xae   : > { %851 = vst.msk [vmem:[#allocation2 + $0x30] sm:$0xf] %vm838_vm8, %v767_v20  ;;  %v4060_v20 = vld [vmem:[%s4694_s19 + $0x40] sm:$0xf] }
  0xaf   : > { %859 = vst.msk [vmem:[#allocation2 + $0x50] sm:$0xf] %vm838_vm8, %v783_v23 }
  0xb2   : > { %1134 = vrot.lane.b32.xlu1 %v1064_v26, %s4643_s21 }
  0xb3   : > { %1132 = vrot.lane.b32.xlu0 %v1060_v29, %s4643_s21  ;;  %1130 = vrot.lane.b32.xlu2 %v1057_v33, %s4643_s21  ;;  %v4061_v29 = vld [vmem:[%s4694_s19 + $0x48] sm:$0xf]  ;;  %v4066_v33 = vld [vmem:[%s4694_s19 + $0x64] sm:$0xf] }
  0xb4   : > { %v775_v38 = vpop.permute.xlu1 %774 }
  0xb5   : > { %855 = vst.msk [vmem:[#allocation2 + $0x40] sm:$0xf] %vm838_vm8, %v775_v38  ;;  %v773_v41 = vpop.permute.xlu0 %772  ;;  %v789_v45 = vpop.permute.xlu2 %788 }
  0xb6   : > { %854 = vst.msk [vmem:[#allocation2 + $0x3c] sm:$0xf] %vm838_vm8, %v773_v41  ;;  %v4067_v41 = vld [vmem:[%s4694_s19 + $0x6c] sm:$0xf] }
  0xb7   : > { %862 = vst.msk [vmem:[#allocation2 + $0x5c] sm:$0xf] %vm838_vm8, %v789_v45  ;;  %v4072_v45 = vld [vmem:[%s4694_s19 + $0x88] sm:$0xf] }
  0xba   : > { %1140 = vrot.lane.b32.xlu1 %v1074_v47, %s4643_s21  ;;  %v4070_v47 = vld [vmem:[%s4694_s19 + $0x7c] sm:$0xf] }
  0xbb   : > { %1138 = vrot.lane.b32.xlu0 %v1071_v49, %s4643_s21  ;;  %1136 = vrot.lane.b32.xlu2 %v1067_v53, %s4643_s21  ;;  %v4073_v53 = vld [vmem:[%s4694_s19 + $0x90] sm:$0xf] }
  0xbc   : > { %v781_v56 = vpop.permute.xlu1 %780 }
  0xbd   : > { %858 = vst.msk [vmem:[#allocation2 + $0x4c] sm:$0xf] %vm838_vm8, %v781_v56  ;;  %v779_v59 = vpop.permute.xlu0 %778  ;;  %v795_v62 = vpop.permute.xlu2 %794 }
  0xbe   : > { %857 = vst.msk [vmem:[#allocation2 + $0x48] sm:$0xf] %vm838_vm8, %v779_v59  ;;  %v1463_v59 = vshll.u32 %v4084_v54, 16  ;;  %v4082_v54 = vld [vmem:[%s4694_s19 + $0xc4] sm:$0xf] }
  0xbf   : > { %865 = vst.msk [vmem:[#allocation2 + $0x68] sm:$0xf] %vm838_vm8, %v795_v62  ;;  %v4077_v62 = vld [vmem:[%s4694_s19 + $0xa8] sm:$0xf] }
  0xc2   : > { %1276 = vrot.lane.b32.xlu1 %v4051_v1, %s4644_s22  ;;  %v1457_v1 = vshll.u32 %v4083_v57, 16 }
  0xc3   : > { %1144 = vrot.lane.b32.xlu0 %v1081_v4, %s4643_s21  ;;  %1142 = vrot.lane.b32.xlu2 %v1078_v5, %s4643_s21  ;;  %v5256_v4 = vrot.slane %v1463_v59, 5  ;;  %v1469_v5 = vrot.slane %v1467_v60, 4 }
  0xc4   : > { %v787_v6 = vpop.permute.xlu1 %786 }
  0xc5   : > { %861 = vst.msk [vmem:[#allocation2 + $0x58] sm:$0xf] %vm838_vm8, %v787_v6  ;;  %v785_v2 = vpop.permute.xlu0 %784  ;;  %v801_v7 = vpop.permute.xlu2 %800  ;;  %v4085_v6 = vld [vmem:[%s4694_s19 + $0x14] sm:$0x1] }
  0xc6   : > { %860 = vst.msk [vmem:[#allocation2 + $0x54] sm:$0xf] %vm838_vm8, %v785_v2 }
  0xc7   : > { %868 = vst.msk [vmem:[#allocation2 + $0x74] sm:$0xf] %vm838_vm8, %v801_v7  ;;  %v1456_v7 = vrot.slane %v1454_v0, 4  ;;  %v4098_v0 = vld [vmem:[%s4694_s19 + $0x48] sm:$0xf] }
  0xca   : > { %1282 = vrot.lane.b32.xlu1 %v4054_v8, %s4644_s22  ;;  %v1459_v8 = vrot.slane %v1457_v1, 5 }
  0xcb   : > { %1280 = vrot.lane.b32.xlu0 %v4053_v9, %s4644_s22  ;;  %1278 = vrot.lane.b32.xlu2 %v4052_v10, %s4644_s22  ;;  %v4089_v9 = vld [vmem:[%s4694_s19 + $0x24] sm:$0xf] }
  0xcc   : > { %v793_v11 = vpop.permute.xlu1 %792 }
  0xcd   : > { %864 = vst.msk [vmem:[#allocation2 + $0x64] sm:$0xf] %vm838_vm8, %v793_v11  ;;  %v791_v12 = vpop.permute.xlu0 %790  ;;  %v1083_v13 = vpop.permute.xlu2 %1082  ;;  %v4087_v11 = vld [vmem:[%s4694_s19 + $0x1c] sm:$0xf] }
  0xce   : > { %863 = vst.msk [vmem:[#allocation2 + $0x60] sm:$0xf] %vm838_vm8, %v791_v12  ;;  %v1470_v12 = vor.u32 %v1469_v5, %v5256_v4  ;;  %v4096_v5 = vld [vmem:[%s4694_s19 + $0x40] sm:$0xf] }
  0xcf   : > { %1179 = vst.msk [vmem:[#allocation2] sm:$0xf] %vm1178_vm9, %v1083_v13  ;;  %v1473_v13 = vshll.u32 %v4085_v6, 16 }
  0xd2   : > { %1288 = vrot.lane.b32.xlu1 %v4057_v14, %s4644_s22 }
  0xd3   : > { %1286 = vrot.lane.b32.xlu0 %v4056_v15, %s4644_s22  ;;  %1284 = vrot.lane.b32.xlu2 %v4055_v16, %s4644_s22  ;;  %v4086_v15 = vld [vmem:[%s4694_s19 + $0x18] sm:$0xf]  ;;  %v4081_v16 = vld [vmem:[%s4694_s19 + $0xc0] sm:$0xf] }
  0xd4   : > { %v799_v17 = vpop.permute.xlu1 %798 }
  0xd5   : > { %867 = vst.msk [vmem:[#allocation2 + $0x70] sm:$0xf] %vm838_vm8, %v799_v17  ;;  %v797_v18 = vpop.permute.xlu0 %796  ;;  %v1089_v19 = vpop.permute.xlu2 %1088  ;;  %v1502_v17 = vshrl.u32 %v4089_v9, 16 }
  0xd6   : > { %866 = vst.msk [vmem:[#allocation2 + $0x6c] sm:$0xf] %vm838_vm8, %v797_v18  ;;  %v1505_v18 = vshll.u32 %v4089_v9, 16 }
  0xd7   : > { %1182 = vst.msk [vmem:[#allocation2 + $0xc] sm:$0xf] %vm1178_vm9, %v1089_v19  ;;  %v4080_v19 = vld [vmem:[%s4694_s19 + $0xb8] sm:$0xf] }
  0xda   : > { %1294 = vrot.lane.b32.xlu1 %v4060_v20, %s4644_s22  ;;  %v1460_v20 = vor.u32 %v1459_v8, %v1456_v7  ;;  %v4095_v8 = vld [vmem:[%s4694_s19 + $0x3c] sm:$0xf] }
  0xdb   : > { %1292 = vrot.lane.b32.xlu0 %v4059_v21, %s4644_s22  ;;  %1290 = vrot.lane.b32.xlu2 %v4058_v22, %s4644_s22  ;;  %v1487_v21 = vshll.u32 %v4087_v11, 16  ;;  %v1491_v22 = vshrl.u32 %v4087_v11, 16 }
  0xdc   : > { %v805_v23 = vpop.permute.xlu1 %804 }
  0xdd   : > { %870 = vst.msk [vmem:[#allocation2 + $0x7c] sm:$0xf] %vm838_vm8, %v805_v23  ;;  %v803_v24 = vpop.permute.xlu0 %802  ;;  %v1095_v26 = vpop.permute.xlu2 %1094  ;;  %v4079_v23 = vld [vmem:[%s4694_s19 + $0xb4] sm:$0xf] }
  0xde   : > { %869 = vst.msk [vmem:[#allocation2 + $0x78] sm:$0xf] %vm838_vm8, %v803_v24  ;;  %v1478_v24 = vshrl.u32 %v4086_v15, 16 }
  0xdf   : > { %1185 = vst.msk [vmem:[#allocation2 + $0x18] sm:$0xf] %vm1178_vm9, %v1095_v26  ;;  %v1481_v26 = vshll.u32 %v4086_v15, 16 }
  0xe2   : > { %1300 = vrot.lane.b32.xlu1 %v4063_v27, %s4644_s22  ;;  %v1471_v27 = vrot.slane %v1470_v12, 4 }
  0xe3   : > { %1298 = vrot.lane.b32.xlu0 %v4062_v28, %s4644_s22  ;;  %1296 = vrot.lane.b32.xlu2 %v4061_v29, %s4644_s22  ;;  %v1475_v28 = vrot.slane %v1473_v13, 5  ;;  %v1504_v29 = vrot.slane %v1502_v17, 4  ;;  %v1574_v13 = vshrl.u32 %v4098_v0, 16  ;;  %v1559_v17 = vshll.u32 %v4096_v5, 16 }
  0xe4   : > { %v1087_v30 = vpop.permute.xlu1 %1086 }
  0xe5   : > { %1181 = vst.msk [vmem:[#allocation2 + $0x8] sm:$0xf] %vm1178_vm9, %v1087_v30  ;;  %v1085_v31 = vpop.permute.xlu0 %1084  ;;  %v1101_v32 = vpop.permute.xlu2 %1100  ;;  %v1507_v30 = vrot.slane %v1505_v18, 5  ;;  %v1563_v18 = vshrl.u32 %v4096_v5, 16 }
  0xe6   : > { %1180 = vst.msk [vmem:[#allocation2 + $0x4] sm:$0xf] %vm1178_vm9, %v1085_v31  ;;  %v4093_v31 = vld [vmem:[%s4694_s19 + $0x34] sm:$0xf] }
  0xe7   : > { %1188 = vst.msk [vmem:[#allocation2 + $0x24] sm:$0xf] %vm1178_vm9, %v1101_v32  ;;  %v4092_v32 = vld [vmem:[%s4694_s19 + $0x30] sm:$0xf] }
  0xea   : > { %1306 = vrot.lane.b32.xlu1 %v4066_v33, %s4644_s22 }
  0xeb   : > { %1304 = vrot.lane.b32.xlu0 %v4065_v34, %s4644_s22  ;;  %1302 = vrot.lane.b32.xlu2 %v4064_v35, %s4644_s22  ;;  %v1461_v34 = vrot.slane %v1460_v20, 4  ;;  %v4090_v35 = vld [vmem:[%s4694_s19 + $0x28] sm:$0xf]  ;;  %v1550_v20 = vshrl.u32 %v4095_v8, 16 }
  0xec   : > { %v1093_v36 = vpop.permute.xlu1 %1092 }
  0xed   : > { %1184 = vst.msk [vmem:[#allocation2 + $0x14] sm:$0xf] %vm1178_vm9, %v1093_v36  ;;  %v1091_v37 = vpop.permute.xlu0 %1090  ;;  %v1107_v38 = vpop.permute.xlu2 %1106  ;;  %v5277_v36 = vrot.slane %v1487_v21, 5  ;;  %v1553_v21 = vshll.u32 %v4095_v8, 16  ;;  %v4105_v8 = vld [vmem:[%s4694_s19 + $0x64] sm:$0xf] }
  0xee   : > { %1183 = vst.msk [vmem:[#allocation2 + $0x10] sm:$0xf] %vm1178_vm9, %v1091_v37  ;;  %v1493_v37 = vrot.slane %v1491_v22, 4 }
  0xef   : > { %1191 = vst.msk [vmem:[#allocation2 + $0x30] sm:$0xf] %vm1178_vm9, %v1107_v38 }
  0xf2   : > { %1312 = vrot.lane.b32.xlu1 %v4069_v39, %s4644_s22  ;;  %v4088_v39 = vld [vmem:[%s4694_s19 + $0x20] sm:$0x1] }
  0xf3   : > { %1310 = vrot.lane.b32.xlu0 %v4068_v40, %s4644_s22  ;;  %1308 = vrot.lane.b32.xlu2 %v4067_v41, %s4644_s22  ;;  %v1480_v40 = vrot.slane %v1478_v24, 4  ;;  %v1483_v41 = vrot.slane %v1481_v26, 5  ;;  %v4102_v26 = vld [vmem:[%s4694_s19 + $0x58] sm:$0xf] }
  0xf4   : > { %v1099_v42 = vpop.permute.xlu1 %1098 }
  0xf5   : > { %1187 = vst.msk [vmem:[#allocation2 + $0x20] sm:$0xf] %vm1178_vm9, %v1099_v42  ;;  %v1097_v43 = vpop.permute.xlu0 %1096  ;;  %v1113_v44 = vpop.permute.xlu2 %1112 }
  0xf6   : > { %1186 = vst.msk [vmem:[#allocation2 + $0x1c] sm:$0xf] %vm1178_vm9, %v1097_v43  ;;  %v1535_v43 = vshll.u32 %v4093_v31, 16 }
  0xf7   : > { %1194 = vst.msk [vmem:[#allocation2 + $0x3c] sm:$0xf] %vm1178_vm9, %v1113_v44  ;;  %v1539_v44 = vshrl.u32 %v4093_v31, 16  ;;  %v1576_v31 = vrot.slane %v1574_v13, 4 }
  0xf9   : > { %v1541_v57 = vrot.slane %v1539_v44, 4 }
  0xfa   : > { %1318 = vrot.lane.b32.xlu1 %v4072_v45, %s4644_s22  ;;  %v1526_v45 = vshrl.u32 %v4092_v32, 16 }
  0xfb   : > { %1316 = vrot.lane.b32.xlu0 %v4071_v46, %s4644_s22  ;;  %1314 = vrot.lane.b32.xlu2 %v4070_v47, %s4644_s22  ;;  %v1529_v46 = vshll.u32 %v4092_v32, 16  ;;  %v1476_v47 = vsel %vm4705_vm2, %v1471_v27, %v1475_v28 }
  0xfc   : > { %v1105_v48 = vpop.permute.xlu1 %1104 }
  0xfd   : > { %1190 = vst.msk [vmem:[#allocation2 + $0x2c] sm:$0xf] %vm1178_vm9, %v1105_v48  ;;  %v1103_v49 = vpop.permute.xlu0 %1102  ;;  %v1119_v50 = vpop.permute.xlu2 %1118  ;;  %v1508_v48 = vor.u32 %v1507_v30, %v1504_v29  ;;  %v1531_v59 = vrot.slane %v1529_v46, 5  ;;  %v4099_v30 = vld [vmem:[%s4694_s19 + $0x4c] sm:$0xf] }
  0xfe   : > { %1189 = vst.msk [vmem:[#allocation2 + $0x28] sm:$0xf] %vm1178_vm9, %v1103_v49  ;;  %v1511_v49 = vshll.u32 %v4090_v35, 16 }
  0xff   : > { %1197 = vst.msk [vmem:[#allocation2 + $0x48] sm:$0xf] %vm1178_vm9, %v1119_v50  ;;  %v1466_v50 = vsel %vm4705_vm2, %v1461_v34, %v5256_v4  ;;  %v1509_v60 = vrot.slane %v1508_v48, 4  ;;  %v5316_v34 = vrot.slane %v1559_v17, 5 }
 0x102   : > { %1324 = vrot.lane.b32.xlu1 %v4075_v51, %s4644_s22  ;;  %v1494_v51 = vor.u32 %v1493_v37, %v5277_v36  ;;  %v1607_v37 = vshll.u32 %v4102_v26, 16 }
 0x103   : > { %1322 = vrot.lane.b32.xlu0 %v4074_v52, %s4644_s22  ;;  %1320 = vrot.lane.b32.xlu2 %v4073_v53, %s4644_s22  ;;  %v1497_v52 = vshll.u32 %v4088_v39, 16  ;;  %v1515_v53 = vshrl.u32 %v4090_v35, 16  ;;  %v1565_v35 = vrot.slane %v1563_v18, 4  ;;  %v4101_v39 = vld [vmem:[%s4694_s19 + $0x54] sm:$0xf]  ;;  %v1631_v18 = vshll.u32 %v4105_v8, 16 }
 0x104   : > { %v1111_v55 = vpop.permute.xlu1 %1110 }
 0x105   : > { %1193 = vst.msk [vmem:[#allocation2 + $0x38] sm:$0xf] %vm1178_vm9, %v1111_v55  ;;  %v1109_v56 = vpop.permute.xlu0 %1108  ;;  %v1125_v58 = vpop.permute.xlu2 %1124  ;;  %v1484_v55 = vor.u32 %v1483_v41, %v1480_v40  ;;  %v1499_v4 = vrot.slane %v1497_v52, 5  ;;  %v1517_v7 = vrot.slane %v1515_v53, 4  ;;  %v1552_v40 = vrot.slane %v1550_v20, 4 }
 0x106   : > { %1192 = vst.msk [vmem:[#allocation2 + $0x34] sm:$0xf] %vm1178_vm9, %v1109_v56  ;;  %v5291_v56 = vrot.slane %v1535_v43, 5  ;;  %v1555_v41 = vrot.slane %v1553_v21, 5  ;;  %v1598_v52 = vshrl.u32 %v4101_v39, 16 }
 0x107   : > { %1200 = vst.msk [vmem:[#allocation2 + $0x54] sm:$0xf] %vm1178_vm9, %v1125_v58  ;;  %v1528_v58 = vrot.slane %v1526_v45, 4  ;;  %v4103_v53 = vld [vmem:[%s4694_s19 + $0x5c] sm:$0x1] }
 0x108   : > { %v1542_v9 = vor.u32 %v1541_v57, %v5291_v56  ;;  %v1601_v57 = vshll.u32 %v4101_v39, 16  ;;  %v4110_v39 = vld [vmem:[%s4694_s19 + $0x78] sm:$0xf] }
 0x109   : > { %v1532_v11 = vor.u32 %v1531_v59, %v1528_v58  ;;  %v1556_v58 = vor.u32 %v1555_v41, %v1552_v40  ;;  %v1587_v59 = vshrl.u32 %v4099_v30, 16 }
 0x10a   : > { %1330 = vrot.lane.b32.xlu1 %v4078_v61, %s4644_s22  ;;  %v1513_v61 = vrot.slane %v1511_v49, 5  ;;  %v1543_v27 = vrot.slane %v1542_v9, 4 }
 0x10b   : > { %1328 = vrot.lane.b32.xlu0 %v4077_v62, %s4644_s22  ;;  %1326 = vrot.lane.b32.xlu2 %v4076_v3, %s4644_s22  ;;  %v4094_v62 = vld [vmem:[%s4694_s19 + $0x38] sm:$0x1]  ;;  %v1495_v3 = vrot.slane %v1494_v51, 4  ;;  %v1533_v29 = vrot.slane %v1532_v11, 4 }
 0x10c   : > { %v1117_v2 = vpop.permute.xlu1 %1116  ;;  %v1514_v15 = vsel %vm4705_vm2, %v1509_v60, %v1513_v61 }
 0x10d   : > { %1196 = vst.msk [vmem:[#allocation2 + $0x44] sm:$0xf] %vm1178_vm9, %v1117_v2  ;;  %v1115_v10 = vpop.permute.xlu0 %1114  ;;  %v1131_v14 = vpop.permute.xlu2 %1130  ;;  %v1485_v2 = vrot.slane %v1484_v55, 4  ;;  %v1538_v46 = vsel %vm4705_vm2, %v1533_v29, %v5291_v56 }
 0x10e   : > { %1195 = vst.msk [vmem:[#allocation2 + $0x40] sm:$0xf] %vm1178_vm9, %v1115_v10  ;;  %v1545_v10 = vshll.u32 %v4094_v62, 16 }
 0x10f   : > { %1203 = vst.msk [vmem:[#allocation2 + $0x60] sm:$0xf] %vm1178_vm9, %v1131_v14  ;;  %v4091_v14 = vld [vmem:[%s4694_s19 + $0x2c] sm:$0x1]  ;;  %v1490_v22 = vsel %vm4705_vm2, %v1485_v2, %v5277_v36  ;;  %v1603_v2 = vrot.slane %v1601_v57, 5 }
 0x110   : > { %v1521_v24 = vshll.u32 %v4091_v14, 16  ;;  %v1547_v28 = vrot.slane %v1545_v10, 5  ;;  %v4100_v14 = vld [vmem:[%s4694_s19 + $0x50] sm:$0x1] }
 0x112   : > { %1336 = vrot.lane.b32.xlu1 %v4081_v16, %s4644_s22  ;;  %v1577_v16 = vshll.u32 %v4098_v0, 16  ;;  %v1523_v44 = vrot.slane %v1521_v24, 5  ;;  %v1548_v45 = vsel %vm4705_vm2, %v1543_v27, %v1547_v28 }
 0x113   : > { %1334 = vrot.lane.b32.xlu0 %v4080_v19, %s4644_s22  ;;  %1332 = vrot.lane.b32.xlu2 %v4079_v23, %s4644_s22  ;;  %v1500_v19 = vsel %vm4705_vm2, %v1495_v3, %v1499_v4  ;;  %v1518_v23 = vor.u32 %v1517_v7, %v1513_v61  ;;  %v4107_v61 = vld [vmem:[%s4694_s19 + $0x6c] sm:$0xf]  ;;  %v1617_v3 = vshll.u32 %v4103_v53, 16  ;;  %v1557_v7 = vrot.slane %v1556_v58, 4 }
 0x114   : > { %v1123_v33 = vpop.permute.xlu1 %1122  ;;  %v1579_v32 = vrot.slane %v1577_v16, 5  ;;  %v1646_v10 = vshrl.u32 %v4107_v61, 16  ;;  %v1649_v11 = vshll.u32 %v4107_v61, 16  ;;  %v1673_v53 = vshll.u32 %v4110_v39, 16 }
 0x115   : > { %1199 = vst.msk [vmem:[#allocation2 + $0x50] sm:$0xf] %vm1178_vm9, %v1123_v33  ;;  %v1121_v38 = vpop.permute.xlu0 %1120  ;;  %v1137_v42 = vpop.permute.xlu2 %1136  ;;  %v4097_v33 = vld [vmem:[%s4694_s19 + $0x44] sm:$0x1]  ;;  %v1519_v43 = vrot.slane %v1518_v23, 4  ;;  %v1619_v21 = vrot.slane %v1617_v3, 5  ;;  %v1562_v23 = vsel %vm4705_vm2, %v1557_v7, %v5316_v34 }
 0x116   : > { %1198 = vst.msk [vmem:[#allocation2 + $0x4c] sm:$0xf] %vm1178_vm9, %v1121_v38  ;;  %v1611_v38 = vshrl.u32 %v4102_v26, 16  ;;  %v1580_v49 = vor.u32 %v1579_v32, %v1576_v31  ;;  %v1569_v51 = vshll.u32 %v4097_v33, 16  ;;  %v1593_v26 = vshll.u32 %v4100_v14, 16 }
 0x117   : > { %1206 = vst.msk [vmem:[#allocation2 + $0x6c] sm:$0xf] %vm1178_vm9, %v1137_v42  ;;  %v1524_v56 = vsel %vm4705_vm2, %v1519_v43, %v1523_v44  ;;  %v1648_v29 = vrot.slane %v1646_v10, 4  ;;  %v4108_v31 = vld [vmem:[%s4694_s19 + $0x70] sm:$0xf]  ;;  %v5355_v32 = vrot.slane %v1631_v18, 5 }
 0x118   : > { %v1613_v55 = vrot.slane %v1611_v38, 4  ;;  %v1581_v62 = vrot.slane %v1580_v49, 4  ;;  %v4106_v38 = vld [vmem:[%s4694_s19 + $0x68] sm:$0x1]  ;;  %v1659_v57 = vshrl.u32 %v4108_v31, 16 }
 0x119   : > { %v4113_v10 = vld [vmem:[%s4694_s19 + $0x84] sm:$0xf] }
 0x11a   : > { %1839 = vrot.lane.b32.xlu1 %v1476_v47, %s4645_s23  ;;  %v1583_v47 = vshll.u32 %v4099_v30, 16  ;;  %v1651_v30 = vrot.slane %v1649_v11, 5 }
 0x11b   : > { %1837 = vrot.lane.b32.xlu0 %v1466_v50, %s4645_s23  ;;  %1338 = vrot.lane.b32.xlu2 %v4082_v54, %s4644_s22  ;;  %v1566_v50 = vor.u32 %v1565_v35, %v5316_v34  ;;  %v5330_v54 = vrot.slane %v1607_v37, 5  ;;  %v4111_v35 = vld [vmem:[%s4694_s19 + $0x7c] sm:$0xf] }
 0x11c   : > { %v1129_v1 = vpop.permute.xlu1 %1128  ;;  %v1585_v60 = vrot.slane %v1583_v47, 5  ;;  %v1683_v49 = vshrl.u32 %v4111_v35, 16 }
 0x11d   : > { %1202 = vst.msk [vmem:[#allocation2 + $0x5c] sm:$0xf] %vm1178_vm9, %v1129_v1  ;;  %v1127_v6 = vpop.permute.xlu0 %1126  ;;  %v1143_v12 = vpop.permute.xlu2 %1142  ;;  %v1567_v0 = vrot.slane %v1566_v50, 4  ;;  %v1571_v1 = vrot.slane %v1569_v51, 5  ;;  %v1614_v5 = vor.u32 %v1613_v55, %v5330_v54  ;;  %v1641_v51 = vshll.u32 %v4106_v38, 16 }
 0x11e   : > { %1201 = vst.msk [vmem:[#allocation2 + $0x58] sm:$0xf] %vm1178_vm9, %v1127_v6  ;;  %v1600_v6 = vrot.slane %v1598_v52, 4  ;;  %v1586_v16 = vsel %vm4705_vm2, %v1581_v62, %v1585_v60  ;;  %v1670_v52 = vshrl.u32 %v4110_v39, 16  ;;  %v1685_v62 = vrot.slane %v1683_v49, 4 }
 0x11f   : > { %1209 = vst.msk [vmem:[#allocation2 + $0x78] sm:$0xf] %vm1178_vm9, %v1143_v12  ;;  %v1589_v12 = vrot.slane %v1587_v59, 4  ;;  %v1572_v17 = vsel %vm4705_vm2, %v1567_v0, %v1571_v1  ;;  %v1615_v20 = vrot.slane %v1614_v5, 4  ;;  %v1643_v1 = vrot.slane %v1641_v51, 5 }
 0x120   : > { %v1672_v3 = vrot.slane %v1670_v52, 4  ;;  %v4119_v38 = vld [vmem:[%s4694_s19 + $0x9c] sm:$0xf] }
 0x121   : > { %v1590_v24 = vor.u32 %v1589_v12, %v1585_v60  ;;  %v1620_v34 = vsel %vm4705_vm2, %v1615_v20, %v1619_v21  ;;  %v1742_v51 = vshrl.u32 %v4119_v38, 16  ;;  %v1745_v52 = vshll.u32 %v4119_v38, 16 }
 0x122   : > { %1845 = vrot.lane.b32.xlu1 %v1514_v15, %s4645_s23  ;;  %v4104_v15 = vld [vmem:[%s4694_s19 + $0x60] sm:$0xf] }
 0x123   : > { %1843 = vrot.lane.b32.xlu0 %v1500_v19, %s4645_s23  ;;  %1841 = vrot.lane.b32.xlu2 %v1490_v22, %s4645_s23  ;;  %v1635_v19 = vshrl.u32 %v4105_v8, 16  ;;  %v1604_v22 = vor.u32 %v1603_v2, %v1600_v6  ;;  %v1622_v27 = vshrl.u32 %v4104_v15, 16  ;;  %v1625_v28 = vshll.u32 %v4104_v15, 16  ;;  %v4116_v6 = vld [vmem:[%s4694_s19 + $0x90] sm:$0xf] }
 0x124   : > { %v1135_v36 = vpop.permute.xlu1 %1134  ;;  %v1591_v41 = vrot.slane %v1590_v24, 4  ;;  %v4114_v2 = vld [vmem:[%s4694_s19 + $0x88] sm:$0xf]  ;;  %v4109_v15 = vld [vmem:[%s4694_s19 + $0x74] sm:$0x1]  ;;  %v1718_v18 = vshrl.u32 %v4116_v6, 16 }
 0x125   : > { %1205 = vst.msk [vmem:[#allocation2 + $0x68] sm:$0xf] %vm1178_vm9, %v1135_v36  ;;  %v1133_v42 = vpop.permute.xlu0 %1132  ;;  %v1279_v48 = vpop.permute.xlu2 %1278  ;;  %v1637_v33 = vrot.slane %v1635_v19, 4  ;;  %v1605_v37 = vrot.slane %v1604_v22, 4  ;;  %v1624_v43 = vrot.slane %v1622_v27, 4  ;;  %v1627_v44 = vrot.slane %v1625_v28, 5 }
 0x126   : > { %1204 = vst.msk [vmem:[#allocation2 + $0x64] sm:$0xf] %vm1178_vm9, %v1133_v42  ;;  %v1595_v42 = vrot.slane %v1593_v26, 5  ;;  %v1721_v19 = vshll.u32 %v4116_v6, 16  ;;  %v1703_v20 = vshll.u32 %v4114_v2, 16  ;;  %v1707_v21 = vshrl.u32 %v4114_v2, 16 }
 0x127   : > { %1374 = vst.msk [vmem:[#allocation2 + $0x4] sm:$0xf] %vm1372_vm10, %v1279_v48  ;;  %v1679_v48 = vshll.u32 %v4111_v35, 16  ;;  %v1638_v50 = vor.u32 %v1637_v33, %v5355_v32  ;;  %v1610_v55 = vsel %vm4705_vm2, %v1605_v37, %v5330_v54  ;;  %v1628_v59 = vor.u32 %v1627_v44, %v1624_v43  ;;  %v4112_v54 = vld [vmem:[%s4694_s19 + $0x80] sm:$0x1] }
 0x128   : > { %v1596_v58 = vsel %vm4705_vm2, %v1591_v41, %v1595_v42  ;;  %v1694_v22 = vshrl.u32 %v4113_v10, 16  ;;  %v1665_v27 = vshll.u32 %v4109_v15, 16  ;;  %v1720_v33 = vrot.slane %v1718_v18, 4  ;;  %v4115_v42 = vld [vmem:[%s4694_s19 + $0x8c] sm:$0x1] }
 0x129   : > { %v5373_v61 = vrot.slane %v1679_v48, 5  ;;  %v1639_v0 = vrot.slane %v1638_v50, 4  ;;  %v1629_v8 = vrot.slane %v1628_v59, 4  ;;  %v1723_v35 = vrot.slane %v1721_v19, 5  ;;  %v4122_v15 = vld [vmem:[%s4694_s19 + $0xa8] sm:$0xf] }
 0x12a   : > { %1851 = vrot.lane.b32.xlu1 %v1548_v45, %s4645_s23  ;;  %v1652_v45 = vor.u32 %v1651_v30, %v1648_v29  ;;  %v4117_v30 = vld [vmem:[%s4694_s19 + $0x94] sm:$0xf]  ;;  %v5398_v37 = vrot.slane %v1703_v20, 5  ;;  %v1696_v39 = vrot.slane %v1694_v22, 4  ;;  %v1667_v44 = vrot.slane %v1665_v27, 5 }
 0x12b   : > { %1849 = vrot.lane.b32.xlu0 %v1538_v46, %s4645_s23  ;;  %1847 = vrot.lane.b32.xlu2 %v1524_v56, %s4645_s23  ;;  %v1655_v46 = vshll.u32 %v4108_v31, 16  ;;  %v1686_v12 = vor.u32 %v1685_v62, %v5373_v61  ;;  %v1634_v24 = vsel %vm4705_vm2, %v1629_v8, %v5355_v32  ;;  %v1709_v32 = vrot.slane %v1707_v21, 4 }
 0x12c   : > { %v1141_v4 = vpop.permute.xlu1 %1140  ;;  %v1653_v56 = vrot.slane %v1652_v45, 4  ;;  %v1724_v49 = vor.u32 %v1723_v35, %v1720_v33  ;;  %v1727_v50 = vshll.u32 %v4117_v30, 16  ;;  %v1731_v59 = vshrl.u32 %v4117_v30, 16 }
 0x12d   : > { %1208 = vst.msk [vmem:[#allocation2 + $0x74] sm:$0xf] %vm1178_vm9, %v1141_v4  ;;  %v1139_v9 = vpop.permute.xlu0 %1138  ;;  %v1285_v13 = vpop.permute.xlu2 %1284  ;;  %v1657_v60 = vrot.slane %v1655_v46, 5  ;;  %v1675_v4 = vrot.slane %v1673_v53, 5  ;;  %v1687_v28 = vrot.slane %v1686_v12, 4  ;;  %v1766_v27 = vshrl.u32 %v4122_v15, 16 }
 0x12e   : > { %1207 = vst.msk [vmem:[#allocation2 + $0x70] sm:$0xf] %vm1178_vm9, %v1139_v9  ;;  %v1661_v9 = vrot.slane %v1659_v57, 4  ;;  %v1713_v57 = vshll.u32 %v4115_v42, 16 }
 0x12f   : > { %1377 = vst.msk [vmem:[#allocation2 + $0x10] sm:$0xf] %vm1372_vm10, %v1285_v13  ;;  %v1658_v11 = vsel %vm4705_vm2, %v1653_v56, %v1657_v60  ;;  %v1689_v13 = vshll.u32 %v4112_v54, 16  ;;  %v1744_v54 = vrot.slane %v1742_v51, 4 }
 0x130   : > { %v1662_v26 = vor.u32 %v1661_v9, %v1657_v60  ;;  %v4121_v60 = vld [vmem:[%s4694_s19 + $0xa4] sm:$0x1]  ;;  %v1715_v6 = vrot.slane %v1713_v57, 5 }
 0x131   : > { %v1691_v29 = vrot.slane %v1689_v13, 5  ;;  %v1761_v9 = vshll.u32 %v4121_v60, 16 }
 0x132   : > { %1857 = vrot.lane.b32.xlu1 %v1586_v16, %s4645_s23  ;;  %v1644_v16 = vsel %vm4705_vm2, %v1639_v0, %v1643_v1  ;;  %v1663_v43 = vrot.slane %v1662_v26, 4  ;;  %v1725_v1 = vrot.slane %v1724_v49, 4 }
 0x133   : > { %1855 = vrot.lane.b32.xlu0 %v1572_v17, %s4645_s23  ;;  %1853 = vrot.lane.b32.xlu2 %v1562_v23, %s4645_s23  ;;  %v1676_v17 = vor.u32 %v1675_v4, %v1672_v3  ;;  %v1697_v23 = vshll.u32 %v4113_v10, 16  ;;  %v1692_v45 = vsel %vm4705_vm2, %v1687_v28, %v1691_v29  ;;  %v1747_v3 = vrot.slane %v1745_v52, 5  ;;  %v4123_v10 = vld [vmem:[%s4694_s19 + $0xac] sm:$0xf] }
 0x134   : > { %v1277_v36 = vpop.permute.xlu1 %1276  ;;  %v1668_v56 = vsel %vm4705_vm2, %v1663_v43, %v1667_v44  ;;  %v1775_v22 = vshll.u32 %v4123_v10, 16  ;;  %v1769_v28 = vshll.u32 %v4122_v15, 16  ;;  %v1763_v30 = vrot.slane %v1761_v9, 5 }
 0x135   : > { %1373 = vst.msk [vmem:[#allocation2] sm:$0xf] %vm1372_vm10, %v1277_v36  ;;  %v1145_v40 = vpop.permute.xlu0 %1144  ;;  %v1291_v47 = vpop.permute.xlu2 %1290  ;;  %v1677_v31 = vrot.slane %v1676_v17, 4  ;;  %v4120_v36 = vld [vmem:[%s4694_s19 + $0xa0] sm:$0xf]  ;;  %v1748_v17 = vor.u32 %v1747_v3, %v1744_v54  ;;  %v1768_v44 = vrot.slane %v1766_v27, 4 }
 0x136   : > { %1210 = vst.msk [vmem:[#allocation2 + $0x7c] sm:$0xf] %vm1178_vm9, %v1145_v40  ;;  %v1699_v40 = vrot.slane %v1697_v23, 5  ;;  %v1755_v48 = vshrl.u32 %v4120_v36, 16  ;;  %v1779_v23 = vshrl.u32 %v4123_v10, 16 }
 0x137   : > { %1380 = vst.msk [vmem:[#allocation2 + $0x1c] sm:$0xf] %vm1372_vm10, %v1291_v47  ;;  %v1751_v47 = vshll.u32 %v4120_v36, 16  ;;  %v1682_v53 = vsel %vm4705_vm2, %v1677_v31, %v5373_v61  ;;  %v1729_v61 = vrot.slane %v1727_v50, 5  ;;  %v4126_v31 = vld [vmem:[%s4694_s19 + $0xb8] sm:$0xf] }
 0x138   : > { %v1757_v0 = vrot.slane %v1755_v48, 4  ;;  %v1749_v33 = vrot.slane %v1748_v17, 4  ;;  %v1781_v38 = vrot.slane %v1779_v23, 4 }
 0x139   : > { %v5415_v62 = vrot.slane %v1751_v47, 5  ;;  %v1799_v47 = vshll.u32 %v4126_v31, 16 }
 0x13a   : > { %1863 = vrot.lane.b32.xlu1 %v1620_v34, %s4645_s23 }
 0x13b   : > { %1861 = vrot.lane.b32.xlu0 %v1610_v55, %s4645_s23  ;;  %1859 = vrot.lane.b32.xlu2 %v1596_v58, %s4645_s23  ;;  %v1710_v55 = vor.u32 %v1709_v32, %v5398_v37  ;;  %v1700_v58 = vor.u32 %v1699_v40, %v1696_v39  ;;  %v1758_v12 = vor.u32 %v1757_v0, %v5415_v62  ;;  %v1777_v32 = vrot.slane %v1775_v22, 5  ;;  %v4129_v39 = vld [vmem:[%s4694_s19 + $0xc4] sm:$0xf]  ;;  %v4128_v40 = vld [vmem:[%s4694_s19 + $0xc0] sm:$0xf] }
 0x13c   : > { %v1283_v5 = vpop.permute.xlu1 %1282  ;;  %v1754_v49 = vsel %vm4705_vm2, %v1749_v33, %v5415_v62  ;;  %v1823_v51 = vshll.u32 %v4129_v39, 16  ;;  %v1827_v52 = vshrl.u32 %v4129_v39, 16  ;;  %v1814_v57 = vshrl.u32 %v4128_v40, 16  ;;  %v4134_v33 = vld [vmem:[%s4694_s19 + $0x18] sm:$0xe] }
 0x13d   : > { %1376 = vst.msk [vmem:[#allocation2 + $0xc] sm:$0xf] %vm1372_vm10, %v1283_v5  ;;  %v1281_v7 = vpop.permute.xlu0 %1280  ;;  %v1297_v14 = vpop.permute.xlu2 %1296  ;;  %v1711_v5 = vrot.slane %v1710_v55, 4  ;;  %v1701_v2 = vrot.slane %v1700_v58, 4  ;;  %v1759_v29 = vrot.slane %v1758_v12, 4  ;;  %v1817_v58 = vshll.u32 %v4128_v40, 16 }
 0x13e   : > { %1375 = vst.msk [vmem:[#allocation2 + $0x8] sm:$0xf] %vm1372_vm10, %v1281_v7  ;;  %v4125_v7 = vld [vmem:[%s4694_s19 + $0xb4] sm:$0xf]  ;;  %v1801_v0 = vrot.slane %v1799_v47, 5 }
 0x13f   : > { %1383 = vst.msk [vmem:[#allocation2 + $0x28] sm:$0xf] %vm1372_vm10, %v1297_v14  ;;  %v4118_v14 = vld [vmem:[%s4694_s19 + $0x98] sm:$0x1]  ;;  %v1790_v18 = vshrl.u32 %v4125_v7, 16  ;;  %v1793_v19 = vshll.u32 %v4125_v7, 16  ;;  %v1716_v20 = vsel %vm4705_vm2, %v1711_v5, %v1715_v6  ;;  %v1706_v21 = vsel %vm4705_vm2, %v1701_v2, %v5398_v37 }
 0x140   : > { %v1737_v26 = vshll.u32 %v4118_v14, 16  ;;  %v4130_v5 = vld [vmem:[%s4694_s19 + $0xc8] sm:$0x1]  ;;  %v1816_v6 = vrot.slane %v1814_v57, 4  ;;  %v1819_v2 = vrot.slane %v1817_v58, 5 }
 0x141   : > { %v1792_v35 = vrot.slane %v1790_v18, 4  ;;  %v1795_v36 = vrot.slane %v1793_v19, 5  ;;  %v1833_v14 = vshll.u32 %v4130_v5, 16 }
 0x142   : > { %1869 = vrot.lane.b32.xlu1 %v1658_v11, %s4645_s23  ;;  %v1733_v11 = vrot.slane %v1731_v59, 4  ;;  %v1739_v43 = vrot.slane %v1737_v26, 5  ;;  %v1803_v59 = vshrl.u32 %v4126_v31, 16  ;;  %v4132_v26 = vld [vmem:[%s4694_s19 + $0x10] sm:$0xf] }
 0x143   : > { %1867 = vrot.lane.b32.xlu0 %v1644_v16, %s4645_s23  ;;  %1865 = vrot.lane.b32.xlu2 %v1634_v24, %s4645_s23  ;;  %v1730_v16 = vsel %vm4705_vm2, %v1725_v1, %v1729_v61  ;;  %v1796_v50 = vor.u32 %v1795_v36, %v1792_v35  ;;  %v1825_v1 = vrot.slane %v1823_v51, 5  ;;  %v4135_v35 = vld [vmem:[%s4694_s19 + $0x1c] sm:$0xf]  ;;  %v2064_v36 = vrot.slane %v4132_v26, 5  ;;  %v4137_v51 = vld [vmem:[%s4694_s19 + $0x24] sm:$0xe] }
 0x144   : > { %v1289_v34 = vpop.permute.xlu1 %1288  ;;  %v1734_v24 = vor.u32 %v1733_v11, %v1729_v61  ;;  %v1829_v61 = vrot.slane %v1827_v52, 4  ;;  %v1805_v9 = vrot.slane %v1803_v59, 4  ;;  %v4127_v11 = vld [vmem:[%s4694_s19 + $0xbc] sm:$0x1]  ;;  %v2071_v39 = vrot.slane %v4135_v35, 5 }
 0x145   : > { %1379 = vst.msk [vmem:[#allocation2 + $0x18] sm:$0xf] %vm1372_vm10, %v1289_v34  ;;  %v1287_v41 = vpop.permute.xlu0 %1286  ;;  %v1303_v46 = vpop.permute.xlu2 %1302  ;;  %v4124_v34 = vld [vmem:[%s4694_s19 + $0xb0] sm:$0x1]  ;;  %v1797_v62 = vrot.slane %v1796_v50, 4  ;;  %v1809_v19 = vshll.u32 %v4127_v11, 16 }
 0x146   : > { %1378 = vst.msk [vmem:[#allocation2 + $0x14] sm:$0xf] %vm1372_vm10, %v1287_v41  ;;  %v1735_v42 = vrot.slane %v1734_v24, 4  ;;  %v1785_v55 = vshll.u32 %v4124_v34, 16  ;;  %v1806_v18 = vor.u32 %v1805_v9, %v1801_v0  ;;  %v4133_v34 = vld [vmem:[%s4694_s19 + $0x14] sm:$0x1] }
 0x147   : > { %1386 = vst.msk [vmem:[#allocation2 + $0x34] sm:$0xf] %vm1372_vm10, %v1303_v46  ;;  %v1764_v46 = vsel %vm4705_vm2, %v1759_v29, %v1763_v30  ;;  %v1802_v12 = vsel %vm4705_vm2, %v1797_v62, %v1801_v0  ;;  %v4139_v50 = vld [vmem:[%s4694_s19 + $0x2c] sm:$0x1]  ;;  %v4181_v59 = vrot.slane %v4137_v51, 9  ;;  %v2073_v62 = vrot.slane %v2071_v39, 4 }
 0x148   : > { %v1807_v27 = vrot.slane %v1806_v18, 4  ;;  %v2081_v57 = vrot.slane %v4139_v50, 5 }
 0x14a   : > { %1875 = vrot.lane.b32.xlu1 %v1692_v45, %s4645_s23  ;;  %v1771_v45 = vrot.slane %v1769_v28, 5  ;;  %v1811_v28 = vrot.slane %v1809_v19, 5 }
 0x14b   : > { %1873 = vrot.lane.b32.xlu0 %v1682_v53, %s4645_s23  ;;  %1871 = vrot.lane.b32.xlu2 %v1668_v56, %s4645_s23  ;;  %v1782_v53 = vor.u32 %v1781_v38, %v1777_v32  ;;  %v1740_v56 = vsel %vm4705_vm2, %v1735_v42, %v1739_v43  ;;  %v4180_v38 = vrot.slane %v4134_v33, 9  ;;  %v2067_v42 = vrot.slane %v4133_v34, 5  ;;  %v4138_v43 = vld [vmem:[%s4694_s19 + $0x28] sm:$0xf] }
 0x14c   : > { %v1295_v4 = vpop.permute.xlu1 %1294  ;;  %v1772_v60 = vor.u32 %v1771_v45, %v1768_v44 }
 0x14d   : > { %1382 = vst.msk [vmem:[#allocation2 + $0x24] sm:$0xf] %vm1372_vm10, %v1295_v4  ;;  %v1293_v8 = vpop.permute.xlu0 %1292  ;;  %v1309_v13 = vpop.permute.xlu2 %1308  ;;  %v1783_v3 = vrot.slane %v1782_v53, 4  ;;  %v1787_v4 = vrot.slane %v1785_v55, 5  ;;  %v2072_v47 = vsel %vm4879_vm6, %v4180_v38, %v2071_v39  ;;  %v4136_v53 = vld [vmem:[%s4694_s19 + $0x20] sm:$0x1] }
 0x14e   : > { %1381 = vst.msk [vmem:[#allocation2 + $0x20] sm:$0xf] %vm1372_vm10, %v1293_v8  ;;  %v1773_v8 = vrot.slane %v1772_v60, 4  ;;  %v4141_v60 = vld [vmem:[%s4694_s19 + $0x34] sm:$0xf]  ;;  %v2074_v0 = vrot.slane %v4136_v53, 5 }
 0x14f   : > { %1389 = vst.msk [vmem:[#allocation2 + $0x40] sm:$0xf] %vm1372_vm10, %v1309_v13  ;;  %v1830_v13 = vor.u32 %v1829_v61, %v1825_v1  ;;  %v1788_v15 = vsel %vm4705_vm2, %v1783_v3, %v1787_v4  ;;  %v4143_v3 = vld [vmem:[%s4694_s19 + $0x3c] sm:$0xe]  ;;  %v4144_v4 = vld [vmem:[%s4694_s19 + $0x40] sm:$0xf] }
 0x150   : > { %v1778_v17 = vsel %vm4705_vm2, %v1773_v8, %v1777_v32  ;;  %v4131_v32 = vld [vmem:[%s4694_s19 + $0xc] sm:$0xe]  ;;  %v2085_v5 = vrot.slane %v4141_v60, 5  ;;  %v4183_v8 = vrot.slane %v4143_v3, 9  ;;  %v2092_v9 = vrot.slane %v4144_v4, 5 }
 0x151   : > { %v4179_v45 = vrot.slane %v4131_v32, 9  ;;  %v4153_v32 = vld [vmem:[%s4694_s19 + $0x64] sm:$0xf]  ;;  %v4151_v39 = vld [vmem:[%s4694_s19 + $0x5c] sm:$0x1] }
 0x152   : > { %1881 = vrot.lane.b32.xlu1 %v1730_v16, %s4645_s23  ;;  %v1820_v16 = vor.u32 %v1819_v2, %v1816_v6  ;;  %v4142_v6 = vld [vmem:[%s4694_s19 + $0x38] sm:$0x1]  ;;  %v2075_v2 = vsel %vm4879_vm6, %v2073_v62, %v2074_v0  ;;  %v2087_v11 = vrot.slane %v2085_v5, 4 }
 0x153   : > { %1879 = vrot.lane.b32.xlu0 %v1716_v20, %s4645_s23  ;;  %1877 = vrot.lane.b32.xlu2 %v1706_v21, %s4645_s23  ;;  %v1831_v20 = vrot.slane %v1830_v13, 4  ;;  %v1835_v21 = vrot.slane %v1833_v14, 5  ;;  %v2065_v52 = vsel %vm4879_vm6, %v4179_v45, %v2064_v36  ;;  %v4147_v13 = vld [vmem:[%s4694_s19 + $0x4c] sm:$0xf] }
 0x154   : > { %v1301_v37 = vpop.permute.xlu1 %1300  ;;  %v1821_v23 = vrot.slane %v1820_v16, 4  ;;  %v2099_v18 = vrot.slane %v4147_v13, 5 }
 0x155   : > { %1385 = vst.msk [vmem:[#allocation2 + $0x30] sm:$0xf] %vm1372_vm10, %v1301_v37  ;;  %v1299_v41 = vpop.permute.xlu0 %1298  ;;  %v1315_v48 = vpop.permute.xlu2 %1314  ;;  %v1836_v30 = vsel %vm4705_vm2, %v1831_v20, %v1835_v21  ;;  %v1812_v37 = vsel %vm4705_vm2, %v1807_v27, %v1811_v28  ;;  %v4148_v20 = vld [vmem:[%s4694_s19 + $0x50] sm:$0x1]  ;;  %v4146_v21 = vld [vmem:[%s4694_s19 + $0x48] sm:$0xe] }
 0x156   : > { %1384 = vst.msk [vmem:[#allocation2 + $0x2c] sm:$0xf] %vm1372_vm10, %v1299_v41  ;;  %v1826_v31 = vsel %vm4705_vm2, %v1821_v23, %v1825_v1  ;;  %v2066_v41 = vrot.slane %v2064_v36, 4  ;;  %v4145_v23 = vld [vmem:[%s4694_s19 + $0x44] sm:$0x1]  ;;  %v2102_v26 = vrot.slane %v4148_v20, 5 }
 0x157   : > { %1392 = vst.msk [vmem:[#allocation2 + $0x4c] sm:$0xf] %vm1372_vm10, %v1315_v48  ;;  %v2078_v48 = vrot.slane %v4138_v43, 5  ;;  %v4184_v28 = vrot.slane %v4146_v21, 9  ;;  %v2095_v33 = vrot.slane %v4145_v23, 5  ;;  %v2113_v43 = vrot.slane %v4153_v32, 5 }
 0x159   : > { %v2080_v55 = vrot.slane %v2078_v48, 4  ;;  %v2100_v34 = vsel %vm4879_vm6, %v4184_v28, %v2099_v18  ;;  %v4163_v28 = vld [vmem:[%s4694_s19 + $0x8c] sm:$0x1] }
 0x15a   : > { %1887 = vrot.lane.b32.xlu1 %v1764_v46, %s4645_s23 }
 0x15b   : > { %1885 = vrot.lane.b32.xlu0 %v1754_v49, %s4645_s23  ;;  %1883 = vrot.lane.b32.xlu2 %v1740_v56, %s4645_s23  ;;  %v2068_v49 = vsel %vm4879_vm6, %v2066_v41, %v2067_v42  ;;  %v2082_v61 = vsel %vm4879_vm6, %v2080_v55, %v2081_v57  ;;  %v4149_v41 = vld [vmem:[%s4694_s19 + $0x54] sm:$0xe]  ;;  %v4157_v55 = vld [vmem:[%s4694_s19 + $0x74] sm:$0x1] }
 0x15c   : > { %v1307_v54 = vpop.permute.xlu1 %1306  ;;  %v4155_v57 = vld [vmem:[%s4694_s19 + $0x6c] sm:$0xe]  ;;  %v2123_v60 = vrot.slane %v4157_v55, 5 }
 0x15d   : > { %1388 = vst.msk [vmem:[#allocation2 + $0x3c] sm:$0xf] %vm1372_vm10, %v1307_v54  ;;  %v1305_v7 = vpop.permute.xlu0 %1304  ;;  %v1321_v10 = vpop.permute.xlu2 %1320  ;;  %v2079_v54 = vsel %vm4879_vm6, %v4181_v59, %v2078_v48  ;;  %v4154_v59 = vld [vmem:[%s4694_s19 + $0x68] sm:$0x1]  ;;  %v4187_v0 = vrot.slane %v4155_v57, 9 }
 0x15e   : > { %1387 = vst.msk [vmem:[#allocation2 + $0x38] sm:$0xf] %vm1372_vm10, %v1305_v7  ;;  %v4140_v7 = vld [vmem:[%s4694_s19 + $0x30] sm:$0xe]  ;;  %v2116_v3 = vrot.slane %v4154_v59, 5 }
 0x15f   : > { %1395 = vst.msk [vmem:[#allocation2 + $0x58] sm:$0xf] %vm1372_vm10, %v1321_v10 }
 0x162   : > { %1893 = vrot.lane.b32.xlu1 %v1802_v12, %s4645_s23  ;;  %v2088_v12 = vrot.slane %v4142_v6, 5 }
 0x163   : > { %1891 = vrot.lane.b32.xlu0 %v1788_v15, %s4645_s23  ;;  %1889 = vrot.lane.b32.xlu2 %v1778_v17, %s4645_s23  ;;  %v4182_v15 = vrot.slane %v4140_v7, 9  ;;  %v2093_v17 = vsel %vm4879_vm6, %v4183_v8, %v2092_v9  ;;  %v4162_v7 = vld [vmem:[%s4694_s19 + $0x88] sm:$0xf] }
 0x164   : > { %v1313_v22 = vpop.permute.xlu1 %1312  ;;  %v2089_v19 = vsel %vm4879_vm6, %v2087_v11, %v2088_v12  ;;  %v4158_v11 = vld [vmem:[%s4694_s19 + $0x78] sm:$0xe]  ;;  %v2134_v13 = vrot.slane %v4162_v7, 5 }
 0x165   : > { %1391 = vst.msk [vmem:[#allocation2 + $0x48] sm:$0xf] %vm1372_vm10, %v1313_v22  ;;  %v1311_v24 = vpop.permute.xlu0 %1310  ;;  %v1327_v29 = vpop.permute.xlu2 %1326  ;;  %v2086_v22 = vsel %vm4879_vm6, %v4182_v15, %v2085_v5 }
 0x166   : > { %1390 = vst.msk [vmem:[#allocation2 + $0x44] sm:$0xf] %vm1372_vm10, %v1311_v24  ;;  %v2101_v24 = vrot.slane %v2099_v18, 4 }
 0x167   : > { %1398 = vst.msk [vmem:[#allocation2 + $0x64] sm:$0xf] %vm1372_vm10, %v1327_v29 }
 0x168   : > { %v2103_v36 = vsel %vm4879_vm6, %v2101_v24, %v2102_v26  ;;  %v4166_v24 = vld [vmem:[%s4694_s19 + $0x98] sm:$0x1]  ;;  %v4164_v26 = vld [vmem:[%s4694_s19 + $0x90] sm:$0xe] }
 0x16a   : > { %1899 = vrot.lane.b32.xlu1 %v1836_v30, %s4645_s23  ;;  %v4150_v30 = vld [vmem:[%s4694_s19 + $0x58] sm:$0xf] }
 0x16b   : > { %1897 = vrot.lane.b32.xlu0 %v1826_v31, %s4645_s23  ;;  %1895 = vrot.lane.b32.xlu2 %v1812_v37, %s4645_s23  ;;  %v2094_v31 = vrot.slane %v2092_v9, 4  ;;  %v4152_v37 = vld [vmem:[%s4694_s19 + $0x60] sm:$0xe]  ;;  %v2106_v38 = vrot.slane %v4150_v30, 5  ;;  %v4160_v9 = vld [vmem:[%s4694_s19 + $0x80] sm:$0x1] }
 0x16c   : > { %v1319_v40 = vpop.permute.xlu1 %1318  ;;  %v4186_v42 = vrot.slane %v4152_v37, 9  ;;  %v2144_v30 = vrot.slane %v4166_v24, 5  ;;  %v2137_v37 = vrot.slane %v4163_v28, 5  ;;  %v4197_v28 = vld [vmem:[%s4694_s19 + $0x24] sm:$0xf]  ;;  %s4469_s23 = sshll.u32 %s6303_s12, 7 }
 0x16d   : > { %1394 = vst.msk [vmem:[#allocation2 + $0x54] sm:$0xf] %vm1372_vm10, %v1319_v40  ;;  %v1317_v44 = vpop.permute.xlu0 %1316  ;;  %v1333_v46 = vpop.permute.xlu2 %1332  ;;  %v2096_v40 = vsel %vm4879_vm6, %v2094_v31, %v2095_v33  ;;  %v2108_v45 = vrot.slane %v2106_v38, 4  ;;  %v4190_v33 = vrot.slane %v4164_v26, 9 }
 0x16e   : > { %1393 = vst.msk [vmem:[#allocation2 + $0x50] sm:$0xf] %vm1372_vm10, %v1317_v44  ;;  %v2114_v51 = vsel %vm4879_vm6, %v4186_v42, %v2113_v43 }
 0x16f   : > { %1401 = vst.msk [vmem:[#allocation2 + $0x70] sm:$0xf] %vm1372_vm10, %v1333_v46  ;;  %v2109_v46 = vrot.slane %v4151_v39, 5 }
 0x171   : > { %v2110_v53 = vsel %vm4879_vm6, %v2108_v45, %v2109_v46  ;;  %v4167_v45 = vld [vmem:[%s4694_s19 + $0x9c] sm:$0xe] }
 0x172   : > { %2178 = vrot.lane.b32.xlu1 %v2072_v47, %s4646_s24  ;;  %v4156_v47 = vld [vmem:[%s4694_s19 + $0x70] sm:$0xf] }
 0x173   : > { %2176 = vrot.lane.b32.xlu0 %v2068_v49, %s4646_s24  ;;  %2174 = vrot.lane.b32.xlu2 %v2065_v52, %s4646_s24  ;;  %v4185_v49 = vrot.slane %v4149_v41, 9  ;;  %v2120_v52 = vrot.slane %v4156_v47, 5  ;;  %v4171_v41 = vld [vmem:[%s4694_s19 + $0xac] sm:$0xf] }
 0x174   : > { %v1325_v58 = vpop.permute.xlu1 %1324  ;;  %v2155_v47 = vrot.slane %v4171_v41, 5 }
 0x175   : > { %1397 = vst.msk [vmem:[#allocation2 + $0x60] sm:$0xf] %vm1372_vm10, %v1325_v58  ;;  %v1323_v56 = vpop.permute.xlu0 %1322  ;;  %v1339_v1 = vpop.permute.xlu2 %1338  ;;  %v2107_v58 = vsel %vm4879_vm6, %v4185_v49, %v2106_v38  ;;  %v2121_v6 = vsel %vm4879_vm6, %v4187_v0, %v2120_v52  ;;  %v4172_v0 = vld [vmem:[%s4694_s19 + $0xb0] sm:$0x1] }
 0x176   : > { %1396 = vst.msk [vmem:[#allocation2 + $0x5c] sm:$0xf] %vm1372_vm10, %v1323_v56  ;;  %v2122_v56 = vrot.slane %v2120_v52, 4 }
 0x177   : > { %1404 = vst.msk [vmem:[#allocation2 + $0x7c] sm:$0xf] %vm1372_vm10, %v1339_v1 }
 0x178   : > { %v2124_v5 = vsel %vm4879_vm6, %v2122_v56, %v2123_v60  ;;  %v4175_v56 = vld [vmem:[%s4694_s19 + $0xbc] sm:$0x1]  ;;  %v4173_v60 = vld [vmem:[%s4694_s19 + $0xb4] sm:$0xe] }
 0x17a   : > { %2184 = vrot.lane.b32.xlu1 %v2082_v61, %s4646_s24  ;;  %v4159_v61 = vld [vmem:[%s4694_s19 + $0x7c] sm:$0xf] }
 0x17b   : > { %2182 = vrot.lane.b32.xlu0 %v2079_v54, %s4646_s24  ;;  %2180 = vrot.lane.b32.xlu2 %v2075_v2, %s4646_s24  ;;  %v2115_v54 = vrot.slane %v2113_v43, 4  ;;  %v4161_v2 = vld [vmem:[%s4694_s19 + $0x84] sm:$0xe]  ;;  %v2127_v8 = vrot.slane %v4159_v61, 5  ;;  %v4169_v43 = vld [vmem:[%s4694_s19 + $0xa4] sm:$0x1] }
 0x17c   : > { %v1331_v10 = vpop.permute.xlu1 %1330  ;;  %v4189_v12 = vrot.slane %v4161_v2, 9  ;;  %v2165_v61 = vrot.slane %v4175_v56, 5  ;;  %v2158_v2 = vrot.slane %v4172_v0, 5  ;;  %v4211_v56 = vld [vmem:[%s4694_s19 + $0x78] sm:$0xf] }
 0x17d   : > { %1400 = vst.msk [vmem:[#allocation2 + $0x6c] sm:$0xf] %vm1372_vm10, %v1331_v10  ;;  %v1329_v14 = vpop.permute.xlu0 %1328  ;;  %v1842_v16 = vpop.permute.xlu2 %1841  ;;  %v2117_v10 = vsel %vm4879_vm6, %v2115_v54, %v2116_v3  ;;  %v2129_v15 = vrot.slane %v2127_v8, 4  ;;  %v4193_v3 = vrot.slane %v4173_v60, 9 }
 0x17e   : > { %1399 = vst.msk [vmem:[#allocation2 + $0x68] sm:$0xf] %vm1372_vm10, %v1329_v14  ;;  %v2135_v21 = vsel %vm4879_vm6, %v4189_v12, %v2134_v13 }
 0x17f   : > { %1936 = vst.msk [vmem:[#allocation2 + $0x8] sm:$0xf] %vm1933_vm11, %v1842_v16  ;;  %v2130_v16 = vrot.slane %v4160_v9, 5 }
 0x181   : > { %v2131_v23 = vsel %vm4879_vm6, %v2129_v15, %v2130_v16 }
 0x182   : > { %2190 = vrot.lane.b32.xlu1 %v2093_v17, %s4646_s24  ;;  %v4165_v17 = vld [vmem:[%s4694_s19 + $0x94] sm:$0xf] }
 0x183   : > { %2188 = vrot.lane.b32.xlu0 %v2089_v19, %s4646_s24  ;;  %2186 = vrot.lane.b32.xlu2 %v2086_v22, %s4646_s24  ;;  %v4188_v19 = vrot.slane %v4158_v11, 9  ;;  %v2141_v22 = vrot.slane %v4165_v17, 5  ;;  %v4178_v11 = vld [vmem:[%s4694_s19 + $0xc8] sm:$0x1] }
 0x184   : > { %v1337_v27 = vpop.permute.xlu1 %1336  ;;  %v2172_v16 = vrot.slane %v4178_v11, 5  ;;  %v4253_v11 = vld [vmem:[%s4694_s19 + $0x80] sm:$0x1] }
 0x185   : > { %1403 = vst.msk [vmem:[#allocation2 + $0x78] sm:$0xf] %vm1372_vm10, %v1337_v27  ;;  %v1335_v29 = vpop.permute.xlu0 %1334  ;;  %v1848_v35 = vpop.permute.xlu2 %1847  ;;  %v2128_v27 = vsel %vm4879_vm6, %v4188_v19, %v2127_v8  ;;  %v2142_v39 = vsel %vm4879_vm6, %v4190_v33, %v2141_v22 }
 0x186   : > { %1402 = vst.msk [vmem:[#allocation2 + $0x74] sm:$0xf] %vm1372_vm10, %v1335_v29  ;;  %v2143_v29 = vrot.slane %v2141_v22, 4 }
 0x187   : > { %1939 = vst.msk [vmem:[#allocation2 + $0x14] sm:$0xf] %vm1933_vm11, %v1848_v35 }
 0x188   : > { %v2145_v38 = vsel %vm4879_vm6, %v2143_v29, %v2144_v30  ;;  %v4196_v29 = vld [vmem:[%s4694_s19 + $0x1c] sm:$0xf] }
 0x18a   : > { %2196 = vrot.lane.b32.xlu1 %v2103_v36, %s4646_s24  ;;  %v4168_v36 = vld [vmem:[%s4694_s19 + $0xa0] sm:$0xf] }
 0x18b   : > { %2194 = vrot.lane.b32.xlu0 %v2100_v34, %s4646_s24  ;;  %2192 = vrot.lane.b32.xlu2 %v2096_v40, %s4646_s24  ;;  %v2136_v34 = vrot.slane %v2134_v13, 4  ;;  %v4170_v40 = vld [vmem:[%s4694_s19 + $0xa8] sm:$0xe]  ;;  %v2148_v42 = vrot.slane %v4168_v36, 5  ;;  %v4176_v13 = vld [vmem:[%s4694_s19 + $0xc0] sm:$0xe] }
 0x18c   : > { %v1840_v44 = vpop.permute.xlu1 %1839  ;;  %v4192_v46 = vrot.slane %v4170_v40, 9  ;;  %v4200_v36 = vld [vmem:[%s4694_s19 + $0x34] sm:$0xf]  ;;  %v4204_v40 = vld [vmem:[%s4694_s19 + $0x4c] sm:$0xf] }
 0x18d   : > { %1935 = vst.msk [vmem:[#allocation2 + $0x4] sm:$0xf] %vm1933_vm11, %v1840_v44  ;;  %v1838_v48 = vpop.permute.xlu0 %1837  ;;  %v1854_v50 = vpop.permute.xlu2 %1853  ;;  %v2138_v44 = vsel %vm4879_vm6, %v2136_v34, %v2137_v37  ;;  %v2150_v49 = vrot.slane %v2148_v42, 4  ;;  %v4199_v34 = vld [vmem:[%s4694_s19 + $0x30] sm:$0xf] }
 0x18e   : > { %1934 = vst.msk [vmem:[#allocation2] sm:$0xf] %vm1933_vm11, %v1838_v48  ;;  %v2156_v57 = vsel %vm4879_vm6, %v4192_v46, %v2155_v47 }
 0x18f   : > { %1942 = vst.msk [vmem:[#allocation2 + $0x20] sm:$0xf] %vm1933_vm11, %v1854_v50  ;;  %v2151_v50 = vrot.slane %v4169_v43, 5  ;;  %v4203_v43 = vld [vmem:[%s4694_s19 + $0x48] sm:$0xf] }
 0x191   : > { %v2152_v59 = vsel %vm4879_vm6, %v2150_v49, %v2151_v50  ;;  %v4264_v49 = vld [vmem:[%s4694_s19 + $0xac] sm:$0xf] }
 0x192   : > { %2202 = vrot.lane.b32.xlu1 %v2114_v51, %s4646_s24  ;;  %v4174_v51 = vld [vmem:[%s4694_s19 + $0xb8] sm:$0xf] }
 0x193   : > { %2200 = vrot.lane.b32.xlu0 %v2110_v53, %s4646_s24  ;;  %2198 = vrot.lane.b32.xlu2 %v2107_v58, %s4646_s24  ;;  %v4191_v53 = vrot.slane %v4167_v45, 9  ;;  %v2162_v58 = vrot.slane %v4174_v51, 5  ;;  %v4263_v51 = vld [vmem:[%s4694_s19 + $0xa8] sm:$0xf] }
 0x194   : > { %v1846_v62 = vpop.permute.xlu1 %1845  ;;  %v2834_v60 = vshrl.u32 %v4263_v51, 16 }
 0x195   : > { %1938 = vst.msk [vmem:[#allocation2 + $0x10] sm:$0xf] %vm1933_vm11, %v1846_v62  ;;  %v1844_v1 = vpop.permute.xlu0 %1843  ;;  %v1860_v4 = vpop.permute.xlu2 %1859  ;;  %v2149_v62 = vsel %vm4879_vm6, %v4191_v53, %v2148_v42  ;;  %v2163_v9 = vsel %vm4879_vm6, %v4193_v3, %v2162_v58 }
 0x196   : > { %1937 = vst.msk [vmem:[#allocation2 + $0xc] sm:$0xf] %vm1933_vm11, %v1844_v1  ;;  %v2164_v1 = vrot.slane %v2162_v58, 4  ;;  %v2843_v58 = vshll.u32 %v4264_v49, 16 }
 0x197   : > { %1945 = vst.msk [vmem:[#allocation2 + $0x2c] sm:$0xf] %vm1933_vm11, %v1860_v4 }
 0x198   : > { %v2166_v8 = vsel %vm4879_vm6, %v2164_v1, %v2165_v61  ;;  %v4205_v1 = vld [vmem:[%s4694_s19 + $0x54] sm:$0xf]  ;;  %v2845_v3 = vrot.slane %v2843_v58, 5  ;;  %v4240_v58 = vld [vmem:[%s4694_s19 + $0x4c] sm:$0xf] }
 0x19a   : > { %2208 = vrot.lane.b32.xlu1 %v2124_v5, %s4646_s24  ;;  %v4177_v5 = vld [vmem:[%s4694_s19 + $0xc4] sm:$0xf] }
 0x19b   : > { %2206 = vrot.lane.b32.xlu0 %v2121_v6, %s4646_s24  ;;  %2204 = vrot.lane.b32.xlu2 %v2117_v10, %s4646_s24  ;;  %v2157_v6 = vrot.slane %v2155_v47, 4  ;;  %v2169_v10 = vrot.slane %v4177_v5, 5 }
 0x19c   : > { %v1852_v14 = vpop.permute.xlu1 %1851 }
 0x19d   : > { %1941 = vst.msk [vmem:[#allocation2 + $0x1c] sm:$0xf] %vm1933_vm11, %v1852_v14  ;;  %v1850_v18 = vpop.permute.xlu0 %1849  ;;  %v1866_v20 = vpop.permute.xlu2 %1865  ;;  %v2159_v12 = vsel %vm4879_vm6, %v2157_v6, %v2158_v2  ;;  %v2171_v15 = vrot.slane %v2169_v10, 4  ;;  %v4265_v6 = vld [vmem:[%s4694_s19 + $0xb0] sm:$0x1]  ;;  %v2836_v2 = vrot.slane %v2834_v60, 4 }
 0x19e   : > { %1940 = vst.msk [vmem:[#allocation2 + $0x18] sm:$0xf] %vm1933_vm11, %v1850_v18  ;;  %v4194_v18 = vrot.slane %v4176_v13, 9 }
 0x19f   : > { %1948 = vst.msk [vmem:[#allocation2 + $0x38] sm:$0xf] %vm1933_vm11, %v1866_v20  ;;  %v4195_v20 = vld [vmem:[%s4694_s19 + $0x18] sm:$0xf] }
 0x1a0   : > { %v2170_v22 = vsel %vm4879_vm6, %v4194_v18, %v2169_v10 }
 0x1a2   : > { %2214 = vrot.lane.b32.xlu1 %v2135_v21, %s4646_s24  ;;  %v2173_v21 = vsel %vm4879_vm6, %v2171_v15, %v2172_v16  ;;  %v4220_v15 = vld [vmem:[%s4694_s19 + $0xac] sm:$0xf] }
 0x1a3   : > { %2212 = vrot.lane.b32.xlu0 %v2131_v23, %s4646_s24  ;;  %2210 = vrot.lane.b32.xlu2 %v2128_v27, %s4646_s24  ;;  %v4198_v27 = vld [vmem:[%s4694_s19 + $0x28] sm:$0xf] }
 0x1a4   : > { %v1858_v31 = vpop.permute.xlu1 %1857 }
 0x1a5   : > { %1944 = vst.msk [vmem:[#allocation2 + $0x28] sm:$0xf] %vm1933_vm11, %v1858_v31  ;;  %v1856_v35 = vpop.permute.xlu0 %1855  ;;  %v1872_v32 = vpop.permute.xlu2 %1871 }
 0x1a6   : > { %1943 = vst.msk [vmem:[#allocation2 + $0x24] sm:$0xf] %vm1933_vm11, %v1856_v35  ;;  %v4201_v35 = vld [vmem:[%s4694_s19 + $0x3c] sm:$0xf] }
 0x1a7   : > { %1951 = vst.msk [vmem:[#allocation2 + $0x44] sm:$0xf] %vm1933_vm11, %v1872_v32  ;;  %v4251_v32 = vld [vmem:[%s4694_s19 + $0x78] sm:$0xf] }
 0x1a8   : > { %v2738_v41 = vshrl.u32 %v4251_v32, 16  ;;  %v2741_v42 = vshll.u32 %v4251_v32, 16  ;;  %v4312_v32 = vld [vmem:[%s4694_s19 + $0xac] sm:$0xf] }
 0x1aa   : > { %2220 = vrot.lane.b32.xlu1 %v2145_v38, %s4646_s24  ;;  %v2740_v45 = vrot.slane %v2738_v41, 4  ;;  %v2743_v46 = vrot.slane %v2741_v42, 5  ;;  %v4301_v41 = vld [vmem:[%s4694_s19 + $0x80] sm:$0x1] }
 0x1ab   : > { %2218 = vrot.lane.b32.xlu0 %v2142_v39, %s4646_s24  ;;  %2216 = vrot.lane.b32.xlu2 %v2138_v44, %s4646_s24  ;;  %v4202_v44 = vld [vmem:[%s4694_s19 + $0x40] sm:$0xf] }
 0x1ac   : > { %v1864_v48 = vpop.permute.xlu1 %1863 }
 0x1ad   : > { %1947 = vst.msk [vmem:[#allocation2 + $0x34] sm:$0xf] %vm1933_vm11, %v1864_v48  ;;  %v1862_v52 = vpop.permute.xlu0 %1861  ;;  %v1878_v55 = vpop.permute.xlu2 %1877  ;;  %v4252_v48 = vld [vmem:[%s4694_s19 + $0x7c] sm:$0xf] }
 0x1ae   : > { %1946 = vst.msk [vmem:[#allocation2 + $0x30] sm:$0xf] %vm1933_vm11, %v1862_v52  ;;  %v4212_v52 = vld [vmem:[%s4694_s19 + $0x7c] sm:$0xf]  ;;  %v2751_v0 = vshrl.u32 %v4252_v48, 16 }
 0x1af   : > { %1954 = vst.msk [vmem:[#allocation2 + $0x50] sm:$0xf] %vm1933_vm11, %v1878_v55  ;;  %v2744_v55 = vor.u32 %v2743_v46, %v2740_v45  ;;  %v3240_v45 = vrot.slane %v4312_v32, 5 }
 0x1b1   : > { %v2745_v61 = vrot.slane %v2744_v55, 4 }
 0x1b2   : > { %2226 = vrot.lane.b32.xlu1 %v2156_v57, %s4646_s24  ;;  %v2747_v57 = vshll.u32 %v4252_v48, 16 }
 0x1b3   : > { %2224 = vrot.lane.b32.xlu0 %v2152_v59, %s4646_s24  ;;  %2222 = vrot.lane.b32.xlu2 %v2149_v62, %s4646_s24  ;;  %v2847_v59 = vshrl.u32 %v4264_v49, 16  ;;  %v2837_v62 = vshll.u32 %v4263_v51, 16  ;;  %v4229_v51 = vld [vmem:[%s4694_s19 + $0x20] sm:$0x1] }
 0x1b4   : > { %v1870_v54 = vpop.permute.xlu1 %1869 }
 0x1b5   : > { %1950 = vst.msk [vmem:[#allocation2 + $0x40] sm:$0xf] %vm1933_vm11, %v1870_v54  ;;  %v1868_v4 = vpop.permute.xlu0 %1867  ;;  %v1884_v7 = vpop.permute.xlu2 %1883  ;;  %v2749_v54 = vrot.slane %v2747_v57, 5 }
 0x1b6   : > { %1949 = vst.msk [vmem:[#allocation2 + $0x3c] sm:$0xf] %vm1933_vm11, %v1868_v4  ;;  %v2849_v4 = vrot.slane %v2847_v59, 4 }
 0x1b7   : > { %1957 = vst.msk [vmem:[#allocation2 + $0x5c] sm:$0xf] %vm1933_vm11, %v1884_v7  ;;  %v2839_v7 = vrot.slane %v2837_v62, 5 }
 0x1b8   : > { %v2850_v13 = vor.u32 %v2849_v4, %v2845_v3 }
 0x1b9   : > { %v2840_v16 = vor.u32 %v2839_v7, %v2836_v2  ;;  %v4313_v2 = vld [vmem:[%s4694_s19 + $0xb0] sm:$0x1] }
 0x1ba   : > { %2232 = vrot.lane.b32.xlu1 %v2166_v8, %s4646_s24 }
 0x1bb   : > { %2230 = vrot.lane.b32.xlu0 %v2163_v9, %s4646_s24  ;;  %2228 = vrot.lane.b32.xlu2 %v2159_v12, %s4646_s24  ;;  %v2753_v9 = vrot.slane %v2751_v0, 4  ;;  %v2750_v12 = vsel %vm4705_vm2, %v2745_v61, %v2749_v54  ;;  %v2565_v0 = vshll.u32 %v4229_v51, 16 }
 0x1bc   : > { %v1876_v14 = vpop.permute.xlu1 %1875 }
 0x1bd   : > { %1953 = vst.msk [vmem:[#allocation2 + $0x4c] sm:$0xf] %vm1933_vm11, %v1876_v14  ;;  %v1874_v17 = vpop.permute.xlu0 %1873  ;;  %v1890_v19 = vpop.permute.xlu2 %1889  ;;  %v2853_v14 = vshll.u32 %v4265_v6, 16  ;;  %v2754_v18 = vor.u32 %v2753_v9, %v2749_v54  ;;  %v2651_v54 = vshll.u32 %v4240_v58, 16 }
 0x1be   : > { %1952 = vst.msk [vmem:[#allocation2 + $0x48] sm:$0xf] %vm1933_vm11, %v1874_v17  ;;  %v4219_v17 = vld [vmem:[%s4694_s19 + $0xa8] sm:$0xf] }
 0x1bf   : > { %1960 = vst.msk [vmem:[#allocation2 + $0x68] sm:$0xf] %vm1933_vm11, %v1890_v19  ;;  %v2757_v19 = vshll.u32 %v4253_v11, 16  ;;  %v4241_v11 = vld [vmem:[%s4694_s19 + $0x50] sm:$0x1] }
 0x1c2   : > { %2368 = vrot.lane.b32.xlu1 %v4195_v20, %s4647_s25  ;;  %v2851_v20 = vrot.slane %v2850_v13, 4 }
 0x1c3   : > { %2236 = vrot.lane.b32.xlu0 %v2173_v21, %s4646_s24  ;;  %2234 = vrot.lane.b32.xlu2 %v2170_v22, %s4646_s24  ;;  %v2855_v21 = vrot.slane %v2853_v14, 5 }
 0x1c4   : > { %v1882_v23 = vpop.permute.xlu1 %1881 }
 0x1c5   : > { %1956 = vst.msk [vmem:[#allocation2 + $0x58] sm:$0xf] %vm1933_vm11, %v1882_v23  ;;  %v1880_v24 = vpop.permute.xlu0 %1879  ;;  %v1896_v26 = vpop.permute.xlu2 %1895  ;;  %v2841_v23 = vrot.slane %v2840_v16, 4  ;;  %v3243_v16 = vrot.slane %v4313_v2, 5  ;;  %v4267_v2 = vld [vmem:[%s4694_s19 + $0xb8] sm:$0xf] }
 0x1c6   : > { %1955 = vst.msk [vmem:[#allocation2 + $0x54] sm:$0xf] %vm1933_vm11, %v1880_v24  ;;  %v4300_v24 = vld [vmem:[%s4694_s19 + $0x7c] sm:$0xf] }
 0x1c7   : > { %1963 = vst.msk [vmem:[#allocation2 + $0x74] sm:$0xf] %vm1933_vm11, %v1896_v26  ;;  %v4228_v26 = vld [vmem:[%s4694_s19 + $0x1c] sm:$0xf] }
 0x1ca   : > { %2374 = vrot.lane.b32.xlu1 %v4198_v27, %s4647_s25 }
 0x1cb   : > { %2372 = vrot.lane.b32.xlu0 %v4197_v28, %s4647_s25  ;;  %2370 = vrot.lane.b32.xlu2 %v4196_v29, %s4647_s25  ;;  %v2755_v28 = vrot.slane %v2754_v18, 4  ;;  %v2759_v29 = vrot.slane %v2757_v19, 5 }
 0x1cc   : > { %v1888_v30 = vpop.permute.xlu1 %1887 }
 0x1cd   : > { %1959 = vst.msk [vmem:[#allocation2 + $0x64] sm:$0xf] %vm1933_vm11, %v1888_v30  ;;  %v1886_v31 = vpop.permute.xlu0 %1885  ;;  %v2175_v33 = vpop.permute.xlu2 %2174  ;;  %v4227_v30 = vld [vmem:[%s4694_s19 + $0x18] sm:$0xf]  ;;  %v2760_v42 = vsel %vm4705_vm2, %v2755_v28, %v2759_v29 }
 0x1ce   : > { %1958 = vst.msk [vmem:[#allocation2 + $0x60] sm:$0xf] %vm1933_vm11, %v1886_v31 }
 0x1cf   : > { %2271 = vst.msk [vmem:[#allocation2] sm:$0xf] %vm2270_vm12, %v2175_v33  ;;  %v2856_v33 = vsel %vm4705_vm2, %v2851_v20, %v2855_v21 }
 0x1d2   : > { %2380 = vrot.lane.b32.xlu1 %v4201_v35, %s4647_s25  ;;  %v4311_v35 = vld [vmem:[%s4694_s19 + $0xa8] sm:$0xe] }
 0x1d3   : > { %2378 = vrot.lane.b32.xlu0 %v4200_v36, %s4647_s25  ;;  %2376 = vrot.lane.b32.xlu2 %v4199_v34, %s4647_s25  ;;  %v2555_v36 = vshll.u32 %v4228_v26, 16  ;;  %v2559_v34 = vshrl.u32 %v4228_v26, 16  ;;  %v2661_v26 = vshll.u32 %v4241_v11, 16 }
 0x1d4   : > { %v1894_v37 = vpop.permute.xlu1 %1893 }
 0x1d5   : > { %1962 = vst.msk [vmem:[#allocation2 + $0x70] sm:$0xf] %vm1933_vm11, %v1894_v37  ;;  %v1892_v38 = vpop.permute.xlu0 %1891  ;;  %v2181_v39 = vpop.permute.xlu2 %2180  ;;  %v2846_v37 = vsel %vm4705_vm2, %v2841_v23, %v2845_v3  ;;  %v2557_v46 = vrot.slane %v2555_v36, 5  ;;  %v2655_v3 = vshrl.u32 %v4240_v58, 16  ;;  %v4276_v23 = vld [vmem:[%s4694_s19 + $0x1c] sm:$0xf] }
 0x1d6   : > { %1961 = vst.msk [vmem:[#allocation2 + $0x6c] sm:$0xf] %vm1933_vm11, %v1892_v38  ;;  %v3212_v38 = vrot.slane %v4300_v24, 5  ;;  %v4288_v36 = vld [vmem:[%s4694_s19 + $0x4c] sm:$0xf] }
 0x1d7   : > { %2274 = vst.msk [vmem:[#allocation2 + $0xc] sm:$0xf] %vm2270_vm12, %v2181_v39  ;;  %v2546_v39 = vshrl.u32 %v4227_v30, 16  ;;  %v2657_v13 = vrot.slane %v2655_v3, 4  ;;  %v4256_v3 = vld [vmem:[%s4694_s19 + $0x8c] sm:$0x1] }
 0x1d8   : > { %v3214_v49 = vrot.slane %v3212_v38, 4  ;;  %v2781_v11 = vshll.u32 %v4256_v3, 16 }
 0x1da   : > { %2386 = vrot.lane.b32.xlu1 %v4204_v40, %s4647_s25  ;;  %v2549_v40 = vshll.u32 %v4227_v30, 16  ;;  %v3156_v30 = vrot.slane %v4276_v23, 5  ;;  %v4268_v23 = vld [vmem:[%s4694_s19 + $0xbc] sm:$0x1] }
 0x1db   : > { %2384 = vrot.lane.b32.xlu0 %v4203_v43, %s4647_s25  ;;  %2382 = vrot.lane.b32.xlu2 %v4202_v44, %s4647_s25  ;;  %v4299_v43 = vld [vmem:[%s4694_s19 + $0x78] sm:$0xe]  ;;  %v4335_v44 = vrot.slane %v4311_v35, 9  ;;  %v2663_v35 = vrot.slane %v2661_v26, 5 }
 0x1dc   : > { %v1900_v47 = vpop.permute.xlu1 %1899  ;;  %v4331_v57 = vrot.slane %v4299_v43, 9  ;;  %v3158_v51 = vrot.slane %v3156_v30, 4 }
 0x1dd   : > { %1965 = vst.msk [vmem:[#allocation2 + $0x7c] sm:$0xf] %vm1933_vm11, %v1900_v47  ;;  %v1898_v50 = vpop.permute.xlu0 %1897  ;;  %v2187_v53 = vpop.permute.xlu2 %2186  ;;  %v2561_v47 = vrot.slane %v2559_v34, 4  ;;  %v3241_v60 = vsel %vm4879_vm6, %v4335_v44, %v3240_v45  ;;  %v4277_v44 = vld [vmem:[%s4694_s19 + $0x20] sm:$0x1] }
 0x1de   : > { %1964 = vst.msk [vmem:[#allocation2 + $0x78] sm:$0xf] %vm1933_vm11, %v1898_v50  ;;  %v3215_v50 = vrot.slane %v4301_v41, 5  ;;  %v3213_v4 = vsel %vm4879_vm6, %v4331_v57, %v3212_v38  ;;  %v4289_v41 = vld [vmem:[%s4694_s19 + $0x50] sm:$0x1] }
 0x1df   : > { %2277 = vst.msk [vmem:[#allocation2 + $0x18] sm:$0xf] %vm2270_vm12, %v2187_v53  ;;  %v2551_v53 = vrot.slane %v2549_v40, 5  ;;  %v2562_v62 = vor.u32 %v2561_v47, %v2557_v46 }
 0x1e1   : > { %v2563_v7 = vrot.slane %v2562_v62, 4 }
 0x1e2   : > { %2402 = vrot.lane.b32.xlu1 %v4212_v52, %s4647_s25  ;;  %v2548_v52 = vrot.slane %v2546_v39, 4  ;;  %v3184_v39 = vrot.slane %v4288_v36, 5  ;;  %v4302_v36 = vld [vmem:[%s4694_s19 + $0x84] sm:$0xe] }
 0x1e3   : > { %2400 = vrot.lane.b32.xlu0 %v4211_v56, %s4647_s25  ;;  %2388 = vrot.lane.b32.xlu2 %v4205_v1, %s4647_s25  ;;  %v4239_v56 = vld [vmem:[%s4694_s19 + $0x48] sm:$0xf]  ;;  %v3216_v1 = vsel %vm4879_vm6, %v3214_v49, %v3215_v50 }
 0x1e4   : > { %v2179_v5 = vpop.permute.xlu1 %2178  ;;  %v2552_v61 = vor.u32 %v2551_v53, %v2548_v52  ;;  %v2645_v6 = vshll.u32 %v4239_v56, 16  ;;  %v4255_v49 = vld [vmem:[%s4694_s19 + $0x88] sm:$0xf]  ;;  %v3159_v52 = vrot.slane %v4277_v44, 5  ;;  %v4254_v53 = vld [vmem:[%s4694_s19 + $0x84] sm:$0xf] }
 0x1e5   : > { %2273 = vst.msk [vmem:[#allocation2 + $0x8] sm:$0xf] %vm2270_vm12, %v2179_v5  ;;  %v2177_v8 = vpop.permute.xlu0 %2176  ;;  %v2193_v10 = vpop.permute.xlu2 %2192  ;;  %v2642_v5 = vshrl.u32 %v4239_v56, 16  ;;  %v2771_v58 = vshll.u32 %v4255_v49, 16  ;;  %v2765_v62 = vshll.u32 %v4254_v53, 16 }
 0x1e6   : > { %2272 = vst.msk [vmem:[#allocation2 + $0x4] sm:$0xf] %vm2270_vm12, %v2177_v8  ;;  %v2567_v8 = vrot.slane %v2565_v0, 5  ;;  %v2647_v18 = vrot.slane %v2645_v6, 5  ;;  %v3160_v0 = vsel %vm4879_vm6, %v3158_v51, %v3159_v52  ;;  %v4315_v44 = vld [vmem:[%s4694_s19 + $0xb8] sm:$0xf] }
 0x1e7   : > { %2280 = vst.msk [vmem:[#allocation2 + $0x24] sm:$0xf] %vm2270_vm12, %v2193_v10  ;;  %v2553_v10 = vrot.slane %v2552_v61, 4  ;;  %v3247_v51 = vrot.slane %v4315_v44, 5 }
 0x1e8   : > { %v2568_v20 = vsel %vm4705_vm2, %v2563_v7, %v2567_v8  ;;  %v4266_v8 = vld [vmem:[%s4694_s19 + $0xb4] sm:$0xf] }
 0x1e9   : > { %v2558_v21 = vsel %vm4705_vm2, %v2553_v10, %v2557_v46  ;;  %v3187_v46 = vrot.slane %v4289_v41, 5 }
 0x1ea   : > { %2961 = vrot.lane.b32.xlu1 %v2750_v12, %s4648_s26  ;;  %v2653_v12 = vrot.slane %v2651_v54, 5 }
 0x1eb   : > { %2418 = vrot.lane.b32.xlu0 %v4220_v15, %s4647_s25  ;;  %2416 = vrot.lane.b32.xlu2 %v4219_v17, %s4647_s25  ;;  %v3242_v15 = vrot.slane %v3240_v45, 4  ;;  %v2644_v17 = vrot.slane %v2642_v5, 4  ;;  %v3186_v45 = vrot.slane %v3184_v39, 4  ;;  %v2767_v5 = vrot.slane %v2765_v62, 5  ;;  %v4304_v62 = vld [vmem:[%s4694_s19 + $0x8c] sm:$0x1] }
 0x1ec   : > { %v2185_v22 = vpop.permute.xlu1 %2184  ;;  %v2658_v24 = vor.u32 %v2657_v13, %v2653_v12 }
 0x1ed   : > { %2276 = vst.msk [vmem:[#allocation2 + $0x14] sm:$0xf] %vm2270_vm12, %v2185_v22  ;;  %v2183_v27 = vpop.permute.xlu0 %2182  ;;  %v2199_v31 = vpop.permute.xlu2 %2198  ;;  %v4275_v22 = vld [vmem:[%s4694_s19 + $0x18] sm:$0xe]  ;;  %v2648_v28 = vor.u32 %v2647_v18, %v2644_v17  ;;  %v3188_v57 = vsel %vm4879_vm6, %v3186_v45, %v3187_v46  ;;  %v2858_v17 = vshrl.u32 %v4266_v8, 16  ;;  %v2861_v18 = vshll.u32 %v4266_v8, 16 }
 0x1ee   : > { %2275 = vst.msk [vmem:[#allocation2 + $0x10] sm:$0xf] %vm2270_vm12, %v2183_v27  ;;  %v3244_v27 = vsel %vm4879_vm6, %v3242_v15, %v3243_v16  ;;  %v4323_v29 = vrot.slane %v4275_v22, 9  ;;  %v2871_v15 = vshrl.u32 %v4267_v2, 16  ;;  %v4213_v16 = vld [vmem:[%s4694_s19 + $0x84] sm:$0xf] }
 0x1ef   : > { %2283 = vst.msk [vmem:[#allocation2 + $0x30] sm:$0xf] %vm2270_vm12, %v2199_v31  ;;  %v4231_v45 = vld [vmem:[%s4694_s19 + $0x28] sm:$0xf] }
 0x1f0   : > { %v3157_v38 = vsel %vm4879_vm6, %v4323_v29, %v3156_v30  ;;  %v2873_v26 = vrot.slane %v2871_v15, 4  ;;  %v2863_v29 = vrot.slane %v2861_v18, 5  ;;  %v2579_v52 = vshll.u32 %v4231_v45, 16 }
 0x1f2   : > { %2979 = vrot.lane.b32.xlu1 %v2856_v33, %s4648_s26  ;;  %v2659_v33 = vrot.slane %v2658_v24, 4 }
 0x1f3   : > { %2977 = vrot.lane.b32.xlu0 %v2846_v37, %s4648_s26  ;;  %2963 = vrot.lane.b32.xlu2 %v2760_v42, %s4648_s26  ;;  %v2649_v37 = vrot.slane %v2648_v28, 4  ;;  %v4287_v42 = vld [vmem:[%s4694_s19 + $0x48] sm:$0xe]  ;;  %v2860_v28 = vrot.slane %v2858_v17, 4 }
 0x1f4   : > { %v2191_v48 = vpop.permute.xlu1 %2190  ;;  %v2664_v40 = vsel %vm4705_vm2, %v2659_v33, %v2663_v35  ;;  %v2877_v33 = vshll.u32 %v4268_v23, 16 }
 0x1f5   : > { %2279 = vst.msk [vmem:[#allocation2 + $0x20] sm:$0xf] %vm2270_vm12, %v2191_v48  ;;  %v2189_v55 = vpop.permute.xlu0 %2188  ;;  %v2205_v59 = vpop.permute.xlu2 %2204  ;;  %v2654_v43 = vsel %vm4705_vm2, %v2649_v37, %v2653_v12  ;;  %v4327_v48 = vrot.slane %v4287_v42, 9  ;;  %v4214_v12 = vld [vmem:[%s4694_s19 + $0x88] sm:$0xf] }
 0x1f6   : > { %2278 = vst.msk [vmem:[#allocation2 + $0x1c] sm:$0xf] %vm2270_vm12, %v2189_v55  ;;  %v2879_v41 = vrot.slane %v2877_v33, 5 }
 0x1f7   : > { %2286 = vst.msk [vmem:[#allocation2 + $0x3c] sm:$0xf] %vm2270_vm12, %v2205_v59  ;;  %v2775_v59 = vshrl.u32 %v4255_v49, 16  ;;  %v3185_v56 = vsel %vm4879_vm6, %v4327_v48, %v3184_v39  ;;  %v4332_v39 = vrot.slane %v4302_v36, 9  ;;  %v4230_v48 = vld [vmem:[%s4694_s19 + $0x24] sm:$0xf] }
 0x1f9   : > { %v2777_v61 = vrot.slane %v2775_v59, 4  ;;  %v2573_v59 = vshll.u32 %v4230_v48, 16 }
 0x1fa   : > { %3314 = vrot.lane.b32.xlu1 %v3241_v60, %s4649_s27  ;;  %v2762_v60 = vshrl.u32 %v4254_v53, 16  ;;  %v2583_v53 = vshrl.u32 %v4231_v45, 16 }
 0x1fb   : > { %3300 = vrot.lane.b32.xlu0 %v3216_v1, %s4649_s27  ;;  %3298 = vrot.lane.b32.xlu2 %v3213_v4, %s4649_s27  ;;  %v2773_v1 = vrot.slane %v2771_v58, 5  ;;  %v2570_v58 = vshrl.u32 %v4230_v48, 16 }
 0x1fc   : > { %v2197_v9 = vpop.permute.xlu1 %2196  ;;  %v2764_v4 = vrot.slane %v2762_v60, 4 }
 0x1fd   : > { %2282 = vst.msk [vmem:[#allocation2 + $0x2c] sm:$0xf] %vm2270_vm12, %v2197_v9  ;;  %v2195_v14 = vpop.permute.xlu0 %2194  ;;  %v2211_v19 = vpop.permute.xlu2 %2210  ;;  %v4221_v9 = vld [vmem:[%s4694_s19 + $0xb4] sm:$0xf]  ;;  %v2778_v10 = vor.u32 %v2777_v61, %v2773_v1  ;;  %v2581_v61 = vrot.slane %v2579_v52, 5 }
 0x1fe   : > { %2281 = vst.msk [vmem:[#allocation2 + $0x28] sm:$0xf] %vm2270_vm12, %v2195_v14  ;;  %v2768_v13 = vor.u32 %v2767_v5, %v2764_v4  ;;  %v2867_v14 = vshll.u32 %v4267_v2, 16  ;;  %v4232_v5 = vld [vmem:[%s4694_s19 + $0x2c] sm:$0x1]  ;;  %v2575_v2 = vrot.slane %v2573_v59, 5 }
 0x1ff   : > { %2289 = vst.msk [vmem:[#allocation2 + $0x48] sm:$0xf] %vm2270_vm12, %v2211_v19  ;;  %v2779_v19 = vrot.slane %v2778_v10, 4  ;;  %v4243_v10 = vld [vmem:[%s4694_s19 + $0x58] sm:$0xf]  ;;  %v2589_v15 = vshll.u32 %v4232_v5, 16 }
 0x200   : > { %v2769_v22 = vrot.slane %v2768_v13, 4  ;;  %v2869_v24 = vrot.slane %v2867_v14, 5  ;;  %v2675_v18 = vshll.u32 %v4243_v10, 16  ;;  %v4258_v5 = vld [vmem:[%s4694_s19 + $0x94] sm:$0xf] }
 0x202   : > { %2931 = vrot.lane.b32.xlu1 %v2568_v20, %s4648_s26  ;;  %v2783_v20 = vrot.slane %v2781_v11, 5  ;;  %v2774_v35 = vsel %vm4705_vm2, %v2769_v22, %v2773_v1  ;;  %v2874_v37 = vor.u32 %v2873_v26, %v2869_v24 }
 0x203   : > { %2929 = vrot.lane.b32.xlu0 %v2558_v21, %s4648_s26  ;;  %3316 = vrot.lane.b32.xlu2 %v3244_v27, %s4649_s27 }
 0x204   : > { %v2203_v31 = vpop.permute.xlu1 %2202 }
 0x205   : > { %2285 = vst.msk [vmem:[#allocation2 + $0x38] sm:$0xf] %vm2270_vm12, %v2203_v31  ;;  %v2201_v34 = vpop.permute.xlu0 %2200  ;;  %v2217_v32 = vpop.permute.xlu2 %2216  ;;  %v2784_v31 = vsel %vm4705_vm2, %v2779_v19, %v2783_v20  ;;  %v2679_v19 = vshrl.u32 %v4243_v10, 16  ;;  %v4489_v10 = vld [vmem:[%s6291_s1 + $0x18] sm:$0xff] }
 0x206   : > { %2284 = vst.msk [vmem:[#allocation2 + $0x34] sm:$0xf] %vm2270_vm12, %v2201_v34  ;;  %v4303_v34 = vld [vmem:[%s4694_s19 + $0x88] sm:$0xf] }
 0x207   : > { %2292 = vst.msk [vmem:[#allocation2 + $0x54] sm:$0xf] %vm2270_vm12, %v2217_v32  ;;  %v4222_v32 = vld [vmem:[%s4694_s19 + $0xb8] sm:$0xf] }
 0x20a   : > { %3266 = vrot.lane.b32.xlu1 %v3157_v38, %s4649_s27  ;;  %v2864_v38 = vor.u32 %v2863_v29, %v2860_v28  ;;  %v2677_v28 = vrot.slane %v2675_v18, 5  ;;  %v2681_v29 = vrot.slane %v2679_v19, 4 }
 0x20b   : > { %2947 = vrot.lane.b32.xlu0 %v2664_v40, %s4648_s26  ;;  %2945 = vrot.lane.b32.xlu2 %v2654_v43, %s4648_s26  ;;  %v3219_v40 = vrot.slane %v4303_v34, 5  ;;  %v2875_v43 = vrot.slane %v2874_v37, 4  ;;  %v4493_v34 = vld [vmem:[%s6291_s1 + $0x38] sm:$0xff] }
 0x20c   : > { %v2209_v47 = vpop.permute.xlu1 %2208  ;;  %4495 = vmatpush.bf16.msra.mxu2 %v4493_v34  ;;  %4496 = vmatpush.bf16.msra.mxu3 %v4493_v34 }
 0x20d   : > { %2288 = vst.msk [vmem:[#allocation2 + $0x44] sm:$0xf] %vm2270_vm12, %v2209_v47  ;;  %v2207_v50 = vpop.permute.xlu0 %2206  ;;  %v2223_v55 = vpop.permute.xlu2 %2222  ;;  %v2865_v47 = vrot.slane %v2864_v38, 4  ;;  %v3221_v8 = vrot.slane %v3219_v40, 4  ;;  %v4278_v38 = vld [vmem:[%s4694_s19 + $0x24] sm:$0xe]  ;;  %3591 = vmatpush.bf16.msra.mxu0 %v4493_v34  ;;  %4494 = vmatpush.bf16.msra.mxu1 %v4493_v34 }
 0x20e   : > { %2287 = vst.msk [vmem:[#allocation2 + $0x40] sm:$0xf] %vm2270_vm12, %v2207_v50  ;;  %v3220_v50 = vsel %vm4879_vm6, %v4332_v39, %v3219_v40  ;;  %v4279_v39 = vld [vmem:[%s4694_s19 + $0x28] sm:$0xf]  ;;  %v2682_v40 = vor.u32 %v2681_v29, %v2677_v28  ;;  %v4324_v44 = vrot.slane %v4278_v38, 9 }
 0x20f   : > { %2295 = vst.msk [vmem:[#allocation2 + $0x60] sm:$0xf] %vm2270_vm12, %v2223_v55  ;;  %v2880_v55 = vsel %vm4705_vm2, %v2875_v43, %v2879_v41  ;;  %v2870_v60 = vsel %vm4705_vm2, %v2865_v47, %v2869_v24  ;;  %v2591_v24 = vrot.slane %v2589_v15, 5  ;;  %v3163_v45 = vrot.slane %v4279_v39, 5  ;;  %v4487_v29 = vld [vmem:[%s6291_s1 + $0x8] sm:$0xff] }
 0x210   : > { %v2683_v48 = vrot.slane %v2682_v40, 4  ;;  %v4215_v38 = vld [vmem:[%s4694_s19 + $0x90] sm:$0xf] }
 0x212   : > { %3284 = vrot.lane.b32.xlu1 %v3188_v57, %s4649_s27  ;;  %v4316_v57 = vld [vmem:[%s4694_s19 + $0xbc] sm:$0x1] }
 0x213   : > { %3282 = vrot.lane.b32.xlu0 %v3185_v56, %s4649_s27  ;;  %3268 = vrot.lane.b32.xlu2 %v3160_v0, %s4649_s27  ;;  %v4314_v56 = vld [vmem:[%s4694_s19 + $0xb4] sm:$0xe]  ;;  %v3249_v0 = vrot.slane %v3247_v51, 4  ;;  %v3250_v1 = vrot.slane %v4316_v57, 5  ;;  %v3164_v57 = vsel %vm4879_vm6, %v4324_v44, %v3163_v45 }
 0x214   : > { %v2215_v54 = vpop.permute.xlu1 %2214  ;;  %v4336_v4 = vrot.slane %v4314_v56, 9  ;;  %v4292_v56 = vld [vmem:[%s4694_s19 + $0x5c] sm:$0x1] }
 0x215   : > { %2291 = vst.msk [vmem:[#allocation2 + $0x50] sm:$0xf] %vm2270_vm12, %v2215_v54  ;;  %v2213_v6 = vpop.permute.xlu0 %2212  ;;  %v2229_v7 = vpop.permute.xlu2 %2228  ;;  %v2585_v54 = vrot.slane %v2583_v53, 4  ;;  %v3251_v13 = vsel %vm4879_vm6, %v3249_v0, %v3250_v1  ;;  %v4280_v0 = vld [vmem:[%s4694_s19 + $0x2c] sm:$0x1] }
 0x216   : > { %2290 = vst.msk [vmem:[#allocation2 + $0x4c] sm:$0xf] %vm2270_vm12, %v2213_v6  ;;  %v2572_v6 = vrot.slane %v2570_v58, 4 }
 0x217   : > { %2298 = vst.msk [vmem:[#allocation2 + $0x6c] sm:$0xf] %vm2270_vm12, %v2229_v7  ;;  %v2586_v14 = vor.u32 %v2585_v54, %v2581_v61  ;;  %v4490_v54 = vld [vmem:[%s6291_s1 + $0x20] sm:$0xff] }
 0x218   : > { %v2576_v17 = vor.u32 %v2575_v2, %v2572_v6  ;;  %v3165_v2 = vrot.slane %v3163_v45, 4 }
 0x219   : > { %v2587_v23 = vrot.slane %v2586_v14, 4 }
 0x21a   : > { %2420 = vrot.lane.b32.xlu1 %v4221_v9, %s4647_s25  ;;  %v3222_v9 = vrot.slane %v4304_v62, 5 }
 0x21b   : > { %2406 = vrot.lane.b32.xlu0 %v4214_v12, %s4647_s25  ;;  %2404 = vrot.lane.b32.xlu2 %v4213_v16, %s4647_s25  ;;  %v4242_v12 = vld [vmem:[%s4694_s19 + $0x54] sm:$0xf]  ;;  %v3248_v16 = vsel %vm4879_vm6, %v4336_v4, %v3247_v51  ;;  %v2592_v37 = vsel %vm4705_vm2, %v2587_v23, %v2591_v24 }
 0x21c   : > { %v2221_v21 = vpop.permute.xlu1 %2220  ;;  %v3223_v20 = vsel %vm4879_vm6, %v3221_v8, %v3222_v9  ;;  %v2669_v22 = vshll.u32 %v4242_v12, 16  ;;  %v4257_v8 = vld [vmem:[%s4694_s19 + $0x90] sm:$0xf] }
 0x21d   : > { %2294 = vst.msk [vmem:[#allocation2 + $0x5c] sm:$0xf] %vm2270_vm12, %v2221_v21  ;;  %v2219_v27 = vpop.permute.xlu0 %2218  ;;  %v2235_v30 = vpop.permute.xlu2 %2234  ;;  %v2666_v21 = vshrl.u32 %v4242_v12, 16  ;;  %v2795_v12 = vshll.u32 %v4258_v5, 16  ;;  %v2786_v15 = vshrl.u32 %v4257_v8, 16 }
 0x21e   : > { %2293 = vst.msk [vmem:[#allocation2 + $0x58] sm:$0xf] %vm2270_vm12, %v2219_v27  ;;  %v2577_v27 = vrot.slane %v2576_v17, 4 }
 0x21f   : > { %2301 = vst.msk [vmem:[#allocation2 + $0x78] sm:$0xf] %vm2270_vm12, %v2235_v30  ;;  %v2668_v33 = vrot.slane %v2666_v21, 4  ;;  %v5908_v18 = vrot.slane %v2795_v12, 5  ;;  %v2788_v23 = vrot.slane %v2786_v15, 4 }
 0x222   : > { %2967 = vrot.lane.b32.xlu1 %v2784_v31, %s4648_s26  ;;  %v4244_v31 = vld [vmem:[%s4694_s19 + $0x5c] sm:$0x1] }
 0x223   : > { %2965 = vrot.lane.b32.xlu0 %v2774_v35, %s4648_s26  ;;  %2422 = vrot.lane.b32.xlu2 %v4222_v32, %s4647_s25  ;;  %v2671_v35 = vrot.slane %v2669_v22, 5  ;;  %v2582_v32 = vsel %vm4705_vm2, %v2577_v27, %v2581_v61  ;;  %v2685_v41 = vshll.u32 %v4244_v31, 16  ;;  %v3194_v61 = vrot.slane %v4292_v56, 5  ;;  %v4259_v22 = vld [vmem:[%s4694_s19 + $0x98] sm:$0x1] }
 0x224   : > { %v2227_v42 = vpop.permute.xlu1 %2226  ;;  %v4270_v27 = vld [vmem:[%s4694_s19 + $0xc4] sm:$0xf]  ;;  %v4223_v31 = vld [vmem:[%s4694_s19 + $0xc0] sm:$0xf] }
 0x225   : > { %2297 = vst.msk [vmem:[#allocation2 + $0x68] sm:$0xf] %vm2270_vm12, %v2227_v42  ;;  %v2225_v46 = vpop.permute.xlu0 %2224  ;;  %v2371_v49 = vpop.permute.xlu2 %2370  ;;  %v4206_v42 = vld [vmem:[%s4694_s19 + $0x58] sm:$0xf]  ;;  %v2672_v43 = vor.u32 %v2671_v35, %v2668_v33  ;;  %v2805_v35 = vshll.u32 %v4259_v22, 16 }
 0x226   : > { %2296 = vst.msk [vmem:[#allocation2 + $0x64] sm:$0xf] %vm2270_vm12, %v2225_v46  ;;  %v4492_v46 = vld [vmem:[%s6291_s1 + $0x30] sm:$0xff] }
 0x227   : > { %2466 = vst.msk [vmem:[#allocation2 + $0x4] sm:$0xf] %vm2464_vm13, %v2371_v49  ;;  %v2687_v49 = vrot.slane %v2685_v41, 5  ;;  %v2673_v52 = vrot.slane %v2672_v43, 4  ;;  %4498 = vmatpush.bf16.msra.mxu2 %v4492_v46  ;;  %4499 = vmatpush.bf16.msra.mxu3 %v4492_v46  ;;  %v4486_v43 = vld [vmem:[%s6291_s1] sm:$0xff] }
 0x228   : > { %3592 = vmatpush.bf16.msra.mxu0 %v4492_v46  ;;  %4497 = vmatpush.bf16.msra.mxu1 %v4492_v46 }
 0x229   : > { %v2688_v59 = vsel %vm4705_vm2, %v2683_v48, %v2687_v49  ;;  %v2678_v62 = vsel %vm4705_vm2, %v2673_v52, %v2677_v28  ;;  %v4271_v49 = vld [vmem:[%s4694_s19 + $0xc8] sm:$0x1] }
 0x22a   : > { %3302 = vrot.lane.b32.xlu1 %v3220_v50, %s4649_s27  ;;  %v4291_v50 = vld [vmem:[%s4694_s19 + $0x58] sm:$0xf]  ;;  %v2901_v56 = vshll.u32 %v4271_v49, 16 }
 0x22b   : > { %2983 = vrot.lane.b32.xlu0 %v2880_v55, %s4648_s26  ;;  %2981 = vrot.lane.b32.xlu2 %v2870_v60, %s4648_s26  ;;  %v4491_v55 = vld [vmem:[%s6291_s1 + $0x28] sm:$0xff]  ;;  %v3191_v58 = vrot.slane %v4291_v50, 5  ;;  %v4290_v60 = vld [vmem:[%s4694_s19 + $0x54] sm:$0xe] }
 0x22c   : > { %v2233_v3 = vpop.permute.xlu1 %2232  ;;  %4501 = vmatpush.bf16.msra.mxu2 %v4491_v55  ;;  %4502 = vmatpush.bf16.msra.mxu3 %v4491_v55  ;;  %v4328_v4 = vrot.slane %v4290_v60, 9  ;;  %v4224_v60 = vld [vmem:[%s4694_s19 + $0xc4] sm:$0xf] }
 0x22d   : > { %2300 = vst.msk [vmem:[#allocation2 + $0x74] sm:$0xf] %vm2270_vm12, %v2233_v3  ;;  %v2231_v7 = vpop.permute.xlu0 %2230  ;;  %v2377_v11 = vpop.permute.xlu2 %2376  ;;  %3593 = vmatpush.bf16.msra.mxu0 %v4491_v55  ;;  %v3193_v1 = vrot.slane %v3191_v58, 4  ;;  %4500 = vmatpush.bf16.msra.mxu1 %v4491_v55 }
 0x22e   : > { %2299 = vst.msk [vmem:[#allocation2 + $0x70] sm:$0xf] %vm2270_vm12, %v2231_v7  ;;  %v3166_v7 = vrot.slane %v4280_v0, 5  ;;  %v3192_v14 = vsel %vm4879_vm6, %v4328_v4, %v3191_v58  ;;  %v4306_v58 = vld [vmem:[%s4694_s19 + $0x94] sm:$0xf]  ;;  %v2903_v4 = vrot.slane %v2901_v56, 5 }
 0x22f   : > { %2469 = vst.msk [vmem:[#allocation2 + $0x10] sm:$0xf] %vm2464_vm13, %v2377_v11  ;;  %v3195_v11 = vsel %vm4879_vm6, %v3193_v1, %v3194_v61  ;;  %v3226_v1 = vrot.slane %v4306_v58, 5  ;;  %v4318_v61 = vld [vmem:[%s4694_s19 + $0xc4] sm:$0xf] }
 0x230   : > { %4504 = vmatpush.bf16.msra.mxu2 %v4490_v54  ;;  %4505 = vmatpush.bf16.msra.mxu3 %v4490_v54  ;;  %v3167_v17 = vsel %vm4879_vm6, %v3165_v2, %v3166_v7  ;;  %v3254_v7 = vrot.slane %v4318_v61, 5  ;;  %v4208_v58 = vld [vmem:[%s4694_s19 + $0x64] sm:$0xf]  ;;  %v4207_v56 = vld [vmem:[%s4694_s19 + $0x60] sm:$0xf] }
 0x231   : > { %3594 = vmatpush.bf16.msra.mxu0 %v4490_v54  ;;  %4503 = vmatpush.bf16.msra.mxu1 %v4490_v54 }
 0x232   : > { %3320 = vrot.lane.b32.xlu1 %v3251_v13, %s4649_s27  ;;  %v2799_v13 = vshrl.u32 %v4258_v5, 16  ;;  %v4233_v5 = vld [vmem:[%s4694_s19 + $0x30] sm:$0xf] }
 0x233   : > { %3318 = vrot.lane.b32.xlu0 %v3248_v16, %s4649_s27  ;;  %3304 = vrot.lane.b32.xlu2 %v3223_v20, %s4649_s27  ;;  %v2789_v16 = vshll.u32 %v4257_v8, 16  ;;  %v4488_v20 = vld [vmem:[%s6291_s1 + $0x10] sm:$0xff]  ;;  %v2597_v12 = vshll.u32 %v4233_v5, 16 }
 0x234   : > { %v2369_v26 = vpop.permute.xlu1 %2368  ;;  %4507 = vmatpush.bf16.msra.mxu2 %v4489_v10  ;;  %4508 = vmatpush.bf16.msra.mxu3 %v4489_v10  ;;  %v2801_v19 = vrot.slane %v2799_v13, 4 }
 0x235   : > { %2465 = vst.msk [vmem:[#allocation2] sm:$0xf] %vm2464_vm13, %v2369_v26  ;;  %v2237_v30 = vpop.permute.xlu0 %2236  ;;  %v2383_v36 = vpop.permute.xlu2 %2382  ;;  %3595 = vmatpush.bf16.msra.mxu0 %v4489_v10  ;;  %4506 = vmatpush.bf16.msra.mxu1 %v4489_v10  ;;  %v2791_v24 = vrot.slane %v2789_v16, 5  ;;  %v4319_v10 = vld [vmem:[%s4694_s19 + $0xc8] sm:$0x1]  ;;  %v3256_v16 = vrot.slane %v3254_v7, 4 }
 0x236   : > { %2302 = vst.msk [vmem:[#allocation2 + $0x7c] sm:$0xf] %vm2270_vm12, %v2237_v30  ;;  %v4269_v30 = vld [vmem:[%s4694_s19 + $0xc0] sm:$0xf]  ;;  %v2802_v33 = vor.u32 %v2801_v19, %v5908_v18 }
 0x237   : > { %2472 = vst.msk [vmem:[#allocation2 + $0x1c] sm:$0xf] %vm2464_vm13, %v2383_v36  ;;  %v4216_v36 = vld [vmem:[%s4694_s19 + $0x94] sm:$0xf]  ;;  %v2792_v34 = vor.u32 %v2791_v24, %v2788_v23  ;;  %v2882_v39 = vshrl.u32 %v4269_v30, 16  ;;  %v2885_v40 = vshll.u32 %v4269_v30, 16 }
 0x238   : > { %4510 = vmatpush.bf16.msra.mxu2 %v4488_v20  ;;  %4511 = vmatpush.bf16.msra.mxu3 %v4488_v20  ;;  %v2803_v41 = vrot.slane %v2802_v33, 4  ;;  %v4234_v23 = vld [vmem:[%s4694_s19 + $0x34] sm:$0xf]  ;;  %v4246_v24 = vld [vmem:[%s4694_s19 + $0x64] sm:$0xf] }
 0x239   : > { %3596 = vmatpush.bf16.msra.mxu0 %v4488_v20  ;;  %4509 = vmatpush.bf16.msra.mxu1 %v4488_v20  ;;  %v2793_v45 = vrot.slane %v2792_v34, 4  ;;  %v2884_v50 = vrot.slane %v2882_v39, 4  ;;  %v2599_v20 = vrot.slane %v2597_v12, 5  ;;  %v2703_v34 = vshrl.u32 %v4246_v24, 16  ;;  %v4294_v12 = vld [vmem:[%s4694_s19 + $0x64] sm:$0xf] }
 0x23a   : > { %2935 = vrot.lane.b32.xlu1 %v2592_v37, %s4648_s26  ;;  %v2891_v37 = vshll.u32 %v4270_v27, 16  ;;  %v2607_v39 = vshrl.u32 %v4234_v23, 16 }
 0x23b   : > { %2933 = vrot.lane.b32.xlu0 %v2582_v32, %s4648_s26  ;;  %2390 = vrot.lane.b32.xlu2 %v4206_v42, %s4647_s25  ;;  %v2895_v32 = vshrl.u32 %v4270_v27, 16  ;;  %v2807_v42 = vrot.slane %v2805_v35, 5  ;;  %v2798_v55 = vsel %vm4705_vm2, %v2793_v45, %v5908_v18  ;;  %v4307_v18 = vld [vmem:[%s4694_s19 + $0x98] sm:$0x1]  ;;  %v3228_v27 = vrot.slane %v3226_v1, 4 }
 0x23c   : > { %v2375_v47 = vpop.permute.xlu1 %2374  ;;  %4513 = vmatpush.bf16.msra.mxu2 %v4487_v29  ;;  %4514 = vmatpush.bf16.msra.mxu3 %v4487_v29  ;;  %v2893_v46 = vrot.slane %v2891_v37, 5  ;;  %v2603_v35 = vshll.u32 %v4234_v23, 16 }
 0x23d   : > { %2468 = vst.msk [vmem:[#allocation2 + $0xc] sm:$0xf] %vm2464_vm13, %v2375_v47  ;;  %v2373_v51 = vpop.permute.xlu0 %2372  ;;  %v2389_v53 = vpop.permute.xlu2 %2388  ;;  %3597 = vmatpush.bf16.msra.mxu0 %v4487_v29  ;;  %4512 = vmatpush.bf16.msra.mxu1 %v4487_v29  ;;  %v2897_v47 = vrot.slane %v2895_v32, 4  ;;  %v4245_v29 = vld [vmem:[%s4694_s19 + $0x60] sm:$0xf] }
 0x23e   : > { %2467 = vst.msk [vmem:[#allocation2 + $0x8] sm:$0xf] %vm2464_vm13, %v2373_v51  ;;  %v2887_v51 = vrot.slane %v2885_v40, 5  ;;  %v2690_v32 = vshrl.u32 %v4245_v29, 16 }
 0x23f   : > { %2475 = vst.msk [vmem:[#allocation2 + $0x28] sm:$0xf] %vm2464_vm13, %v2389_v53  ;;  %v2808_v53 = vsel %vm4705_vm2, %v2803_v41, %v2807_v42  ;;  %v2605_v42 = vrot.slane %v2603_v35, 5 }
 0x240   : > { %4516 = vmatpush.bf16.msra.mxu2 %v4486_v43  ;;  %4517 = vmatpush.bf16.msra.mxu3 %v4486_v43 }
 0x241   : > { %3598 = vmatpush.bf16.msra.mxu0 %v4486_v43  ;;  %4515 = vmatpush.bf16.msra.mxu1 %v4486_v43 }
 0x242   : > { %3270 = vrot.lane.b32.xlu1 %v3164_v57, %s4649_s27  ;;  %v4305_v57 = vld [vmem:[%s4694_s19 + $0x90] sm:$0xe] }
 0x243   : > { %2951 = vrot.lane.b32.xlu0 %v2688_v59, %s4648_s26  ;;  %2949 = vrot.lane.b32.xlu2 %v2678_v62, %s4648_s26  ;;  %v2898_v59 = vor.u32 %v2897_v47, %v2893_v46  ;;  %v2888_v62 = vor.u32 %v2887_v51, %v2884_v50  ;;  %v4333_v0 = vrot.slane %v4305_v57, 9  ;;  %v2692_v47 = vrot.slane %v2690_v32, 4  ;;  %v4261_v32 = vld [vmem:[%s4694_s19 + $0xa0] sm:$0xf] }
 0x244   : > { %v2381_v3 = vpop.permute.xlu1 %2380  ;;  %v2609_v50 = vrot.slane %v2607_v39, 4 }
 0x245   : > { %2471 = vst.msk [vmem:[#allocation2 + $0x18] sm:$0xf] %vm2464_vm13, %v2381_v3  ;;  %v2379_v6 = vpop.permute.xlu0 %2378  ;;  %v2417_v9 = vpop.permute.xlu2 %2416  ;;  %v2899_v3 = vrot.slane %v2898_v59, 4  ;;  %v2889_v2 = vrot.slane %v2888_v62, 4 }
 0x246   : > { %2470 = vst.msk [vmem:[#allocation2 + $0x14] sm:$0xf] %vm2464_vm13, %v2379_v6 }
 0x247   : > { %2489 = vst.msk [vmem:[#allocation2 + $0x60] sm:$0xf] %vm2464_vm13, %v2417_v9  ;;  %v3227_v9 = vsel %vm4879_vm6, %v4333_v0, %v3226_v1  ;;  %v2904_v13 = vsel %vm4705_vm2, %v2899_v3, %v2903_v4  ;;  %v2894_v15 = vsel %vm4705_vm2, %v2889_v2, %v2893_v46  ;;  %v4247_v46 = vld [vmem:[%s4694_s19 + $0x68] sm:$0x1]  ;;  %v4282_v4 = vld [vmem:[%s4694_s19 + $0x34] sm:$0xf] }
 0x248   : > { %v2709_v57 = vshll.u32 %v4247_v46, 16  ;;  %v2819_v46 = vshll.u32 %v4261_v32, 16 }
 0x24a   : > { %3288 = vrot.lane.b32.xlu1 %v3195_v11, %s4649_s27  ;;  %v2594_v11 = vshrl.u32 %v4233_v5, 16  ;;  %v2711_v1 = vrot.slane %v2709_v57, 5  ;;  %v2821_v57 = vrot.slane %v2819_v46, 5 }
 0x24b   : > { %3286 = vrot.lane.b32.xlu0 %v3192_v14, %s4649_s27  ;;  %3272 = vrot.lane.b32.xlu2 %v3167_v17, %s4649_s27  ;;  %v4317_v14 = vld [vmem:[%s4694_s19 + $0xc0] sm:$0xe]  ;;  %v3257_v17 = vrot.slane %v4319_v10, 5 }
 0x24c   : > { %v2387_v21 = vpop.permute.xlu1 %2386  ;;  %v2596_v19 = vrot.slane %v2594_v11, 4  ;;  %v4337_v22 = vrot.slane %v4317_v14, 9  ;;  %v4293_v10 = vld [vmem:[%s4694_s19 + $0x60] sm:$0xe]  ;;  %v4283_v14 = vld [vmem:[%s4694_s19 + $0x38] sm:$0x1] }
 0x24d   : > { %2474 = vst.msk [vmem:[#allocation2 + $0x24] sm:$0xf] %vm2464_vm13, %v2387_v21  ;;  %v2385_v26 = vpop.permute.xlu0 %2384  ;;  %v2964_v28 = vpop.permute.xlu2 %2963  ;;  %v3258_v30 = vsel %vm4879_vm6, %v3256_v16, %v3257_v17  ;;  %v4281_v16 = vld [vmem:[%s4694_s19 + $0x30] sm:$0xe]  ;;  %v4329_v17 = vrot.slane %v4293_v10, 9 }
 0x24e   : > { %2473 = vst.msk [vmem:[#allocation2 + $0x20] sm:$0xf] %vm2464_vm13, %v2385_v26  ;;  %v2600_v33 = vor.u32 %v2599_v20, %v2596_v19  ;;  %v3255_v37 = vsel %vm4879_vm6, %v4337_v22, %v3254_v7  ;;  %v4260_v22 = vld [vmem:[%s4694_s19 + $0x9c] sm:$0xf] }
 0x250   : > { %v2601_v41 = vrot.slane %v2600_v33, 4  ;;  %v4295_v33 = vld [vmem:[%s4694_s19 + $0x68] sm:$0x1] }
 0x252   : > { %2424 = vrot.lane.b32.xlu1 %v4223_v31, %s4647_s25 }
 0x253   : > { %2410 = vrot.lane.b32.xlu0 %v4216_v36, %s4647_s25  ;;  %2408 = vrot.lane.b32.xlu2 %v4215_v38, %s4647_s25  ;;  %v2699_v36 = vshll.u32 %v4246_v24, 16  ;;  %v2693_v38 = vshll.u32 %v4245_v29, 16  ;;  %v4325_v24 = vrot.slane %v4281_v16, 9  ;;  %v2813_v29 = vshll.u32 %v4260_v22, 16 }
 0x254   : > { %v2403_v44 = vpop.permute.xlu1 %2402 }
 0x255   : > { %2482 = vst.msk [vmem:[#allocation2 + $0x44] sm:$0xf] %vm2464_vm13, %v2403_v44  ;;  %v2401_v48 = vpop.permute.xlu0 %2400  ;;  %v3299_v52 = vpop.permute.xlu2 %3298  ;;  %v2701_v43 = vrot.slane %v2699_v36, 5  ;;  %v2705_v44 = vrot.slane %v2703_v34, 4  ;;  %v2815_v36 = vrot.slane %v2813_v29, 5 }
 0x256   : > { %2481 = vst.msk [vmem:[#allocation2 + $0x40] sm:$0xf] %vm2464_vm13, %v2401_v48  ;;  %v2695_v48 = vrot.slane %v2693_v38, 5  ;;  %v4273_v38 = vld [vmem:[%s4694_s19 + $0xd0] sm:$0xf] }
 0x257   : > { %3043 = vst.msk [vmem:[#allocation2 + $0x44] sm:$0xf] %vm3025_vm14, %v2964_v28  ;;  %v3229_v28 = vrot.slane %v4307_v18, 5  ;;  %v3198_v18 = vrot.slane %v4294_v12, 5  ;;  %v4308_v29 = vld [vmem:[%s4694_s19 + $0x9c] sm:$0xe] }
 0x258   : > { %v2696_v59 = vor.u32 %v2695_v48, %v2692_v47  ;;  %v2915_v47 = vshll.u32 %v4273_v38, 16  ;;  %v2919_v48 = vshrl.u32 %v4273_v38, 16  ;;  %v4237_v38 = vld [vmem:[%s4694_s19 + $0x40] sm:$0xf] }
 0x259   : > { %v3230_v40 = vsel %vm4879_vm6, %v3228_v27, %v3229_v28  ;;  %v3199_v27 = vsel %vm4879_vm6, %v4329_v17, %v3198_v18  ;;  %v2810_v28 = vshrl.u32 %v4260_v22, 16  ;;  %v4309_v17 = vld [vmem:[%s4694_s19 + $0xa0] sm:$0xf]  ;;  %v4320_v22 = vld [vmem:[%s4694_s19 + $0xcc] sm:$0xe] }
 0x25a   : > { %2971 = vrot.lane.b32.xlu1 %v2808_v53, %s4648_s26  ;;  %v2606_v53 = vsel %vm4705_vm2, %v2601_v41, %v2605_v42  ;;  %v2697_v3 = vrot.slane %v2696_v59, 4  ;;  %v3201_v41 = vrot.slane %v4295_v33, 5  ;;  %v2921_v59 = vrot.slane %v2919_v48, 4  ;;  %v4249_v48 = vld [vmem:[%s4694_s19 + $0x70] sm:$0xf] }
 0x25b   : > { %2969 = vrot.lane.b32.xlu0 %v2798_v55, %s4648_s26  ;;  %2426 = vrot.lane.b32.xlu2 %v4224_v60, %s4647_s25  ;;  %v2706_v55 = vor.u32 %v2705_v44, %v2701_v43  ;;  %v2610_v60 = vor.u32 %v2609_v50, %v2605_v42  ;;  %v2812_v35 = vrot.slane %v2810_v28, 4  ;;  %v4272_v42 = vld [vmem:[%s4694_s19 + $0xcc] sm:$0xf]  ;;  %v4218_v44 = vld [vmem:[%s4694_s19 + $0xa0] sm:$0xf] }
 0x25c   : > { %v2962_v54 = vpop.permute.xlu1 %2961  ;;  %v2702_v11 = vsel %vm4705_vm2, %v2697_v3, %v2701_v43  ;;  %v2906_v50 = vshrl.u32 %v4272_v42, 16 }
 0x25d   : > { %3042 = vst.msk [vmem:[#allocation2 + $0x40] sm:$0xf] %vm3025_vm14, %v2962_v54  ;;  %v2419_v6 = vpop.permute.xlu0 %2418  ;;  %v3317_v8 = vpop.permute.xlu2 %3316  ;;  %v2707_v0 = vrot.slane %v2706_v55, 4  ;;  %v2611_v2 = vrot.slane %v2610_v60, 4  ;;  %v4274_v60 = vld [vmem:[%s4694_s19 + $0xd4] sm:$0x1] }
 0x25e   : > { %2490 = vst.msk [vmem:[#allocation2 + $0x64] sm:$0xf] %vm2464_vm13, %v2419_v6 }
 0x25f   : > { %3379 = vst.msk [vmem:[#allocation2 + $0x40] sm:$0xf] %vm3362_vm15, %v3299_v52  ;;  %v4235_v52 = vld [vmem:[%s4694_s19 + $0x38] sm:$0x1] }
 0x260   : > { %v2613_v62 = vshll.u32 %v4235_v52, 16  ;;  %v2823_v52 = vshrl.u32 %v4261_v32, 16  ;;  %v4334_v32 = vrot.slane %v4308_v29, 9 }
 0x262   : > { %3306 = vrot.lane.b32.xlu1 %v3227_v9, %s4649_s27  ;;  %v2615_v7 = vrot.slane %v2613_v62, 5  ;;  %v2712_v9 = vsel %vm4705_vm2, %v2707_v0, %v2711_v1  ;;  %v2908_v62 = vrot.slane %v2906_v50, 4 }
 0x263   : > { %2987 = vrot.lane.b32.xlu0 %v2904_v13, %s4648_s26  ;;  %2985 = vrot.lane.b32.xlu2 %v2894_v15, %s4648_s26  ;;  %v3170_v13 = vrot.slane %v4282_v4, 5  ;;  %v4262_v4 = vld [vmem:[%s4694_s19 + $0xa4] sm:$0x1] }
 0x264   : > { %v2980_v21 = vpop.permute.xlu1 %2979  ;;  %v2616_v15 = vsel %vm4705_vm2, %v2611_v2, %v2615_v7  ;;  %v2925_v2 = vshll.u32 %v4274_v60, 16  ;;  %v4226_v7 = vld [vmem:[%s4694_s19 + $0xd0] sm:$0xf] }
 0x265   : > { %3051 = vst.msk [vmem:[#allocation2 + $0x64] sm:$0xf] %vm3025_vm14, %v2980_v21  ;;  %v2978_v26 = vpop.permute.xlu0 %2977  ;;  %v2946_v31 = vpop.permute.xlu2 %2945  ;;  %v3172_v20 = vrot.slane %v3170_v13, 4  ;;  %v3173_v21 = vrot.slane %v4283_v14, 5 }
 0x266   : > { %3050 = vst.msk [vmem:[#allocation2 + $0x60] sm:$0xf] %vm3025_vm14, %v2978_v26 }
 0x267   : > { %3388 = vst.msk [vmem:[#allocation2 + $0x64] sm:$0xf] %vm3362_vm15, %v3317_v8 }
 0x268   : > { %3034 = vst.msk [vmem:[#allocation2 + $0x20] sm:$0xf] %vm3025_vm14, %v2946_v31  ;;  %v3171_v31 = vsel %vm4879_vm6, %v4325_v24, %v3170_v13  ;;  %v2927_v13 = vrot.slane %v2925_v2, 5  ;;  %v4321_v24 = vld [vmem:[%s4694_s19 + $0xd0] sm:$0xf] }
 0x26a   : > { %3324 = vrot.lane.b32.xlu1 %v3258_v30, %s4649_s27  ;;  %v3174_v30 = vsel %vm4879_vm6, %v3172_v20, %v3173_v21 }
 0x26b   : > { %3322 = vrot.lane.b32.xlu0 %v3255_v37, %s4649_s27  ;;  %3308 = vrot.lane.b32.xlu2 %v3230_v40, %s4649_s27  ;;  %v3200_v40 = vrot.slane %v3198_v18, 4 }
 0x26c   : > { %v3315_v45 = vpop.permute.xlu1 %3314 }
 0x26d   : > { %3387 = vst.msk [vmem:[#allocation2 + $0x60] sm:$0xf] %vm3362_vm15, %v3315_v45  ;;  %v3301_v49 = vpop.permute.xlu0 %3300  ;;  %v3269_v51 = vpop.permute.xlu2 %3268  ;;  %v2816_v45 = vor.u32 %v2815_v36, %v2812_v35 }
 0x26e   : > { %3380 = vst.msk [vmem:[#allocation2 + $0x44] sm:$0xf] %vm3362_vm15, %v3301_v49  ;;  %v4217_v49 = vld [vmem:[%s4694_s19 + $0x9c] sm:$0xf] }
 0x26f   : > { %v2817_v55 = vrot.slane %v2816_v45, 4  ;;  %v2631_v45 = vshrl.u32 %v4237_v38, 16 }
 0x272   : > { %2937 = vrot.lane.b32.xlu1 %v2606_v53, %s4648_s26  ;;  %v3202_v53 = vsel %vm4879_vm6, %v3200_v40, %v3201_v41 }
 0x273   : > { %2394 = vrot.lane.b32.xlu0 %v4208_v58, %s4647_s25  ;;  %2392 = vrot.lane.b32.xlu2 %v4207_v56, %s4647_s25  ;;  %v2917_v58 = vrot.slane %v2915_v47, 5  ;;  %v4322_v47 = vld [vmem:[%s4694_s19 + $0xd4] sm:$0x1] }
 0x274   : > { %v2932_v61 = vpop.permute.xlu1 %2931  ;;  %v4482_v54 = vld [vmem:[#allocation2 + $0x60] sm:$0xff]  ;;  %v3264_v60 = vrot.slane %v4322_v47, 5 }
 0x275   : > { %3027 = vst.msk [vmem:[#allocation2 + $0x4] sm:$0xf] %vm3025_vm14, %v2932_v61  ;;  %v2930_v5 = vpop.permute.xlu0 %2929  ;;  %v4478_v6 = vld [vmem:[#allocation2 + $0x40] sm:$0xff]  ;;  %3659 = vmatmul.bf16.vlgmr.msra.gmra.mxu3 %v4482_v54  ;;  %v2405_v8 = vpop.permute.xlu2 %2404  ;;  %v2825_v54 = vrot.slane %v2823_v52, 4 }
 0x276   : > { %3026 = vst.msk [vmem:[#allocation2] sm:$0xf] %vm3025_vm14, %v2930_v5  ;;  %3639 = vmatmul.bf16.vlgmr.msra.gmra.mxu2 %v4478_v6  ;;  %v2822_v5 = vsel %vm4705_vm2, %v2817_v55, %v2821_v57  ;;  %v2922_v6 = vor.u32 %v2921_v59, %v2917_v58 }
 0x277   : > { %3364 = vst.msk [vmem:[#allocation2 + $0x4] sm:$0xf] %vm3362_vm15, %v3269_v51  ;;  %v2909_v51 = vshll.u32 %v4272_v42, 16  ;;  %v2826_v10 = vor.u32 %v2825_v54, %v2821_v57  ;;  %v2633_v57 = vrot.slane %v2631_v45, 4 }
 0x278   : > { %2483 = vst.msk [vmem:[#allocation2 + $0x48] sm:$0xf] %vm2464_vm13, %v2405_v8  ;;  %v2923_v12 = vrot.slane %v2922_v6, 4  ;;  %v4209_v6 = vld [vmem:[%s4694_s19 + $0x6c] sm:$0xf] }
 0x279   : > { %v2911_v0 = vrot.slane %v2909_v51, 5  ;;  %v2827_v18 = vrot.slane %v2826_v10, 4  ;;  %v4238_v51 = vld [vmem:[%s4694_s19 + $0x44] sm:$0x1]  ;;  %v2727_v10 = vshrl.u32 %v4249_v48, 16 }
 0x27a   : > { %2955 = vrot.lane.b32.xlu1 %v2712_v9, %s4648_s26  ;;  %v4225_v9 = vld [vmem:[%s4694_s19 + $0xcc] sm:$0xf]  ;;  %v2928_v21 = vsel %vm4705_vm2, %v2923_v12, %v2927_v13 }
 0x27b   : > { %2953 = vrot.lane.b32.xlu0 %v2702_v11, %s4648_s26  ;;  %2939 = vrot.lane.b32.xlu2 %v2616_v15, %s4648_s26  ;;  %v2912_v8 = vor.u32 %v2911_v0, %v2908_v62  ;;  %v2829_v11 = vshll.u32 %v4262_v4, 16 }
 0x27c   : > { %v3267_v19 = vpop.permute.xlu1 %3266 }
 0x27d   : > { %3363 = vst.msk [vmem:[#allocation2] sm:$0xf] %vm3362_vm15, %v3267_v19  ;;  %v2948_v23 = vpop.permute.xlu0 %2947  ;;  %v2423_v26 = vpop.permute.xlu2 %2422  ;;  %v2913_v15 = vrot.slane %v2912_v8, 4  ;;  %v2831_v19 = vrot.slane %v2829_v11, 5 }
 0x27e   : > { %3035 = vst.msk [vmem:[#allocation2 + $0x24] sm:$0xf] %vm3025_vm14, %v2948_v23 }
 0x27f   : > { %2492 = vst.msk [vmem:[#allocation2 + $0x6c] sm:$0xf] %vm2464_vm13, %v2423_v26  ;;  %v2918_v23 = vsel %vm4705_vm2, %v2913_v15, %v2917_v58  ;;  %v3233_v26 = vrot.slane %v4309_v17, 5  ;;  %v2832_v28 = vsel %vm4705_vm2, %v2827_v18, %v2831_v19  ;;  %v4236_v58 = vld [vmem:[%s4694_s19 + $0x3c] sm:$0xf] }
 0x280   : > { %v2618_v62 = vshrl.u32 %v4236_v58, 16  ;;  %v2621_v0 = vshll.u32 %v4236_v58, 16 }
 0x281   : > { %v3235_v35 = vrot.slane %v3233_v26, 4  ;;  %v3234_v46 = vsel %vm4879_vm6, %v4334_v32, %v3233_v26  ;;  %v4297_v32 = vld [vmem:[%s4694_s19 + $0x70] sm:$0xf] }
 0x282   : > { %3290 = vrot.lane.b32.xlu1 %v3199_v27, %s4649_s27  ;;  %v4310_v27 = vld [vmem:[%s4694_s19 + $0xa4] sm:$0x1]  ;;  %v2620_v4 = vrot.slane %v2618_v62, 4 }
 0x283   : > { %3276 = vrot.lane.b32.xlu0 %v3174_v30, %s4649_s27  ;;  %3274 = vrot.lane.b32.xlu2 %v3171_v31, %s4649_s27  ;;  %v4338_v30 = vrot.slane %v4320_v22, 9  ;;  %v3261_v31 = vrot.slane %v4321_v24, 5  ;;  %v3236_v36 = vrot.slane %v4310_v27, 5  ;;  %v2729_v22 = vrot.slane %v2727_v10, 4  ;;  %v4286_v27 = vld [vmem:[%s4694_s19 + $0x44] sm:$0x1] }
 0x284   : > { %v3285_v34 = vpop.permute.xlu1 %3284  ;;  %v4470_v37 = vld [vmem:[#allocation2] sm:$0xff] }
 0x285   : > { %3372 = vst.msk [vmem:[#allocation2 + $0x24] sm:$0xf] %vm3362_vm15, %v3285_v34  ;;  %v3283_v39 = vpop.permute.xlu0 %3282  ;;  %3599 = vmatmul.bf16.vlgmr.msra.gmra.mxu0 %v4470_v37  ;;  %v2982_v43 = vpop.permute.xlu2 %2981  ;;  %v4248_v34 = vld [vmem:[%s4694_s19 + $0x6c] sm:$0xf]  ;;  %v3262_v40 = vsel %vm4879_vm6, %v4338_v30, %v3261_v31 }
 0x286   : > { %3371 = vst.msk [vmem:[#allocation2 + $0x20] sm:$0xf] %vm3362_vm15, %v3283_v39  ;;  %v2714_v41 = vshrl.u32 %v4248_v34, 16  ;;  %v2717_v42 = vshll.u32 %v4248_v34, 16 }
 0x288   : > { %v2719_v50 = vrot.slane %v2717_v42, 5 }
 0x28a   : > { %2414 = vrot.lane.b32.xlu1 %v4218_v44, %s4647_s25  ;;  %v2627_v44 = vshll.u32 %v4237_v38, 16 }
 0x28b   : > { %2412 = vrot.lane.b32.xlu0 %v4217_v49, %s4647_s25  ;;  %3292 = vrot.lane.b32.xlu2 %v3202_v53, %s4649_s27  ;;  %v2716_v49 = vrot.slane %v2714_v41, 4 }
 0x28c   : > { %v2421_v56 = vpop.permute.xlu1 %2420  ;;  %v2629_v55 = vrot.slane %v2627_v44, 5  ;;  %v4298_v44 = vld [vmem:[%s4694_s19 + $0x74] sm:$0x1] }
 0x28d   : > { %2491 = vst.msk [vmem:[#allocation2 + $0x68] sm:$0xf] %vm2464_vm13, %v2421_v56  ;;  %v2407_v1 = vpop.permute.xlu0 %2406  ;;  %v4474_v61 = vld [vmem:[#allocation2 + $0x20] sm:$0xff]  ;;  %v3305_v3 = vpop.permute.xlu2 %3304  ;;  %v3263_v56 = vrot.slane %v3261_v31, 4  ;;  %v2720_v54 = vor.u32 %v2719_v50, %v2716_v49  ;;  %v3208_v50 = vrot.slane %v4298_v44, 5 }
 0x28e   : > { %2484 = vst.msk [vmem:[#allocation2 + $0x4c] sm:$0xf] %vm2464_vm13, %v2407_v1  ;;  %3619 = vmatmul.bf16.vlgmr.msra.gmra.mxu1 %v4474_v61  ;;  %v4210_v61 = vld [vmem:[%s4694_s19 + $0x70] sm:$0xf]  ;;  %v2634_v2 = vor.u32 %v2633_v57, %v2629_v55 }
 0x28f   : > { %3052 = vst.msk [vmem:[#allocation2 + $0x68] sm:$0xf] %vm3025_vm14, %v2982_v43  ;;  %v3237_v43 = vsel %vm4879_vm6, %v3235_v35, %v3236_v36  ;;  %v3265_v8 = vsel %vm4879_vm6, %v3263_v56, %v3264_v60  ;;  %v2721_v11 = vrot.slane %v2720_v54, 4  ;;  %v3180_v35 = vrot.slane %v4286_v27, 5 }
 0x292   : > { %2973 = vrot.lane.b32.xlu1 %v2822_v5, %s4648_s26  ;;  %v2623_v5 = vrot.slane %v2621_v0, 5 }
 0x293   : > { %2430 = vrot.lane.b32.xlu0 %v4226_v7, %s4647_s25  ;;  %2428 = vrot.lane.b32.xlu2 %v4225_v9, %s4647_s25  ;;  %v2637_v7 = vshll.u32 %v4238_v51, 16 }
 0x294   : > { %v2968_v14 = vpop.permute.xlu1 %2967  ;;  %v2624_v9 = vor.u32 %v2623_v5, %v2620_v4 }
 0x295   : > { %3045 = vst.msk [vmem:[#allocation2 + $0x4c] sm:$0xf] %vm3025_vm14, %v2968_v14  ;;  %v2966_v16 = vpop.permute.xlu0 %2965  ;;  %v2391_v20 = vpop.permute.xlu2 %2390  ;;  %v2635_v14 = vrot.slane %v2634_v2, 4  ;;  %v2639_v15 = vrot.slane %v2637_v7, 5 }
 0x296   : > { %3044 = vst.msk [vmem:[#allocation2 + $0x48] sm:$0xf] %vm3025_vm14, %v2966_v16  ;;  %v4285_v16 = vld [vmem:[%s4694_s19 + $0x40] sm:$0xf]  ;;  %v2625_v19 = vrot.slane %v2624_v9, 4 }
 0x297   : > { %3382 = vst.msk [vmem:[#allocation2 + $0x4c] sm:$0xf] %vm3362_vm15, %v3305_v3  ;;  %v2723_v3 = vshll.u32 %v4249_v48, 16  ;;  %v3177_v24 = vrot.slane %v4285_v16, 5  ;;  %v2640_v26 = vsel %vm4705_vm2, %v2635_v14, %v2639_v15  ;;  %v6156_v14 = vld [vmem:[%s6292_s2] ss:$0 sm:$0xff] }
 0x298   : > { %2476 = vst.msk [vmem:[#allocation2 + $0x2c] sm:$0xf] %vm2464_vm13, %v2391_v20  ;;  %v2630_v29 = vsel %vm4705_vm2, %v2625_v19, %v2629_v55 }
 0x299   : > { %v2725_v12 = vrot.slane %v2723_v3, 5 }
 0x29a   : > { %2991 = vrot.lane.b32.xlu1 %v2928_v21, %s4648_s26  ;;  %v4250_v21 = vld [vmem:[%s4694_s19 + $0x74] sm:$0x1] }
 0x29b   : > { %2989 = vrot.lane.b32.xlu0 %v2918_v23, %s4648_s26  ;;  %2975 = vrot.lane.b32.xlu2 %v2832_v28, %s4648_s26  ;;  %v2726_v23 = vsel %vm4705_vm2, %v2721_v11, %v2725_v12  ;;  %v4284_v28 = vld [vmem:[%s4694_s19 + $0x3c] sm:$0xe]  ;;  %v2730_v30 = vor.u32 %v2729_v22, %v2725_v12  ;;  %v2733_v31 = vshll.u32 %v4250_v21, 16 }
 0x29c   : > { %v3303_v33 = vpop.permute.xlu1 %3302  ;;  %v4326_v34 = vrot.slane %v4284_v28, 9 }
 0x29d   : > { %3381 = vst.msk [vmem:[#allocation2 + $0x48] sm:$0xf] %vm3362_vm15, %v3303_v33  ;;  %v2984_v37 = vpop.permute.xlu0 %2983  ;;  %v2950_v39 = vpop.permute.xlu2 %2949  ;;  %v3179_v33 = vrot.slane %v3177_v24, 4  ;;  %v2731_v38 = vrot.slane %v2730_v30, 4 }
 0x29e   : > { %3053 = vst.msk [vmem:[#allocation2 + $0x6c] sm:$0xf] %vm3025_vm14, %v2984_v37  ;;  %v3178_v42 = vsel %vm4879_vm6, %v4326_v34, %v3177_v24 }
 0x29f   : > { %3036 = vst.msk [vmem:[#allocation2 + $0x28] sm:$0xf] %vm3025_vm14, %v2950_v39  ;;  %v2735_v39 = vrot.slane %v2733_v31, 5  ;;  %v3181_v41 = vsel %vm4879_vm6, %v3179_v33, %v3180_v35 }
 0x2a1   : > { %v2736_v45 = vsel %vm4705_vm2, %v2731_v38, %v2735_v39  ;;  %vm3904_vm2 = vcmask 60416  }
 0x2a2   : > { %3326 = vrot.lane.b32.xlu1 %v3262_v40, %s4649_s27 }
 0x2a3   : > { %3312 = vrot.lane.b32.xlu0 %v3237_v43, %s4649_s27  ;;  %3310 = vrot.lane.b32.xlu2 %v3234_v46, %s4649_s27  ;;  %v3205_v43 = vrot.slane %v4297_v32, 5  ;;  %v4296_v46 = vld [vmem:[%s4694_s19 + $0x6c] sm:$0xe] }
 0x2a4   : > { %v3321_v52 = vpop.permute.xlu1 %3320  ;;  %v4479_v53 = vld [vmem:[#allocation2 + $0x48] sm:$0xff] }
 0x2a5   : > { %3390 = vst.msk [vmem:[#allocation2 + $0x6c] sm:$0xf] %vm3362_vm15, %v3321_v52  ;;  %v3319_v59 = vpop.permute.xlu0 %3318  ;;  %3644 = vmatmul.bf16.gmra.mxu2 %v4479_v53  ;;  %v3273_v1 = vpop.permute.xlu2 %3272  ;;  %v3207_v49 = vrot.slane %v3205_v43, 4  ;;  %v4330_v52 = vrot.slane %v4296_v46, 9 }
 0x2a6   : > { %3389 = vst.msk [vmem:[#allocation2 + $0x68] sm:$0xf] %vm3362_vm15, %v3319_v59 }
 0x2a7   : > { %v3209_v53 = vsel %vm4879_vm6, %v3207_v49, %v3208_v50  ;;  %v3206_v55 = vsel %vm4879_vm6, %v4330_v52, %v3205_v43 }
 0x2aa   : > { %2398 = vrot.lane.b32.xlu1 %v4210_v61, %s4647_s25 }
 0x2ab   : > { %2396 = vrot.lane.b32.xlu0 %v4209_v6, %s4647_s25  ;;  %3328 = vrot.lane.b32.xlu2 %v3265_v8, %s4649_s27 }
 0x2ac   : > { %v2936_v13 = vpop.permute.xlu1 %2935 }
 0x2ad   : > { %3029 = vst.msk [vmem:[#allocation2 + $0xc] sm:$0xf] %vm3025_vm14, %v2936_v13  ;;  %v2934_v17 = vpop.permute.xlu0 %2933  ;;  %v4483_v18 = vld [vmem:[#allocation2 + $0x68] sm:$0xff]  ;;  %v2409_v20 = vpop.permute.xlu2 %2408 }
 0x2ae   : > { %3028 = vst.msk [vmem:[#allocation2 + $0x8] sm:$0xf] %vm3025_vm14, %v2934_v17  ;;  %3664 = vmatmul.bf16.gmra.mxu3 %v4483_v18 }
 0x2af   : > { %3366 = vst.msk [vmem:[#allocation2 + $0xc] sm:$0xf] %vm3362_vm15, %v3273_v1 }
 0x2b0   : > { %2485 = vst.msk [vmem:[#allocation2 + $0x50] sm:$0xf] %vm2464_vm13, %v2409_v20 }
 0x2b2   : > { %2957 = vrot.lane.b32.xlu1 %v2726_v23, %s4648_s26 }
 0x2b3   : > { %2943 = vrot.lane.b32.xlu0 %v2640_v26, %s4648_s26  ;;  %2941 = vrot.lane.b32.xlu2 %v2630_v29, %s4648_s26 }
 0x2b4   : > { %v3271_v36 = vpop.permute.xlu1 %3270 }
 0x2b5   : > { %3365 = vst.msk [vmem:[#allocation2 + $0x8] sm:$0xf] %vm3362_vm15, %v3271_v36  ;;  %v2952_v37 = vpop.permute.xlu0 %2951  ;;  %v2427_v40 = vpop.permute.xlu2 %2426 }
 0x2b6   : > { %3037 = vst.msk [vmem:[#allocation2 + $0x2c] sm:$0xf] %vm3025_vm14, %v2952_v37 }
 0x2b7   : > { %2494 = vst.msk [vmem:[#allocation2 + $0x74] sm:$0xf] %vm2464_vm13, %v2427_v40 }
 0x2ba   : > { %3280 = vrot.lane.b32.xlu1 %v3181_v41, %s4649_s27 }
 0x2bb   : > { %3278 = vrot.lane.b32.xlu0 %v3178_v42, %s4649_s27  ;;  %2959 = vrot.lane.b32.xlu2 %v2736_v45, %s4648_s26  ;;  %s6173_s26 = scalar_lea.vmem %s6293_s3, %s4469_s23 }
 0x2bc   : > { %v3289_v47 = vpop.permute.xlu1 %3288  ;;  %v4471_v48 = vld [vmem:[#allocation2 + $0x8] sm:$0xff] }
 0x2bd   : > { %3374 = vst.msk [vmem:[#allocation2 + $0x2c] sm:$0xf] %vm3362_vm15, %v3289_v47  ;;  %v3287_v51 = vpop.permute.xlu0 %3286  ;;  %3604 = vmatmul.bf16.gmra.mxu0 %v4471_v48  ;;  %v2986_v25 = vpop.permute.xlu2 %2985 }
 0x2be   : > { %3373 = vst.msk [vmem:[#allocation2 + $0x28] sm:$0xf] %vm3362_vm15, %v3287_v51 }
 0x2c3   : > { %3296 = vrot.lane.b32.xlu0 %v3209_v53, %s4649_s27  ;;  %3294 = vrot.lane.b32.xlu2 %v3206_v55, %s4649_s27 }
 0x2c4   : > { %v2425_v57 = vpop.permute.xlu1 %2424 }
 0x2c5   : > { %2493 = vst.msk [vmem:[#allocation2 + $0x70] sm:$0xf] %vm2464_vm13, %v2425_v57  ;;  %v2411_v58 = vpop.permute.xlu0 %2410  ;;  %v4475_v59 = vld [vmem:[#allocation2 + $0x28] sm:$0xff]  ;;  %v3309_v56 = vpop.permute.xlu2 %3308 }
 0x2c6   : > { %2486 = vst.msk [vmem:[#allocation2 + $0x54] sm:$0xf] %vm2464_vm13, %v2411_v58  ;;  %3624 = vmatmul.bf16.gmra.mxu1 %v4475_v59 }
 0x2c7   : > { %3054 = vst.msk [vmem:[#allocation2 + $0x70] sm:$0xf] %vm3025_vm14, %v2986_v25 }
 0x2cc   : > { %v2972_v60 = vpop.permute.xlu1 %2971 }
 0x2cd   : > { %3047 = vst.msk [vmem:[#allocation2 + $0x54] sm:$0xf] %vm3025_vm14, %v2972_v60  ;;  %v2970_v63 = vpop.permute.xlu0 %2969  ;;  %v2393_v62 = vpop.permute.xlu2 %2392 }
 0x2ce   : > { %3046 = vst.msk [vmem:[#allocation2 + $0x50] sm:$0xf] %vm3025_vm14, %v2970_v63 }
 0x2cf   : > { %3384 = vst.msk [vmem:[#allocation2 + $0x54] sm:$0xf] %vm3362_vm15, %v3309_v56 }
 0x2d0   : > { %2477 = vst.msk [vmem:[#allocation2 + $0x30] sm:$0xf] %vm2464_vm13, %v2393_v62 }
 0x2d4   : > { %v3307_v0 = vpop.permute.xlu1 %3306 }
 0x2d5   : > { %3383 = vst.msk [vmem:[#allocation2 + $0x50] sm:$0xf] %vm3362_vm15, %v3307_v0  ;;  %v2988_v1 = vpop.permute.xlu0 %2987  ;;  %v2940_v61 = vpop.permute.xlu2 %2939 }
 0x2d6   : > { %3055 = vst.msk [vmem:[#allocation2 + $0x74] sm:$0xf] %vm3025_vm14, %v2988_v1 }
 0x2d7   : > { %3031 = vst.msk [vmem:[#allocation2 + $0x14] sm:$0xf] %vm3025_vm14, %v2940_v61 }
 0x2dc   : > { %v3325_v54 = vpop.permute.xlu1 %3324  ;;  %v4480_v3 = vld [vmem:[#allocation2 + $0x50] sm:$0xff] }
 0x2dd   : > { %3392 = vst.msk [vmem:[#allocation2 + $0x74] sm:$0xf] %vm3362_vm15, %v3325_v54  ;;  %v3323_v4 = vpop.permute.xlu0 %3322  ;;  %3649 = vmatmul.bf16.gmra.mxu2 %v4480_v3  ;;  %v3275_v5 = vpop.permute.xlu2 %3274 }
 0x2de   : > { %3391 = vst.msk [vmem:[#allocation2 + $0x70] sm:$0xf] %vm3362_vm15, %v3323_v4 }
 0x2e4   : > { %v2938_v6 = vpop.permute.xlu1 %2937 }
 0x2e5   : > { %3030 = vst.msk [vmem:[#allocation2 + $0x10] sm:$0xf] %vm3025_vm14, %v2938_v6  ;;  %v2395_v2 = vpop.permute.xlu0 %2394  ;;  %v4484_v7 = vld [vmem:[#allocation2 + $0x70] sm:$0xff]  ;;  %v3293_v8 = vpop.permute.xlu2 %3292 }
 0x2e6   : > { %2478 = vst.msk [vmem:[#allocation2 + $0x34] sm:$0xf] %vm2464_vm13, %v2395_v2  ;;  %3669 = vmatmul.bf16.gmra.mxu3 %v4484_v7 }
 0x2e7   : > { %3367 = vst.msk [vmem:[#allocation2 + $0x10] sm:$0xf] %vm3362_vm15, %v3275_v5 }
 0x2ec   : > { %v2956_v9 = vpop.permute.xlu1 %2955 }
 0x2ed   : > { %3039 = vst.msk [vmem:[#allocation2 + $0x34] sm:$0xf] %vm3025_vm14, %v2956_v9  ;;  %v2954_v10 = vpop.permute.xlu0 %2953  ;;  %v2429_v11 = vpop.permute.xlu2 %2428 }
 0x2ee   : > { %3038 = vst.msk [vmem:[#allocation2 + $0x30] sm:$0xf] %vm3025_vm14, %v2954_v10 }
 0x2ef   : > { %3376 = vst.msk [vmem:[#allocation2 + $0x34] sm:$0xf] %vm3362_vm15, %v3293_v8 }
 0x2f0   : > { %2495 = vst.msk [vmem:[#allocation2 + $0x78] sm:$0xf] %vm2464_vm13, %v2429_v11 }
 0x2f4   : > { %v3291_v12 = vpop.permute.xlu1 %3290 }
 0x2f5   : > { %3375 = vst.msk [vmem:[#allocation2 + $0x30] sm:$0xf] %vm3362_vm15, %v3291_v12  ;;  %v3277_v13 = vpop.permute.xlu0 %3276  ;;  %v2976_v15 = vpop.permute.xlu2 %2975 }
 0x2f6   : > { %3368 = vst.msk [vmem:[#allocation2 + $0x14] sm:$0xf] %vm3362_vm15, %v3277_v13 }
 0x2f8   : > { %v3660_v16 = vpop.f32.mrf.mxu3 }
 0x2f9   : > { %v3640_v17 = vpop.f32.mrf.mxu2  ;;  %v3661_v18 = vadd.f32 %v6156_v14, %v3660_v16 }
 0x2fa   : > { %v3641_v19 = vadd.f32 %v6156_v14, %v3640_v17 }
 0x2fb   : > { %v3736_v20 = vmin.f32 %v3661_v18, 0.0  ;;  %vm3704_vm0 = vcmp.gt.f32.partialorder %v3661_v18, 0.0 }
 0x2fc   : > { %v2415_v21 = vpop.permute.xlu1 %2414  ;;  %v4476_v22 = vld [vmem:[#allocation2 + $0x30] sm:$0xff]  ;;  %v3728_v23 = vmin.f32 %v3641_v19, 0.0  ;;  %vm3696_vm1 = vcmp.gt.f32.partialorder %v3641_v19, 0.0 }
 0x2fd   : > { %2488 = vst.msk [vmem:[#allocation2 + $0x5c] sm:$0xf] %vm2464_vm13, %v2415_v21  ;;  %v2413_v24 = vpop.permute.xlu0 %2412  ;;  %v4472_v26 = vld [vmem:[#allocation2 + $0x10] sm:$0xff]  ;;  %v3792_v27 = vmul.f32 1.442695, %v3736_v20  ;;  %3629 = vmatmul.bf16.gmra.mxu1 %v4476_v22  ;;  %v3311_v28 = vpop.permute.xlu2 %3310 }
 0x2fe   : > { %2487 = vst.msk [vmem:[#allocation2 + $0x58] sm:$0xf] %vm2464_vm13, %v2413_v24  ;;  %v3776_v29 = vmul.f32 1.442695, %v3728_v23  ;;  %3609 = vmatmul.bf16.gmra.mxu0 %v4472_v26 }
 0x2ff   : > { %3049 = vst.msk [vmem:[#allocation2 + $0x5c] sm:$0xf] %vm3025_vm14, %v2976_v15  ;;  %4553 = vpow2.f32 %v3792_v27 }
 0x300   : > { %4555 = vpow2.f32 %v3776_v29  ;;  %v3662_v30 = vpop.f32.mrf.mxu3 }
 0x301   : > { %v3642_v31 = vpop.f32.mrf.mxu2  ;;  %v3663_v33 = vadd.f32 %v6156_v14, %v3662_v30 }
 0x302   : > { %v3643_v35 = vadd.f32 %v6156_v14, %v3642_v31  ;;  %v3600_v36 = vpop.f32.mrf.mxu0 }
 0x303   : > { %v3737_v34 = vmin.f32 %v3663_v33, 0.0  ;;  %v3601_v32 = vadd.f32 %v6156_v14, %v3600_v36  ;;  %vm3705_vm3 = vcmp.gt.f32.partialorder %v3663_v33, 0.0 }
 0x304   : > { %v2974_v37 = vpop.permute.xlu1 %2973  ;;  %v3729_v38 = vmin.f32 %v3643_v35, 0.0  ;;  %vm3697_vm4 = vcmp.gt.f32.partialorder %v3643_v35, 0.0 }
 0x305   : > { %3048 = vst.msk [vmem:[#allocation2 + $0x58] sm:$0xf] %vm3025_vm14, %v2974_v37  ;;  %v2431_v39 = vpop.permute.xlu0 %2430  ;;  %v4554_v40 = vpop.eup %4553  ;;  %v3794_v41 = vmul.f32 1.442695, %v3737_v34  ;;  %v3712_v42 = vmin.f32 %v3601_v32, 0.0  ;;  %vm3680_vm5 = vcmp.gt.f32.partialorder %v3601_v32, 0.0 }
 0x306   : > { %2496 = vst.msk [vmem:[#allocation2 + $0x7c] sm:$0xf] %vm2464_vm13, %v2431_v39  ;;  %v3329_v43 = vpop.permute.xlu2 %3328  ;;  %v4556_v44 = vpop.eup %4555  ;;  %v4459_v45 = vadd.f32 -1.0, %v4554_v40  ;;  %v3778_v46 = vmul.f32 1.442695, %v3729_v38 }
 0x307   : > { %3385 = vst.msk [vmem:[#allocation2 + $0x58] sm:$0xf] %vm3362_vm15, %v3311_v28  ;;  %v4451_v47 = vadd.f32 -1.0, %v4556_v44  ;;  %4557 = vpow2.f32 %v3794_v41  ;;  %v3744_v48 = vmul.f32 1.442695, %v3712_v42 }
 0x308   : > { %v3864_v49 = vsel %vm3704_vm0, %v3661_v18, %v4459_v45  ;;  %4559 = vpow2.f32 %v3778_v46 }
 0x309   : > { %v3856_v50 = vsel %vm3696_vm1, %v3641_v19, %v4451_v47  ;;  %v3896_v51 = vpack.c.bf16 %v3864_v49, %v3864_v49  ;;  %4561 = vpow2.f32 %v3744_v48 }
 0x30a   : > { %v3888_v52 = vpack.c.bf16 %v3856_v50, %v3856_v50  ;;  %v3602_v25 = vpop.f32.mrf.mxu0 }
 0x30b   : > { %3929 = vst.msk [vmem:[%s6173_s26 + $0x60] sm:$0xf] %vm3904_vm2, %v3896_v51  ;;  %v3603_v55 = vadd.f32 %v6156_v14, %v3602_v25  ;;  %v3620_v57 = vpop.f32.mrf.mxu1 }
 0x30c   : > { %v2992_v53 = vpop.permute.xlu1 %2991  ;;  %3921 = vst.msk [vmem:[%s6173_s26 + $0x40] sm:$0xf] %vm3904_vm2, %v3888_v52  ;;  %v3621_v59 = vadd.f32 %v6156_v14, %v3620_v57 }
 0x30d   : > { %v2990_v58 = vpop.permute.xlu0 %2989  ;;  %v4558_v56 = vpop.eup %4557  ;;  %3057 = vst.msk [vmem:[#allocation2 + $0x7c] sm:$0xf] %vm3025_vm14, %v2992_v53  ;;  %v3713_v60 = vmin.f32 %v3603_v55, 0.0  ;;  %vm3681_vm6 = vcmp.gt.f32.partialorder %v3603_v55, 0.0 }
 0x30e   : > { %v2942_v63 = vpop.permute.xlu2 %2941  ;;  %v4560_v62 = vpop.eup %4559  ;;  %v4460_v0 = vadd.f32 -1.0, %v4558_v56  ;;  %3056 = vst.msk [vmem:[#allocation2 + $0x78] sm:$0xf] %vm3025_vm14, %v2990_v58  ;;  %v3720_v1 = vmin.f32 %v3621_v59, 0.0  ;;  %vm3688_vm7 = vcmp.gt.f32.partialorder %v3621_v59, 0.0 }
 0x30f   : > { %v4562_v61 = vpop.eup %4561  ;;  %v4452_v54 = vadd.f32 -1.0, %v4560_v62  ;;  %v3746_v3 = vmul.f32 1.442695, %v3713_v60  ;;  %3394 = vst.msk [vmem:[#allocation2 + $0x7c] sm:$0xf] %vm3362_vm15, %v3329_v43 }
 0x310   : > { %v3865_v4 = vsel %vm3705_vm3, %v3663_v33, %v4460_v0  ;;  %v4435_v5 = vadd.f32 -1.0, %v4562_v61  ;;  %v3760_v6 = vmul.f32 1.442695, %v3720_v1  ;;  %3032 = vst.msk [vmem:[#allocation2 + $0x18] sm:$0xf] %vm3025_vm14, %v2942_v63 }
 0x311   : > { %v3857_v2 = vsel %vm3697_vm4, %v3643_v35, %v4452_v54  ;;  %v3897_v7 = vpack.c.bf16 %v3865_v4, %v3865_v4  ;;  %4563 = vpow2.f32 %v3746_v3 }
 0x312   : > { %v3889_v8 = vpack.c.bf16 %v3857_v2, %v3857_v2  ;;  %v3840_v9 = vsel %vm3680_vm5, %v3601_v32, %v4435_v5  ;;  %4565 = vpow2.f32 %v3760_v6 }
 0x313   : > { %3930 = vst.msk [vmem:[%s6173_s26 + $0x64] sm:$0xf] %vm3904_vm2, %v3897_v7  ;;  %v3872_v10 = vpack.c.bf16 %v3840_v9, %v3840_v9  ;;  %v3622_v12 = vpop.f32.mrf.mxu1 }
 0x314   : > { %v3327_v11 = vpop.permute.xlu1 %3326  ;;  %3922 = vst.msk [vmem:[%s6173_s26 + $0x44] sm:$0xf] %vm3904_vm2, %v3889_v8  ;;  %v3623_v15 = vadd.f32 %v6156_v14, %v3622_v12 }
 0x315   : > { %v3313_v13 = vpop.permute.xlu0 %3312  ;;  %3905 = vst.msk [vmem:[%s6173_s26] sm:$0xf] %vm3904_vm2, %v3872_v10 }
 0x316   : > { %3393 = vst.msk [vmem:[#allocation2 + $0x78] sm:$0xf] %vm3362_vm15, %v3327_v11  ;;  %v3721_v16 = vmin.f32 %v3623_v15, 0.0  ;;  %v2960_v23 = vpop.permute.xlu2 %2959  ;;  %vm3689_vm8 = vcmp.gt.f32.partialorder %v3623_v15, 0.0 }
 0x317   : > { %v4564_v17 = vpop.eup %4563  ;;  %3386 = vst.msk [vmem:[#allocation2 + $0x5c] sm:$0xf] %vm3362_vm15, %v3313_v13 }
 0x318   : > { %v4566_v18 = vpop.eup %4565  ;;  %v4436_v19 = vadd.f32 -1.0, %v4564_v17  ;;  %v3762_v20 = vmul.f32 1.442695, %v3721_v16 }
 0x319   : > { %v4443_v21 = vadd.f32 -1.0, %v4566_v18 }
 0x31a   : > { %v3841_v22 = vsel %vm3681_vm6, %v3603_v55, %v4436_v19  ;;  %4567 = vpow2.f32 %v3762_v20 }
 0x31b   : > { %v3873_v24 = vpack.c.bf16 %v3841_v22, %v3841_v22  ;;  %v3848_v26 = vsel %vm3688_vm7, %v3621_v59, %v4443_v21 }
 0x31c   : > { %v2399_v27 = vpop.permute.xlu1 %2398  ;;  %v3880_v28 = vpack.c.bf16 %v3848_v26, %v3848_v26 }
 0x31d   : > { %2480 = vst.msk [vmem:[#allocation2 + $0x3c] sm:$0xf] %vm2464_vm13, %v2399_v27  ;;  %v2397_v29 = vpop.permute.xlu0 %2396  ;;  %v4485_v30 = vld [vmem:[#allocation2 + $0x78] sm:$0xff] }
 0x31e   : > { %3906 = vst.msk [vmem:[%s6173_s26 + $0x4] sm:$0xf] %vm3904_vm2, %v3873_v24  ;;  %v4481_v31 = vld [vmem:[#allocation2 + $0x58] sm:$0xff]  ;;  %3674 = vmatmul.bf16.gmra.mxu3 %v4485_v30  ;;  %v3295_v38 = vpop.permute.xlu2 %3294 }
 0x31f   : > { %3913 = vst.msk [vmem:[%s6173_s26 + $0x20] sm:$0xf] %vm3904_vm2, %v3880_v28  ;;  %3654 = vmatmul.bf16.gmra.mxu2 %v4481_v31 }
 0x320   : > { %2479 = vst.msk [vmem:[#allocation2 + $0x38] sm:$0xf] %vm2464_vm13, %v2397_v29  ;;  %v4568_v33 = vpop.eup %4567 }
 0x321   : > { %3041 = vst.msk [vmem:[#allocation2 + $0x3c] sm:$0xf] %vm3025_vm14, %v2960_v23  ;;  %v4444_v35 = vadd.f32 -1.0, %v4568_v33 }
 0x323   : > { %v3849_v36 = vsel %vm3689_vm8, %v3623_v15, %v4444_v35 }
 0x324   : > { %v2958_v34 = vpop.permute.xlu1 %2957  ;;  %v3881_v37 = vpack.c.bf16 %v3849_v36, %v3849_v36 }
 0x325   : > { %3040 = vst.msk [vmem:[#allocation2 + $0x38] sm:$0xf] %vm3025_vm14, %v2958_v34  ;;  %v2944_v32 = vpop.permute.xlu0 %2943 }
 0x326   : > { %3033 = vst.msk [vmem:[#allocation2 + $0x1c] sm:$0xf] %vm3025_vm14, %v2944_v32 }
 0x327   : > { %3914 = vst.msk [vmem:[%s6173_s26 + $0x24] sm:$0xf] %vm3904_vm2, %v3881_v37 }
 0x328   : > { %3377 = vst.msk [vmem:[#allocation2 + $0x38] sm:$0xf] %vm3362_vm15, %v3295_v38  ;;  %v3645_v39 = vpop.f32.mrf.mxu2 }
 0x329   : > { %v3646_v40 = vadd.f32 %v6156_v14, %v3645_v39 }
 0x32b   : > { %v3730_v41 = vmin.f32 %v3646_v40, 0.0  ;;  %vm3698_vm9 = vcmp.gt.f32.partialorder %v3646_v40, 0.0 }
 0x32c   : > { %v3281_v42 = vpop.permute.xlu1 %3280 }
 0x32d   : > { %3370 = vst.msk [vmem:[#allocation2 + $0x1c] sm:$0xf] %vm3362_vm15, %v3281_v42  ;;  %v3279_v43 = vpop.permute.xlu0 %3278  ;;  %v3780_v44 = vmul.f32 1.442695, %v3730_v41 }
 0x32e   : > { %3369 = vst.msk [vmem:[#allocation2 + $0x18] sm:$0xf] %vm3362_vm15, %v3279_v43 }
 0x32f   : > { %4569 = vpow2.f32 %v3780_v44 }
 0x330   : > { %v3647_v45 = vpop.f32.mrf.mxu2 }
 0x331   : > { %v3648_v46 = vadd.f32 %v6156_v14, %v3647_v45  ;;  %v3665_v47 = vpop.f32.mrf.mxu3 }
 0x332   : > { %v3666_v48 = vadd.f32 %v6156_v14, %v3665_v47 }
 0x333   : > { %v3731_v49 = vmin.f32 %v3648_v46, 0.0  ;;  %vm3699_vm10 = vcmp.gt.f32.partialorder %v3648_v46, 0.0 }
 0x334   : > { %v3738_v50 = vmin.f32 %v3666_v48, 0.0  ;;  %vm3706_vm11 = vcmp.gt.f32.partialorder %v3666_v48, 0.0 }
 0x335   : > { %v3297_v51 = vpop.permute.xlu0 %3296  ;;  %v4473_v52 = vld [vmem:[#allocation2 + $0x18] sm:$0xff]  ;;  %v4570_v25 = vpop.eup %4569  ;;  %v3782_v53 = vmul.f32 1.442695, %v3731_v49 }
 0x336   : > { %3378 = vst.msk [vmem:[#allocation2 + $0x3c] sm:$0xf] %vm3362_vm15, %v3297_v51  ;;  %v4453_v55 = vadd.f32 -1.0, %v4570_v25  ;;  %v3796_v57 = vmul.f32 1.442695, %v3738_v50  ;;  %3614 = vmatmul.bf16.gmra.mxu0 %v4473_v52 }
 0x337   : > { %4571 = vpow2.f32 %v3782_v53 }
 0x338   : > { %v3858_v58 = vsel %vm3698_vm9, %v3646_v40, %v4453_v55  ;;  %4573 = vpow2.f32 %v3796_v57 }
 0x339   : > { %v3890_v59 = vpack.c.bf16 %v3858_v58, %v3858_v58  ;;  %v3667_v56 = vpop.f32.mrf.mxu3 }
 0x33a   : > { %v3668_v60 = vadd.f32 %v6156_v14, %v3667_v56  ;;  %v3605_v63 = vpop.f32.mrf.mxu0 }
 0x33b   : > { %3923 = vst.msk [vmem:[%s6173_s26 + $0x48] sm:$0xf] %vm3904_vm2, %v3890_v59  ;;  %v3606_v62 = vadd.f32 %v6156_v14, %v3605_v63 }
 0x33c   : > { %v3739_v0 = vmin.f32 %v3668_v60, 0.0  ;;  %vm3707_vm12 = vcmp.gt.f32.partialorder %v3668_v60, 0.0 }
 0x33d   : > { %v4477_v1 = vld [vmem:[#allocation2 + $0x38] sm:$0xff]  ;;  %v4572_v61 = vpop.eup %4571  ;;  %v3714_v54 = vmin.f32 %v3606_v62, 0.0  ;;  %vm3682_vm13 = vcmp.gt.f32.partialorder %v3606_v62, 0.0 }
 0x33e   : > { %v4574_v3 = vpop.eup %4573  ;;  %v4454_v4 = vadd.f32 -1.0, %v4572_v61  ;;  %v3798_v5 = vmul.f32 1.442695, %v3739_v0  ;;  %3634 = vmatmul.bf16.gmra.mxu1 %v4477_v1 }
 0x33f   : > { %v4461_v6 = vadd.f32 -1.0, %v4574_v3  ;;  %v3748_v2 = vmul.f32 1.442695, %v3714_v54 }
 0x340   : > { %v3859_v7 = vsel %vm3699_vm10, %v3648_v46, %v4454_v4  ;;  %4575 = vpow2.f32 %v3798_v5 }
 0x341   : > { %v3891_v8 = vpack.c.bf16 %v3859_v7, %v3859_v7  ;;  %v3866_v9 = vsel %vm3706_vm11, %v3666_v48, %v4461_v6  ;;  %4577 = vpow2.f32 %v3748_v2 }
 0x342   : > { %v3898_v10 = vpack.c.bf16 %v3866_v9, %v3866_v9  ;;  %v3607_v11 = vpop.f32.mrf.mxu0 }
 0x343   : > { %3924 = vst.msk [vmem:[%s6173_s26 + $0x4c] sm:$0xf] %vm3904_vm2, %v3891_v8  ;;  %v3608_v12 = vadd.f32 %v6156_v14, %v3607_v11  ;;  %v3625_v13 = vpop.f32.mrf.mxu1 }
 0x344   : > { %3931 = vst.msk [vmem:[%s6173_s26 + $0x68] sm:$0xf] %vm3904_vm2, %v3898_v10  ;;  %v3626_v15 = vadd.f32 %v6156_v14, %v3625_v13 }
 0x345   : > { %v3715_v16 = vmin.f32 %v3608_v12, 0.0  ;;  %vm3683_vm14 = vcmp.gt.f32.partialorder %v3608_v12, 0.0 }
 0x346   : > { %v4576_v17 = vpop.eup %4575  ;;  %v3722_v18 = vmin.f32 %v3626_v15, 0.0  ;;  %vm3690_vm15 = vcmp.gt.f32.partialorder %v3626_v15, 0.0 }
 0x347   : > { %v4578_v19 = vpop.eup %4577  ;;  %v4462_v20 = vadd.f32 -1.0, %v4576_v17  ;;  %v3750_v21 = vmul.f32 1.442695, %v3715_v16 }
 0x348   : > { %v4437_v22 = vadd.f32 -1.0, %v4578_v19  ;;  %v3764_v23 = vmul.f32 1.442695, %v3722_v18 }
 0x349   : > { %v3867_v24 = vsel %vm3707_vm12, %v3668_v60, %v4462_v20  ;;  %4579 = vpow2.f32 %v3750_v21 }
 0x34a   : > { %v3899_v26 = vpack.c.bf16 %v3867_v24, %v3867_v24  ;;  %v3842_v27 = vsel %vm3682_vm13, %v3606_v62, %v4437_v22  ;;  %4581 = vpow2.f32 %v3764_v23 }
 0x34b   : > { %v3874_v28 = vpack.c.bf16 %v3842_v27, %v3842_v27  ;;  %v3627_v29 = vpop.f32.mrf.mxu1 }
 0x34c   : > { %3932 = vst.msk [vmem:[%s6173_s26 + $0x6c] sm:$0xf] %vm3904_vm2, %v3899_v26  ;;  %v3628_v30 = vadd.f32 %v6156_v14, %v3627_v29 }
 0x34d   : > { %3907 = vst.msk [vmem:[%s6173_s26 + $0x8] sm:$0xf] %vm3904_vm2, %v3874_v28 }
 0x34e   : > { %v3723_v31 = vmin.f32 %v3628_v30, 0.0  ;;  %vm3691_vm0 = vcmp.gt.f32.partialorder %v3628_v30, 0.0 }
 0x34f   : > { %v4580_v33 = vpop.eup %4579 }
 0x350   : > { %v4582_v35 = vpop.eup %4581  ;;  %v4438_v36 = vadd.f32 -1.0, %v4580_v33  ;;  %v3766_v34 = vmul.f32 1.442695, %v3723_v31 }
 0x351   : > { %v4445_v37 = vadd.f32 -1.0, %v4582_v35 }
 0x352   : > { %v3843_v32 = vsel %vm3683_vm14, %v3608_v12, %v4438_v36  ;;  %4583 = vpow2.f32 %v3766_v34 }
 0x353   : > { %v3875_v38 = vpack.c.bf16 %v3843_v32, %v3843_v32  ;;  %v3850_v39 = vsel %vm3690_vm15, %v3626_v15, %v4445_v37 }
 0x354   : > { %v3882_v40 = vpack.c.bf16 %v3850_v39, %v3850_v39 }
 0x355   : > { %3908 = vst.msk [vmem:[%s6173_s26 + $0xc] sm:$0xf] %vm3904_vm2, %v3875_v38 }
 0x356   : > { %3915 = vst.msk [vmem:[%s6173_s26 + $0x28] sm:$0xf] %vm3904_vm2, %v3882_v40 }
 0x358   : > { %v4584_v41 = vpop.eup %4583 }
 0x359   : > { %v4446_v42 = vadd.f32 -1.0, %v4584_v41 }
 0x35b   : > { %v3851_v43 = vsel %vm3691_vm0, %v3628_v30, %v4446_v42 }
 0x35c   : > { %v3883_v44 = vpack.c.bf16 %v3851_v43, %v3851_v43 }
 0x35e   : > { %3916 = vst.msk [vmem:[%s6173_s26 + $0x2c] sm:$0xf] %vm3904_vm2, %v3883_v44 }
 0x360   : > { %v3650_v45 = vpop.f32.mrf.mxu2 }
 0x361   : > { %v3651_v46 = vadd.f32 %v6156_v14, %v3650_v45 }
 0x363   : > { %v3732_v47 = vmin.f32 %v3651_v46, 0.0  ;;  %vm3700_vm1 = vcmp.gt.f32.partialorder %v3651_v46, 0.0 }
 0x365   : > { %v3784_v48 = vmul.f32 1.442695, %v3732_v47 }
 0x367   : > { %4585 = vpow2.f32 %v3784_v48 }
 0x368   : > { %v3652_v49 = vpop.f32.mrf.mxu2 }
 0x369   : > { %v3653_v50 = vadd.f32 %v6156_v14, %v3652_v49  ;;  %v3670_v51 = vpop.f32.mrf.mxu3 }
 0x36a   : > { %v3671_v52 = vadd.f32 %v6156_v14, %v3670_v51 }
 0x36b   : > { %v3733_v25 = vmin.f32 %v3653_v50, 0.0  ;;  %vm3701_vm3 = vcmp.gt.f32.partialorder %v3653_v50, 0.0 }
 0x36c   : > { %v3740_v53 = vmin.f32 %v3671_v52, 0.0  ;;  %vm3708_vm4 = vcmp.gt.f32.partialorder %v3671_v52, 0.0 }
 0x36d   : > { %v4586_v55 = vpop.eup %4585  ;;  %v3786_v57 = vmul.f32 1.442695, %v3733_v25 }
 0x36e   : > { %v4455_v58 = vadd.f32 -1.0, %v4586_v55  ;;  %v3800_v59 = vmul.f32 1.442695, %v3740_v53 }
 0x36f   : > { %4587 = vpow2.f32 %v3786_v57 }
 0x370   : > { %v3860_v56 = vsel %vm3700_vm1, %v3651_v46, %v4455_v58  ;;  %4589 = vpow2.f32 %v3800_v59 }
 0x371   : > { %v3892_v60 = vpack.c.bf16 %v3860_v56, %v3860_v56  ;;  %v3672_v63 = vpop.f32.mrf.mxu3 }
 0x372   : > { %v3673_v62 = vadd.f32 %v6156_v14, %v3672_v63 }
 0x373   : > { %3925 = vst.msk [vmem:[%s6173_s26 + $0x50] sm:$0xf] %vm3904_vm2, %v3892_v60 }
 0x374   : > { %v3741_v0 = vmin.f32 %v3673_v62, 0.0  ;;  %vm3709_vm5 = vcmp.gt.f32.partialorder %v3673_v62, 0.0 }
 0x375   : > { %v4588_v1 = vpop.eup %4587 }
 0x376   : > { %v4590_v61 = vpop.eup %4589  ;;  %v4456_v54 = vadd.f32 -1.0, %v4588_v1  ;;  %v3802_v3 = vmul.f32 1.442695, %v3741_v0 }
 0x377   : > { %v4463_v4 = vadd.f32 -1.0, %v4590_v61 }
 0x378   : > { %v3861_v5 = vsel %vm3701_vm3, %v3653_v50, %v4456_v54  ;;  %4591 = vpow2.f32 %v3802_v3 }
 0x379   : > { %v3893_v6 = vpack.c.bf16 %v3861_v5, %v3861_v5  ;;  %v3868_v2 = vsel %vm3708_vm4, %v3671_v52, %v4463_v4 }
 0x37a   : > { %v3900_v7 = vpack.c.bf16 %v3868_v2, %v3868_v2  ;;  %v3630_v8 = vpop.f32.mrf.mxu1 }
 0x37b   : > { %3926 = vst.msk [vmem:[%s6173_s26 + $0x54] sm:$0xf] %vm3904_vm2, %v3893_v6  ;;  %v3610_v9 = vpop.f32.mrf.mxu0  ;;  %v3631_v10 = vadd.f32 %v6156_v14, %v3630_v8 }
 0x37c   : > { %3933 = vst.msk [vmem:[%s6173_s26 + $0x70] sm:$0xf] %vm3904_vm2, %v3900_v7  ;;  %v3611_v11 = vadd.f32 %v6156_v14, %v3610_v9 }
 0x37d   : > { %v3724_v12 = vmin.f32 %v3631_v10, 0.0  ;;  %vm3692_vm6 = vcmp.gt.f32.partialorder %v3631_v10, 0.0 }
 0x37e   : > { %v4592_v13 = vpop.eup %4591  ;;  %v3716_v15 = vmin.f32 %v3611_v11, 0.0  ;;  %vm3684_vm7 = vcmp.gt.f32.partialorder %v3611_v11, 0.0 }
 0x37f   : > { %v4464_v16 = vadd.f32 -1.0, %v4592_v13  ;;  %v3768_v17 = vmul.f32 1.442695, %v3724_v12 }
 0x380   : > { %v3752_v18 = vmul.f32 1.442695, %v3716_v15 }
 0x381   : > { %v3869_v19 = vsel %vm3709_vm5, %v3673_v62, %v4464_v16  ;;  %4593 = vpow2.f32 %v3768_v17 }
 0x382   : > { %v3901_v20 = vpack.c.bf16 %v3869_v19, %v3869_v19  ;;  %4595 = vpow2.f32 %v3752_v18  ;;  %v3632_v21 = vpop.f32.mrf.mxu1 }
 0x383   : > { %v3612_v22 = vpop.f32.mrf.mxu0  ;;  %v3633_v23 = vadd.f32 %v6156_v14, %v3632_v21 }
 0x384   : > { %3934 = vst.msk [vmem:[%s6173_s26 + $0x74] sm:$0xf] %vm3904_vm2, %v3901_v20  ;;  %v3613_v24 = vadd.f32 %v6156_v14, %v3612_v22 }
 0x385   : > { %v3725_v26 = vmin.f32 %v3633_v23, 0.0  ;;  %vm3693_vm8 = vcmp.gt.f32.partialorder %v3633_v23, 0.0 }
 0x386   : > { %v3717_v27 = vmin.f32 %v3613_v24, 0.0  ;;  %vm3685_vm9 = vcmp.gt.f32.partialorder %v3613_v24, 0.0 }
 0x387   : > { %v4594_v28 = vpop.eup %4593  ;;  %v3770_v29 = vmul.f32 1.442695, %v3725_v26 }
 0x388   : > { %v4596_v30 = vpop.eup %4595  ;;  %v4447_v31 = vadd.f32 -1.0, %v4594_v28  ;;  %v3754_v33 = vmul.f32 1.442695, %v3717_v27 }
 0x389   : > { %v4439_v35 = vadd.f32 -1.0, %v4596_v30  ;;  %4597 = vpow2.f32 %v3770_v29 }
 0x38a   : > { %v3852_v36 = vsel %vm3692_vm6, %v3631_v10, %v4447_v31  ;;  %4599 = vpow2.f32 %v3754_v33 }
 0x38b   : > { %v3844_v34 = vsel %vm3684_vm7, %v3611_v11, %v4439_v35  ;;  %v3884_v37 = vpack.c.bf16 %v3852_v36, %v3852_v36 }
 0x38c   : > { %v3876_v32 = vpack.c.bf16 %v3844_v34, %v3844_v34 }
 0x38d   : > { %3917 = vst.msk [vmem:[%s6173_s26 + $0x30] sm:$0xf] %vm3904_vm2, %v3884_v37 }
 0x38e   : > { %3909 = vst.msk [vmem:[%s6173_s26 + $0x10] sm:$0xf] %vm3904_vm2, %v3876_v32 }
 0x38f   : > { %v4598_v38 = vpop.eup %4597 }
 0x390   : > { %v4600_v39 = vpop.eup %4599  ;;  %v4448_v40 = vadd.f32 -1.0, %v4598_v38 }
 0x391   : > { %v4440_v41 = vadd.f32 -1.0, %v4600_v39 }
 0x392   : > { %v3853_v42 = vsel %vm3693_vm8, %v3633_v23, %v4448_v40 }
 0x393   : > { %v3845_v43 = vsel %vm3685_vm9, %v3613_v24, %v4440_v41  ;;  %v3885_v44 = vpack.c.bf16 %v3853_v42, %v3853_v42 }
 0x394   : > { %v3877_v45 = vpack.c.bf16 %v3845_v43, %v3845_v43 }
 0x395   : > { %3918 = vst.msk [vmem:[%s6173_s26 + $0x34] sm:$0xf] %vm3904_vm2, %v3885_v44 }
 0x396   : > { %3910 = vst.msk [vmem:[%s6173_s26 + $0x14] sm:$0xf] %vm3904_vm2, %v3877_v45 }
 0x3a1   : > { %v3675_v46 = vpop.f32.mrf.mxu3 }
 0x3a2   : > { %v3655_v47 = vpop.f32.mrf.mxu2  ;;  %v3676_v48 = vadd.f32 %v6156_v14, %v3675_v46 }
 0x3a3   : > { %v3656_v49 = vadd.f32 %v6156_v14, %v3655_v47 }
 0x3a4   : > { %v3742_v50 = vmin.f32 %v3676_v48, 0.0  ;;  %vm3710_vm10 = vcmp.gt.f32.partialorder %v3676_v48, 0.0 }
 0x3a5   : > { %v3734_v51 = vmin.f32 %v3656_v49, 0.0  ;;  %vm3702_vm11 = vcmp.gt.f32.partialorder %v3656_v49, 0.0 }
 0x3a6   : > { %v3804_v52 = vmul.f32 1.442695, %v3742_v50 }
 0x3a7   : > { %v3788_v25 = vmul.f32 1.442695, %v3734_v51 }
 0x3a8   : > { %4601 = vpow2.f32 %v3804_v52 }
 0x3a9   : > { %4603 = vpow2.f32 %v3788_v25  ;;  %v3677_v53 = vpop.f32.mrf.mxu3 }
 0x3aa   : > { %v3657_v55 = vpop.f32.mrf.mxu2  ;;  %v3678_v57 = vadd.f32 %v6156_v14, %v3677_v53 }
 0x3ab   : > { %v3658_v58 = vadd.f32 %v6156_v14, %v3657_v55 }
 0x3ac   : > { %v3743_v59 = vmin.f32 %v3678_v57, 0.0  ;;  %vm3711_vm12 = vcmp.gt.f32.partialorder %v3678_v57, 0.0 }
 0x3ad   : > { %v3735_v56 = vmin.f32 %v3658_v58, 0.0  ;;  %vm3703_vm13 = vcmp.gt.f32.partialorder %v3658_v58, 0.0 }
 0x3ae   : > { %v4602_v60 = vpop.eup %4601  ;;  %v3806_v63 = vmul.f32 1.442695, %v3743_v59 }
 0x3af   : > { %v4604_v62 = vpop.eup %4603  ;;  %v4465_v0 = vadd.f32 -1.0, %v4602_v60  ;;  %v3790_v1 = vmul.f32 1.442695, %v3735_v56 }
 0x3b0   : > { %v4457_v61 = vadd.f32 -1.0, %v4604_v62  ;;  %4605 = vpow2.f32 %v3806_v63 }
 0x3b1   : > { %v3870_v54 = vsel %vm3710_vm10, %v3676_v48, %v4465_v0  ;;  %4607 = vpow2.f32 %v3790_v1 }
 0x3b2   : > { %v3862_v3 = vsel %vm3702_vm11, %v3656_v49, %v4457_v61  ;;  %v3902_v4 = vpack.c.bf16 %v3870_v54, %v3870_v54 }
 0x3b3   : > { %v3615_v5 = vpop.f32.mrf.mxu0  ;;  %v3894_v6 = vpack.c.bf16 %v3862_v3, %v3862_v3 }
 0x3b4   : > { %v3616_v2 = vadd.f32 %v6156_v14, %v3615_v5  ;;  %3935 = vst.msk [vmem:[%s6173_s26 + $0x78] sm:$0xf] %vm3904_vm2, %v3902_v4 }
 0x3b5   : > { %3927 = vst.msk [vmem:[%s6173_s26 + $0x58] sm:$0xf] %vm3904_vm2, %v3894_v6 }
 0x3b6   : > { %v3718_v7 = vmin.f32 %v3616_v2, 0.0  ;;  %v4606_v8 = vpop.eup %4605  ;;  %vm3686_vm14 = vcmp.gt.f32.partialorder %v3616_v2, 0.0 }
 0x3b7   : > { %v4608_v9 = vpop.eup %4607  ;;  %v4466_v10 = vadd.f32 -1.0, %v4606_v8 }
 0x3b8   : > { %v3756_v11 = vmul.f32 1.442695, %v3718_v7  ;;  %v4458_v12 = vadd.f32 -1.0, %v4608_v9 }
 0x3b9   : > { %v3871_v13 = vsel %vm3711_vm12, %v3678_v57, %v4466_v10 }
 0x3ba   : > { %4609 = vpow2.f32 %v3756_v11  ;;  %v3863_v15 = vsel %vm3703_vm13, %v3658_v58, %v4458_v12  ;;  %v3903_v16 = vpack.c.bf16 %v3871_v13, %v3871_v13 }
 0x3bb   : > { %v3617_v17 = vpop.f32.mrf.mxu0  ;;  %v3635_v18 = vpop.f32.mrf.mxu1  ;;  %v3895_v19 = vpack.c.bf16 %v3863_v15, %v3863_v15 }
 0x3bc   : > { %v3618_v20 = vadd.f32 %v6156_v14, %v3617_v17  ;;  %v3636_v21 = vadd.f32 %v6156_v14, %v3635_v18  ;;  %3936 = vst.msk [vmem:[%s6173_s26 + $0x7c] sm:$0xf] %vm3904_vm2, %v3903_v16 }
 0x3bd   : > { %3928 = vst.msk [vmem:[%s6173_s26 + $0x5c] sm:$0xf] %vm3904_vm2, %v3895_v19 }
 0x3be   : > { %v3719_v22 = vmin.f32 %v3618_v20, 0.0  ;;  %v3726_v23 = vmin.f32 %v3636_v21, 0.0  ;;  %vm3687_vm15 = vcmp.gt.f32.partialorder %v3618_v20, 0.0  ;;  %vm3694_vm0 = vcmp.gt.f32.partialorder %v3636_v21, 0.0 }
 0x3c0   : > { %v4610_v24 = vpop.eup %4609  ;;  %v3758_v26 = vmul.f32 1.442695, %v3719_v22  ;;  %v3772_v27 = vmul.f32 1.442695, %v3726_v23 }
 0x3c1   : > { %v4441_v28 = vadd.f32 -1.0, %v4610_v24 }
 0x3c2   : > { %4611 = vpow2.f32 %v3758_v26 }
 0x3c3   : > { %v3846_v29 = vsel %vm3686_vm14, %v3616_v2, %v4441_v28  ;;  %4613 = vpow2.f32 %v3772_v27  ;;  %v3637_v30 = vpop.f32.mrf.mxu1 }
 0x3c4   : > { %v3878_v31 = vpack.c.bf16 %v3846_v29, %v3846_v29  ;;  %v3638_v33 = vadd.f32 %v6156_v14, %v3637_v30 }
 0x3c6   : > { %3911 = vst.msk [vmem:[%s6173_s26 + $0x18] sm:$0xf] %vm3904_vm2, %v3878_v31  ;;  %v3727_v35 = vmin.f32 %v3638_v33, 0.0  ;;  %vm3695_vm1 = vcmp.gt.f32.partialorder %v3638_v33, 0.0 }
 0x3c8   : > { %v4612_v36 = vpop.eup %4611  ;;  %v3774_v34 = vmul.f32 1.442695, %v3727_v35 }
 0x3c9   : > { %v4614_v37 = vpop.eup %4613  ;;  %v4442_v32 = vadd.f32 -1.0, %v4612_v36 }
 0x3ca   : > { %v4449_v38 = vadd.f32 -1.0, %v4614_v37  ;;  %4615 = vpow2.f32 %v3774_v34 }
 0x3cb   : > { %v3847_v39 = vsel %vm3687_vm15, %v3618_v20, %v4442_v32 }
 0x3cc   : > { %v3879_v40 = vpack.c.bf16 %v3847_v39, %v3847_v39  ;;  %v3854_v41 = vsel %vm3694_vm0, %v3636_v21, %v4449_v38 }
 0x3cd   : > { %v3886_v42 = vpack.c.bf16 %v3854_v41, %v3854_v41 }
 0x3ce   : > { %3912 = vst.msk [vmem:[%s6173_s26 + $0x1c] sm:$0xf] %vm3904_vm2, %v3879_v40 }
 0x3cf   : > { %3919 = vst.msk [vmem:[%s6173_s26 + $0x38] sm:$0xf] %vm3904_vm2, %v3886_v42 }
 0x3d0   : > { %v4616_v14 = vpop.eup %4615 }
 0x3d1   : > { %v4450_v43 = vadd.f32 -1.0, %v4616_v14 }
 0x3d3   : > { %v3855_v44 = vsel %vm3695_vm1, %v3638_v33, %v4450_v43 }
 0x3d4   : > { %v3887_v45 = vpack.c.bf16 %v3855_v44, %v3855_v44 }
 0x3d6   : > { %3920 = vst.msk [vmem:[%s6173_s26 + $0x3c] sm:$0xf] %vm3904_vm2, %v3887_v45 }
 0x3d7 PF: > { %s13_s14 = sadd.s32 1, %s4639_s14   ;;  %s6298_s12 = smov %s4635_s13 }
 0x3d8   : > { %p10_p5 = scmp.ge.s32.totalorder %s13_s14, 4   ;;  %s6299_s13 = smov %s6301_s15 }
 0x3da   :  { %12 = sbr.rel (!%p10_p5) target bundleno = 2 (0x2), region = 64 }

</bundles_post_ra>
